<compile_context>
chip_gen: v6e
topology: v6e:2x2x1
jax: 0.10.0
libtpu: 0.0.40
codegen_flags: <defaults>
</compile_context>

<pallas_src>
import jax
import jax.numpy as jnp
from jax.experimental import pallas as pl
from jax.experimental.pallas import tpu as pltpu

D_IN = 64 * 64      # 4096
D_HID = 256
D_LAT = 9
_LANE_CHUNK = 1024  # final matmul emitted in 4 chunks of 1024 output lanes


def _autoencoder_kernel(x_ref,
                        w1_ref, b1_ref,     # Linear(4096, 256)      (bf16 W, f32 b)
                        w23_ref, b23_ref,   # folded Linear(256,256) (bf16 W, f32 b)
                        w4_ref, b4_ref,     # Linear(256, 4096)      (bf16 W, f32 b)
                        o_ref):
    # x arrives straight from HBM as f32 (no separate cast pass); cast here.
    x = x_ref[...].astype(jnp.bfloat16)                         # [tb, 4096]

    # encoder layer 1 + ReLU (bf16 MXU, f32 accumulation)
    h1 = jnp.dot(x, w1_ref[...], preferred_element_type=jnp.float32) + b1_ref[...]
    h1 = jnp.maximum(h1, 0.0)

    # folded latent bottleneck (w2 @ w3 precomputed; exact fold), decoder ReLU
    h2 = jnp.dot(h1.astype(jnp.bfloat16), w23_ref[...],
                 preferred_element_type=jnp.float32) + b23_ref[...]
    h2 = jnp.maximum(h2, 0.0)
    h2 = h2.astype(jnp.bfloat16)                                # [tb, 256]

    # decoder output layer, statically chunked over the 4096 output lanes so
    # the f32 y intermediate is bounded to [tb, 1024] per chunk. Static ref
    # slices are zero-cost views; h2 (small, VMEM-resident) is reused.
    for c in range(D_IN // _LANE_CHUNK):
        lo = c * _LANE_CHUNK
        hi = lo + _LANE_CHUNK
        y = jnp.dot(h2, w4_ref[:, lo:hi], preferred_element_type=jnp.float32)
        y = y + b4_ref[:, lo:hi]
        o_ref[:, lo:hi] = y.astype(o_ref.dtype)


def _round_up(n, m):
    return ((n + m - 1) // m) * m


def _detect_small_vmem():
    """True on v7x-like chips (64 MiB VMEM per TensorCore). Conservative on failure."""
    try:
        kind = jax.devices()[0].device_kind.lower()
        if "v5" in kind or "v6" in kind:
            return False
        if "7" in kind:
            return True
    except Exception:
        pass
    try:
        return int(pltpu.get_tpu_info().vmem_capacity_bytes) <= (64 << 20)
    except Exception:
        return True  # conservative default: budget as if 64 MiB VMEM


def autoencoder_linear_forward(x, kparams, *, tb=None, out_dtype=jnp.float32):
    """x: [B, 4096] float32. kparams: dict from prepare_kernel_params().

    out_dtype: jnp.float32 (default, matches the module) or jnp.bfloat16
    (halves the dominant HBM writeback stream; opt in if downstream tolerates
    bf16 numerics for the reconstruction).
    """
    B, D = x.shape
    assert D == D_IN

    small_vmem = _detect_small_vmem()

    if tb is None:
        # v5e/v6e (128 MiB VMEM): big tiles amortize per-step overhead.
        # v7x (64 MiB VMEM): cap at 512 with f32 output so buffers fit.
        tb = 512 if small_vmem else 1024

    # Row alignment: 8 sublanes for f32 output, 16 for bf16-packed output.
    row_align = 16 if jnp.dtype(out_dtype) == jnp.dtype(jnp.bfloat16) else 8
    tb_eff = _round_up(min(tb, _round_up(B, row_align)), row_align)

    # v7x has 2 TensorCores: if the whole batch would be a single grid step,
    # split it so both cores get work under dimension_semantics=("parallel",).
    if small_vmem and pl.cdiv(B, tb_eff) == 1 and B > 2 * row_align:
        tb_eff = max(row_align, _round_up(pl.cdiv(B, 2), row_align))

    # No jnp.pad: Pallas masks writes of the partial last block and the
    # garbage rows read there never feed a cross-row reduction.
    grid = (pl.cdiv(B, tb_eff),)

    w1, b1 = kparams["w1"], kparams["b1"]       # [4096,256] bf16, [1,256]  f32
    w23, b23 = kparams["w23"], kparams["b23"]   # [256,256]  bf16, [1,256]  f32
    w4, b4 = kparams["w4"], kparams["b4"]       # [256,4096] bf16, [1,4096] f32

    full = lambda arr: pl.BlockSpec(arr.shape, lambda i: (0, 0))

    vmem_limit = (56 << 20) if small_vmem else (100 << 20)

    out = pl.pallas_call(
        _autoencoder_kernel,
        out_shape=jax.ShapeDtypeStruct((B, D_IN), out_dtype),
        grid_spec=pltpu.PrefetchScalarGridSpec(
            num_scalar_prefetch=0,
            grid=grid,
            in_specs=[
                pl.BlockSpec((tb_eff, D_IN), lambda i: (i, 0)),   # x (f32, cast in-kernel)
                full(w1), full(b1),
                full(w23), full(b23),
                full(w4), full(b4),
            ],
            out_specs=pl.BlockSpec((tb_eff, D_IN), lambda i: (i, 0)),
        ),
        compiler_params=pltpu.CompilerParams(
            dimension_semantics=("parallel",),   # batch axis -> megacore / dual-TC
            vmem_limit_bytes=vmem_limit,
        ),
    )(x, w1, b1, w23, b23, w4, b4)

    return out


def init_params(key):
    """PyTorch-Linear-style init (uniform ±1/sqrt(fan_in)); weights stored [in, out]."""
    def linear(k, fan_in, fan_out):
        kw, kb = jax.random.split(k)
        bound = 1.0 / jnp.sqrt(float(fan_in))
        w = jax.random.uniform(kw, (fan_in, fan_out), jnp.float32, -bound, bound)
        b = jax.random.uniform(kb, (1, fan_out), jnp.float32, -bound, bound)
        return w, b

    k1, k2, k3, k4 = jax.random.split(key, 4)
    w1, b1 = linear(k1, D_IN, D_HID)
    w2, b2 = linear(k2, D_HID, D_LAT)
    w3, b3 = linear(k3, D_LAT, D_HID)
    w4, b4 = linear(k4, D_HID, D_IN)
    return dict(w1=w1, b1=b1, w2=w2, b2=b2, w3=w3, b3=b3, w4=w4, b4=b4)


def prepare_kernel_params(p):
    """Fold the latent bottleneck (no nonlinearity between w2 and w3) and cast to bf16."""
    w23 = p["w2"] @ p["w3"]              # [256, 256] f32
    b23 = p["b2"] @ p["w3"] + p["b3"]    # [1, 256]   f32
    return dict(
        w1=p["w1"].astype(jnp.bfloat16), b1=p["b1"],
        w23=w23.astype(jnp.bfloat16),    b23=b23,
        w4=p["w4"].astype(jnp.bfloat16), b4=p["b4"],
    )


def reference_forward_matched(x, kp):
    """Pure-JAX reference using the same bf16 casts / fold as the kernel."""
    xb = x.astype(jnp.bfloat16)
    h1 = jnp.maximum(
        jnp.dot(xb, kp["w1"], preferred_element_type=jnp.float32) + kp["b1"], 0.0)
    h2 = jnp.maximum(
        jnp.dot(h1.astype(jnp.bfloat16), kp["w23"],
                preferred_element_type=jnp.float32) + kp["b23"], 0.0)
    return jnp.dot(h2.astype(jnp.bfloat16), kp["w4"],
                   preferred_element_type=jnp.float32) + kp["b4"]


def reference_forward_f32(x, p):
    """Original-module (unfolded, f32) semantics."""
    h = jnp.maximum(x @ p["w1"] + p["b1"], 0.0)
    z = h @ p["w2"] + p["b2"]
    h = jnp.maximum(z @ p["w3"] + p["b3"], 0.0)
    return h @ p["w4"] + p["b4"]


if __name__ == "__main__":
    key = jax.random.PRNGKey(0)
    kx, kp, kx2 = jax.random.split(key, 3)

    params = init_params(kp)
    kparams = prepare_kernel_params(params)

    # --- default path: f32 writeback, small batch ---
    B = 8
    x = jax.random.normal(kx, (B, D_IN), jnp.float32)
    out = jax.block_until_ready(autoencoder_linear_forward(x, kparams))
    assert out.shape == (B, D_IN) and out.dtype == jnp.float32

    # exact-semantics check vs a JAX impl using the same bf16 casts / fold
    ref_bf16 = reference_forward_matched(x, kparams)
    assert jnp.allclose(out, ref_bf16, atol=2e-3, rtol=2e-3), "mismatch vs bf16 reference"

    # sanity check vs original f32 module semantics (bf16 quantization noise)
    ref_f32 = reference_forward_f32(x, params)
    assert jnp.allclose(out, ref_f32, atol=2e-2, rtol=2e-2), "mismatch vs f32 reference"

    # --- optional bf16-writeback knob (halves the dominant HBM stream) ---
    B2 = 16
    x2 = jax.random.normal(kx2, (B2, D_IN), jnp.float32)
    out_bf16 = jax.block_until_ready(
        autoencoder_linear_forward(x2, kparams, out_dtype=jnp.bfloat16))
    assert out_bf16.shape == (B2, D_IN) and out_bf16.dtype == jnp.bfloat16
    ref2 = reference_forward_matched(x2, kparams)
    assert jnp.allclose(out_bf16.astype(jnp.float32), ref2, atol=2e-2, rtol=2e-2), \
        "mismatch vs bf16-output reference"

    print("KERNEL_OK")
</pallas_src>

<mosaic_0001>
module attributes {stable_mosaic.version = 11 : i64} {
  func.func @_autoencoder_kernel(%arg0: i32, %arg1: memref<8x4096xf32, #tpu.memory_space<vmem>>, %arg2: memref<4096x256xbf16, #tpu.memory_space<vmem>>, %arg3: memref<1x256xf32, #tpu.memory_space<vmem>>, %arg4: memref<256x256xbf16, #tpu.memory_space<vmem>>, %arg5: memref<1x256xf32, #tpu.memory_space<vmem>>, %arg6: memref<256x4096xbf16, #tpu.memory_space<vmem>>, %arg7: memref<1x4096xf32, #tpu.memory_space<vmem>>, %arg8: memref<8x4096xf32, #tpu.memory_space<vmem>>) attributes {dimension_semantics = [#tpu.dimension_semantics<parallel>], iteration_bounds = array<i64: 1>, scalar_prefetch = 0 : i64, scratch_operands = 0 : i64, tpu.core_type = #tpu.core_type<tc>, window_params = [{transform_indices = @transform_0, window_bounds = array<i64: 8, 4096>}, {pipeline_mode = #tpu.pipeline_mode<synchronous>, transform_indices = @transform_1, window_bounds = array<i64: 4096, 256>}, {pipeline_mode = #tpu.pipeline_mode<synchronous>, transform_indices = @transform_2, window_bounds = array<i64: 1, 256>}, {pipeline_mode = #tpu.pipeline_mode<synchronous>, transform_indices = @transform_3, window_bounds = array<i64: 256, 256>}, {pipeline_mode = #tpu.pipeline_mode<synchronous>, transform_indices = @transform_4, window_bounds = array<i64: 1, 256>}, {pipeline_mode = #tpu.pipeline_mode<synchronous>, transform_indices = @transform_5, window_bounds = array<i64: 256, 4096>}, {pipeline_mode = #tpu.pipeline_mode<synchronous>, transform_indices = @transform_6, window_bounds = array<i64: 1, 4096>}, {transform_indices = @transform_7, window_bounds = array<i64: 8, 4096>}]} {
    %c0 = arith.constant 0 : index
    %c0_0 = arith.constant 0 : index
    %0 = vector.load %arg1[%c0, %c0_0] : memref<8x4096xf32, #tpu.memory_space<vmem>>, vector<8x4096xf32>
    %1 = arith.truncf %0 : vector<8x4096xf32> to vector<8x4096xbf16>
    %c0_1 = arith.constant 0 : index
    %c0_2 = arith.constant 0 : index
    %2 = vector.load %arg2[%c0_1, %c0_2] : memref<4096x256xbf16, #tpu.memory_space<vmem>>, vector<4096x256xbf16>
    %cst = arith.constant dense<0.000000e+00> : vector<8x256xf32>
    %3 = tpu.matmul %1, %2, %cst {dimension_numbers = #tpu.dot_dimension_numbers<[1], [0], [0], [1], [0, 0, 1, 1], [], []>} : vector<8x4096xbf16>, vector<4096x256xbf16>, vector<8x256xf32> -> vector<8x256xf32>
    %c0_3 = arith.constant 0 : index
    %c0_4 = arith.constant 0 : index
    %4 = vector.load %arg3[%c0_3, %c0_4] : memref<1x256xf32, #tpu.memory_space<vmem>>, vector<1x256xf32>
    %5 = vector.broadcast %4 : vector<1x256xf32> to vector<8x256xf32>
    %6 = arith.addf %3, %5 : vector<8x256xf32>
    %cst_5 = arith.constant 0.000000e+00 : f32
    %7 = vector.broadcast %cst_5 : f32 to vector<8x256xf32>
    %8 = arith.maximumf %6, %7 : vector<8x256xf32>
    %9 = arith.truncf %8 : vector<8x256xf32> to vector<8x256xbf16>
    %c0_6 = arith.constant 0 : index
    %c0_7 = arith.constant 0 : index
    %10 = vector.load %arg4[%c0_6, %c0_7] : memref<256x256xbf16, #tpu.memory_space<vmem>>, vector<256x256xbf16>
    %cst_8 = arith.constant dense<0.000000e+00> : vector<8x256xf32>
    %11 = tpu.matmul %9, %10, %cst_8 {dimension_numbers = #tpu.dot_dimension_numbers<[1], [0], [0], [1], [0, 0, 1, 1], [], []>} : vector<8x256xbf16>, vector<256x256xbf16>, vector<8x256xf32> -> vector<8x256xf32>
    %c0_9 = arith.constant 0 : index
    %c0_10 = arith.constant 0 : index
    %12 = vector.load %arg5[%c0_9, %c0_10] : memref<1x256xf32, #tpu.memory_space<vmem>>, vector<1x256xf32>
    %13 = vector.broadcast %12 : vector<1x256xf32> to vector<8x256xf32>
    %14 = arith.addf %11, %13 : vector<8x256xf32>
    %cst_11 = arith.constant 0.000000e+00 : f32
    %15 = vector.broadcast %cst_11 : f32 to vector<8x256xf32>
    %16 = arith.maximumf %14, %15 : vector<8x256xf32>
    %17 = arith.truncf %16 : vector<8x256xf32> to vector<8x256xbf16>
    %c0_12 = arith.constant 0 : index
    %c0_13 = arith.constant 0 : index
    %18 = vector.load %arg6[%c0_12, %c0_13] : memref<256x4096xbf16, #tpu.memory_space<vmem>>, vector<256x1024xbf16>
    %cst_14 = arith.constant dense<0.000000e+00> : vector<8x1024xf32>
    %19 = tpu.matmul %17, %18, %cst_14 {dimension_numbers = #tpu.dot_dimension_numbers<[1], [0], [0], [1], [0, 0, 1, 1], [], []>} : vector<8x256xbf16>, vector<256x1024xbf16>, vector<8x1024xf32> -> vector<8x1024xf32>
    %c0_15 = arith.constant 0 : index
    %c0_16 = arith.constant 0 : index
    %20 = vector.load %arg7[%c0_15, %c0_16] : memref<1x4096xf32, #tpu.memory_space<vmem>>, vector<1x1024xf32>
    %21 = vector.broadcast %20 : vector<1x1024xf32> to vector<8x1024xf32>
    %22 = arith.addf %19, %21 : vector<8x1024xf32>
    %c0_17 = arith.constant 0 : index
    %c0_18 = arith.constant 0 : index
    %23 = vector.load %arg8[%c0_17, %c0_18] : memref<8x4096xf32, #tpu.memory_space<vmem>>, vector<8x1024xf32>
    tpu.vector_store %arg8[%c0_17, %c0_18], %22 {strides = array<i32>} : memref<8x4096xf32, #tpu.memory_space<vmem>>, vector<8x1024xf32>,
    %c0_19 = arith.constant 0 : index
    %c1024 = arith.constant 1024 : index
    %24 = vector.load %arg6[%c0_19, %c1024] : memref<256x4096xbf16, #tpu.memory_space<vmem>>, vector<256x1024xbf16>
    %cst_20 = arith.constant dense<0.000000e+00> : vector<8x1024xf32>
    %25 = tpu.matmul %17, %24, %cst_20 {dimension_numbers = #tpu.dot_dimension_numbers<[1], [0], [0], [1], [0, 0, 1, 1], [], []>} : vector<8x256xbf16>, vector<256x1024xbf16>, vector<8x1024xf32> -> vector<8x1024xf32>
    %c0_21 = arith.constant 0 : index
    %c1024_22 = arith.constant 1024 : index
    %26 = vector.load %arg7[%c0_21, %c1024_22] : memref<1x4096xf32, #tpu.memory_space<vmem>>, vector<1x1024xf32>
    %27 = vector.broadcast %26 : vector<1x1024xf32> to vector<8x1024xf32>
    %28 = arith.addf %25, %27 : vector<8x1024xf32>
    %c0_23 = arith.constant 0 : index
    %c1024_24 = arith.constant 1024 : index
    %29 = vector.load %arg8[%c0_23, %c1024_24] : memref<8x4096xf32, #tpu.memory_space<vmem>>, vector<8x1024xf32>
    tpu.vector_store %arg8[%c0_23, %c1024_24], %28 {strides = array<i32>} : memref<8x4096xf32, #tpu.memory_space<vmem>>, vector<8x1024xf32>,
    %c0_25 = arith.constant 0 : index
    %c2048 = arith.constant 2048 : index
    %30 = vector.load %arg6[%c0_25, %c2048] : memref<256x4096xbf16, #tpu.memory_space<vmem>>, vector<256x1024xbf16>
    %cst_26 = arith.constant dense<0.000000e+00> : vector<8x1024xf32>
    %31 = tpu.matmul %17, %30, %cst_26 {dimension_numbers = #tpu.dot_dimension_numbers<[1], [0], [0], [1], [0, 0, 1, 1], [], []>} : vector<8x256xbf16>, vector<256x1024xbf16>, vector<8x1024xf32> -> vector<8x1024xf32>
    %c0_27 = arith.constant 0 : index
    %c2048_28 = arith.constant 2048 : index
    %32 = vector.load %arg7[%c0_27, %c2048_28] : memref<1x4096xf32, #tpu.memory_space<vmem>>, vector<1x1024xf32>
    %33 = vector.broadcast %32 : vector<1x1024xf32> to vector<8x1024xf32>
    %34 = arith.addf %31, %33 : vector<8x1024xf32>
    %c0_29 = arith.constant 0 : index
    %c2048_30 = arith.constant 2048 : index
    %35 = vector.load %arg8[%c0_29, %c2048_30] : memref<8x4096xf32, #tpu.memory_space<vmem>>, vector<8x1024xf32>
    tpu.vector_store %arg8[%c0_29, %c2048_30], %34 {strides = array<i32>} : memref<8x4096xf32, #tpu.memory_space<vmem>>, vector<8x1024xf32>,
    %c0_31 = arith.constant 0 : index
    %c3072 = arith.constant 3072 : index
    %36 = vector.load %arg6[%c0_31, %c3072] : memref<256x4096xbf16, #tpu.memory_space<vmem>>, vector<256x1024xbf16>
    %cst_32 = arith.constant dense<0.000000e+00> : vector<8x1024xf32>
    %37 = tpu.matmul %17, %36, %cst_32 {dimension_numbers = #tpu.dot_dimension_numbers<[1], [0], [0], [1], [0, 0, 1, 1], [], []>} : vector<8x256xbf16>, vector<256x1024xbf16>, vector<8x1024xf32> -> vector<8x1024xf32>
    %c0_33 = arith.constant 0 : index
    %c3072_34 = arith.constant 3072 : index
    %38 = vector.load %arg7[%c0_33, %c3072_34] : memref<1x4096xf32, #tpu.memory_space<vmem>>, vector<1x1024xf32>
    %39 = vector.broadcast %38 : vector<1x1024xf32> to vector<8x1024xf32>
    %40 = arith.addf %37, %39 : vector<8x1024xf32>
    %c0_35 = arith.constant 0 : index
    %c3072_36 = arith.constant 3072 : index
    %41 = vector.load %arg8[%c0_35, %c3072_36] : memref<8x4096xf32, #tpu.memory_space<vmem>>, vector<8x1024xf32>
    tpu.vector_store %arg8[%c0_35, %c3072_36], %40 {strides = array<i32>} : memref<8x4096xf32, #tpu.memory_space<vmem>>, vector<8x1024xf32>,
    return
  }
  func.func @transform_0(%arg0: i32) -> (i32, i32) {
    %c0_i32 = arith.constant 0 : i32
    %c0_i32_0 = arith.constant 0 : i32
    return %arg0, %c0_i32 : i32, i32
  }
  func.func @transform_1(%arg0: i32) -> (i32, i32) {
    %c0_i32 = arith.constant 0 : i32
    %c0_i32_0 = arith.constant 0 : i32
    %c0_i32_1 = arith.constant 0 : i32
    return %c0_i32, %c0_i32_0 : i32, i32
  }
  func.func @transform_2(%arg0: i32) -> (i32, i32) {
    %c0_i32 = arith.constant 0 : i32
    %c0_i32_0 = arith.constant 0 : i32
    %c0_i32_1 = arith.constant 0 : i32
    return %c0_i32, %c0_i32_0 : i32, i32
  }
  func.func @transform_3(%arg0: i32) -> (i32, i32) {
    %c0_i32 = arith.constant 0 : i32
    %c0_i32_0 = arith.constant 0 : i32
    %c0_i32_1 = arith.constant 0 : i32
    return %c0_i32, %c0_i32_0 : i32, i32
  }
  func.func @transform_4(%arg0: i32) -> (i32, i32) {
    %c0_i32 = arith.constant 0 : i32
    %c0_i32_0 = arith.constant 0 : i32
    %c0_i32_1 = arith.constant 0 : i32
    return %c0_i32, %c0_i32_0 : i32, i32
  }
  func.func @transform_5(%arg0: i32) -> (i32, i32) {
    %c0_i32 = arith.constant 0 : i32
    %c0_i32_0 = arith.constant 0 : i32
    %c0_i32_1 = arith.constant 0 : i32
    return %c0_i32, %c0_i32_0 : i32, i32
  }
  func.func @transform_6(%arg0: i32) -> (i32, i32) {
    %c0_i32 = arith.constant 0 : i32
    %c0_i32_0 = arith.constant 0 : i32
    %c0_i32_1 = arith.constant 0 : i32
    return %c0_i32, %c0_i32_0 : i32, i32
  }
  func.func @transform_7(%arg0: i32) -> (i32, i32) {
    %c0_i32 = arith.constant 0 : i32
    %c0_i32_0 = arith.constant 0 : i32
    return %arg0, %c0_i32 : i32, i32
  }
}

</mosaic_0001>

<bundles_post_ra>
// kernel: tpu_custom_call.1
= control target key start
LH: loop header
LB: loop body
LE: loop exit
PB: predicated region body
PF: predicated region fallthrough
CT: control target
= control target key end

     0   :  { %12 = vsyncpa [#allocation3], 0  ;;  %s10410_s0 = inlined_call_operand.hbm [shape: f32[8,4096], index: 0, kind: input, shape index: {}]   ;;  %s10411_s1 = inlined_call_operand.hbm [shape: bf16[4096,256], index: 1, kind: input, shape index: {}]   ;;  %s10412_s2 = inlined_call_operand.hbm [shape: f32[1,256], index: 2, kind: input, shape index: {}]   ;;  %s10413_s3 = inlined_call_operand.hbm [shape: bf16[256,256], index: 3, kind: input, shape index: {}]   ;;  %s10414_s4 = inlined_call_operand.hbm [shape: f32[1,256], index: 4, kind: input, shape index: {}]   ;;  %s10415_s5 = inlined_call_operand.hbm [shape: bf16[256,4096], index: 5, kind: input, shape index: {}]   ;;  %s10416_s6 = inlined_call_operand.hbm [shape: f32[1,4096], index: 6, kind: input, shape index: {}]   ;;  %s10417_s7 = inlined_call_operand.hbm [shape: f32[8,4096], index: 7, kind: output, shape index: {}]  }
   0x1   :  { %13 = vsyncpa [#allocation6], 0 }
   0x2   :  { %14 = vsyncpa [#allocation9], 0 }
   0x3   :  { %15 = vsyncpa [#allocation12], 0 }
   0x4   :  { %16 = vsyncpa [#allocation4], 0  ;;  %s10170_s24 = smov [#allocation5]  }
   0x5   :  { %s32_s25 = sshll.u32 %s10170_s24, 4  ;;  %s33_s25 = int_to_ptr.vmem [resolvable:$true] %s32_s25 }
   0x6   :  { %s10008_s26 = scalar_lea.vmem %s33_s25, 65536  ;;  %p10013_p1 = scmp.lt.s32.totalorder %s33_s25, %s33_s25 }
   0x7   :  { %p10009_p0 = scmp.ne.s32.totalorder %s33_s25, %s10008_s26  ;;  %p10014_p2 = scmp.lt.s32.totalorder %s10008_s26, %s10008_s26 }
   0x9   :  { %p10015_p3 = por %p10014_p2, %p10013_p1 }
   0xb   :  { %p10016_p4 = pnand %p10015_p3, %p10009_p0 }
   0xd   :  { %10019 = shalt.err (!%p10016_p4)
}
   0xe   :  { %s10171_s27 = smov 128   ;;  %s10172_s28 = smov 8  }
   0xf   :  { %38 = dma.hbm_to_vmem [thread:$0]  %s10411_s1, 65536, %s33_s25, [#allocation6], %s10171_s27, %s10171_s27, %s10172_s28  }
  0x10   :  { %s10173_s8 = smov [#allocation8]   ;;  %s10174_s10 = smov [#allocation11]  }
  0x11   :  { %s54_s9 = sshll.u32 %s10173_s8, 4  ;;  %s76_s11 = sshll.u32 %s10174_s10, 4  ;;  %s55_s9 = int_to_ptr.vmem [resolvable:$true] %s54_s9  ;;  %s77_s11 = int_to_ptr.vmem [resolvable:$true] %s76_s11 }
  0x12   :  { %s10028_s12 = scalar_lea.vmem %s55_s9, 4096  ;;  %p10033_p6 = scmp.lt.s32.totalorder %s55_s9, %s55_s9 }
  0x13   :  { %p10029_p5 = scmp.ne.s32.totalorder %s55_s9, %s10028_s12  ;;  %p10034_p7 = scmp.lt.s32.totalorder %s10028_s12, %s10028_s12 }
  0x15   :  { %p10035_p8 = por %p10034_p7, %p10033_p6 }
  0x17   :  { %p10036_p9 = pnand %p10035_p8, %p10029_p5 }
  0x19   :  { %10039 = shalt.err (!%p10036_p9)
}
  0x1a   :  { %60 = dma.hbm_to_vmem [thread:$0]  %s10413_s3, 4096, %s55_s9, [#allocation9], %s10171_s27, %s10171_s27, %s10172_s28  }
  0x1b   :  { %s10048_s15 = scalar_lea.vmem %s77_s11, 65536  ;;  %p10053_p11 = scmp.lt.s32.totalorder %s77_s11, %s77_s11 }
  0x1c   :  { %p10049_p10 = scmp.ne.s32.totalorder %s77_s11, %s10048_s15  ;;  %p10054_p12 = scmp.lt.s32.totalorder %s10048_s15, %s10048_s15 }
  0x1e   :  { %p10055_p13 = por %p10054_p12, %p10053_p11 }
  0x20   :  { %p10056_p0 = pnand %p10055_p13, %p10049_p10 }
  0x22   :  { %10059 = shalt.err (!%p10056_p0)
}
  0x23   :  { %s10175_s1 = smov 2048   ;;  %s10176_s18 = smov [#allocation2]  }
  0x24   :  { %82 = dma.hbm_to_vmem [thread:$0]  %s10415_s5, 65536, %s77_s11, [#allocation12], %s10175_s1, %s10175_s1, %s10171_s27  }
  0x25   :  { %s23_s19 = sshll.u32 %s10176_s18, 4  ;;  %s10177_s20 = smov [#allocation7]   ;;  %s24_s19 = int_to_ptr.vmem [resolvable:$true] %s23_s19 }
  0x26   :  { %s45_s21 = sshll.u32 %s10177_s20, 4  ;;  %s10068_s3 = scalar_lea.vmem %s24_s19, 4096  ;;  %s46_s21 = int_to_ptr.vmem [resolvable:$true] %s45_s21 }
  0x27   :  { %p10069_p1 = scmp.ne.s32.totalorder %s24_s19, %s10068_s3  ;;  %p10073_p2 = scmp.lt.s32.totalorder %s24_s19, %s24_s19 }
  0x28   :  { %p10074_p3 = scmp.lt.s32.totalorder %s10068_s3, %s10068_s3 }
  0x2a   :  { %p10075_p4 = por %p10074_p3, %p10073_p2 }
  0x2c   :  { %p10076_p5 = pnand %p10075_p4, %p10069_p1 }
  0x2e   :  { %10079 = shalt.err (!%p10076_p5)
}
  0x2f   :  { %26 = dma.hbm_to_vmem [thread:$0]  %s10410_s0, 4096, %s24_s19, [#allocation3]  }
  0x30   :  { %s10088_s24 = scalar_lea.vmem %s46_s21, 32  ;;  %p10093_p7 = scmp.lt.s32.totalorder %s46_s21, %s46_s21 }
  0x31   :  { %p10089_p6 = scmp.ne.s32.totalorder %s46_s21, %s10088_s24  ;;  %p10094_p8 = scmp.lt.s32.totalorder %s10088_s24, %s10088_s24 }
  0x33   :  { %p10095_p9 = por %p10094_p8, %p10093_p7 }
  0x35   :  { %p10096_p10 = pnand %p10095_p9, %p10089_p6 }
  0x37   :  { %10099 = shalt.err (!%p10096_p10)
}
  0x38   :  { %48 = dma.hbm_to_vmem [thread:$0]  %s10412_s2, 32, %s46_s21, [#allocation6]  }
  0x39   :  { %s10178_s26 = smov [#allocation10]   ;;  %s10179_s28 = smov [#allocation13]  }
  0x3a   :  { %s67_s27 = sshll.u32 %s10178_s26, 4  ;;  %s89_s29 = sshll.u32 %s10179_s28, 4  ;;  %s68_s27 = int_to_ptr.vmem [resolvable:$true] %s67_s27  ;;  %s90_s29 = int_to_ptr.vmem [resolvable:$true] %s89_s29 }
  0x3b   :  { %s10108_s30 = scalar_lea.vmem %s68_s27, 32  ;;  %p10113_p12 = scmp.lt.s32.totalorder %s68_s27, %s68_s27 }
  0x3c   :  { %p10109_p11 = scmp.ne.s32.totalorder %s68_s27, %s10108_s30  ;;  %p10114_p13 = scmp.lt.s32.totalorder %s10108_s30, %s10108_s30 }
  0x3e   :  { %p10115_p0 = por %p10114_p13, %p10113_p12 }
  0x40   :  { %p10116_p1 = pnand %p10115_p0, %p10109_p11 }
  0x42   :  { %10119 = shalt.err (!%p10116_p1)
}
  0x43   :  { %70 = dma.hbm_to_vmem [thread:$0]  %s10414_s4, 32, %s68_s27, [#allocation9]  }
  0x44   :  { %s10128_s9 = scalar_lea.vmem %s90_s29, 512  ;;  %p10133_p3 = scmp.lt.s32.totalorder %s90_s29, %s90_s29 }
  0x45   :  { %p10129_p2 = scmp.ne.s32.totalorder %s90_s29, %s10128_s9  ;;  %p10134_p4 = scmp.lt.s32.totalorder %s10128_s9, %s10128_s9 }
  0x47   :  { %p10135_p5 = por %p10134_p4, %p10133_p3 }
  0x49   :  { %p10136_p6 = pnand %p10135_p5, %p10129_p2 }
  0x4b   :  { %10139 = shalt.err (!%p10136_p6)
}
  0x4c   :  { %92 = dma.hbm_to_vmem [thread:$0]  %s10416_s6, 512, %s90_s29, [#allocation12]  }
  0x4d   :  { %10160 = dma.done.wait [#allocation3], 4096  }
  0x4e   :  { %10161 = vsyncadd [#allocation3], 4294963200 }
  0x4f   :  { %10162 = dma.done.wait [#allocation6], 65568  }
  0x50   :  { %10163 = vsyncadd [#allocation6], 4294901728 }
  0x51   :  { %10164 = dma.done.wait [#allocation9], 4128  }
  0x52   :  { %10165 = vsyncadd [#allocation9], 4294963168 }
  0x53   :  { %10166 = dma.done.wait [#allocation12], 66048  }
  0x54   :  { %10167 = vsyncadd [#allocation12], 4294901248  ;;  %v9184_v0 = vld [vmem:[#allocation5 + $0x74] ss:$8 sps:$4 sm:$0xff]   ;;  %v9188_v2 = vld [vmem:[#allocation5 + $0x70] ss:$8 sps:$4 sm:$0xff]  }
  0x55   :  { %v9186_v1 = vld [vmem:[#allocation5 + $0x174] ss:$8 sps:$4 sm:$0xff]   ;;  %3262 = vmatprep.subr.bf16.mxu0 %v9184_v0  ;;  %v9189_v3 = vld [vmem:[#allocation5 + $0x170] ss:$8 sps:$4 sm:$0xff]   ;;  %v9190_v4 = vld [vmem:[#allocation5 + $0x64] ss:$8 sps:$4 sm:$0xff]  }
  0x56   :  { %3303 = vmatprep.subr.bf16.mxu1 %v9186_v1  ;;  %3263 = vmatpush1.bf16.msra.mxu0 %v9188_v2  ;;  %v9192_v5 = vld [vmem:[#allocation5 + $0x164] ss:$8 sps:$4 sm:$0xff]   ;;  %v9194_v6 = vld [vmem:[#allocation5 + $0x60] ss:$8 sps:$4 sm:$0xff]   ;;  %v9196_v8 = vld [vmem:[#allocation5 + $0x54] ss:$8 sps:$4 sm:$0xff]  }
  0x57   :  { %3304 = vmatpush1.bf16.msra.mxu1 %v9189_v3  ;;  %3264 = vmatprep.subr.bf16.mxu0 %v9190_v4  ;;  %v9195_v7 = vld [vmem:[#allocation5 + $0x160] ss:$8 sps:$4 sm:$0xff]   ;;  %v9198_v9 = vld [vmem:[#allocation5 + $0x154] ss:$8 sps:$4 sm:$0xff]   ;;  %v9200_v10 = vld [vmem:[#allocation5 + $0x50] ss:$8 sps:$4 sm:$0xff]  }
  0x58   :  { %3305 = vmatprep.subr.bf16.mxu1 %v9192_v5  ;;  %v9201_v11 = vld [vmem:[#allocation5 + $0x150] ss:$8 sps:$4 sm:$0xff]   ;;  %v9202_v12 = vld [vmem:[#allocation5 + $0x44] ss:$8 sps:$4 sm:$0xff]   ;;  %v9206_v14 = vld [vmem:[#allocation5 + $0x40] ss:$8 sps:$4 sm:$0xff]  }
  0x59   :  { %v9204_v13 = vld [vmem:[#allocation5 + $0x144] ss:$8 sps:$4 sm:$0xff]   ;;  %v9207_v15 = vld [vmem:[#allocation5 + $0x140] ss:$8 sps:$4 sm:$0xff]   ;;  %v9208_v16 = vld [vmem:[#allocation5 + $0x34] ss:$8 sps:$4 sm:$0xff]  }
  0x5a   :  { %3265 = vmatpush1.bf16.msra.mxu0 %v9194_v6  ;;  %v9210_v17 = vld [vmem:[#allocation5 + $0x134] ss:$8 sps:$4 sm:$0xff]   ;;  %v9212_v18 = vld [vmem:[#allocation5 + $0x30] ss:$8 sps:$4 sm:$0xff]   ;;  %v9214_v20 = vld [vmem:[#allocation5 + $0x24] ss:$8 sps:$4 sm:$0xff]  }
  0x5b   :  { %3306 = vmatpush1.bf16.msra.mxu1 %v9195_v7  ;;  %3266 = vmatprep.subr.bf16.mxu0 %v9196_v8  ;;  %v9213_v19 = vld [vmem:[#allocation5 + $0x130] ss:$8 sps:$4 sm:$0xff]   ;;  %v9216_v21 = vld [vmem:[#allocation5 + $0x124] ss:$8 sps:$4 sm:$0xff]   ;;  %v9218_v22 = vld [vmem:[#allocation5 + $0x20] ss:$8 sps:$4 sm:$0xff]  }
  0x5c   :  { %3307 = vmatprep.subr.bf16.mxu1 %v9198_v9  ;;  %v9219_v23 = vld [vmem:[#allocation5 + $0x120] ss:$8 sps:$4 sm:$0xff]   ;;  %v9220_v24 = vld [vmem:[#allocation5 + $0x14] ss:$8 sps:$4 sm:$0xff]   ;;  %v9224_v26 = vld [vmem:[#allocation5 + $0x10] ss:$8 sps:$4 sm:$0xff]  }
  0x5d   :  { %v9222_v25 = vld [vmem:[#allocation5 + $0x114] ss:$8 sps:$4 sm:$0xff]   ;;  %v9225_v27 = vld [vmem:[#allocation5 + $0x110] ss:$8 sps:$4 sm:$0xff]   ;;  %v9226_v28 = vld [vmem:[#allocation5 + $0x4] ss:$8 sps:$4 sm:$0xff]  }
  0x5e   :  { %3267 = vmatpush1.bf16.msra.mxu0 %v9200_v10  ;;  %v9228_v29 = vld [vmem:[#allocation5 + $0x104] ss:$8 sps:$4 sm:$0xff]   ;;  %v9230_v30 = vld [vmem:[#allocation5] ss:$8 sps:$4 sm:$0xff]   ;;  %v9232_v32 = vld [vmem:[#allocation5 + $0xf4] ss:$8 sps:$4 sm:$0xff]  }
  0x5f   :  { %3308 = vmatpush1.bf16.msra.mxu1 %v9201_v11  ;;  %3268 = vmatprep.subr.bf16.mxu0 %v9202_v12  ;;  %v9231_v31 = vld [vmem:[#allocation5 + $0x100] ss:$8 sps:$4 sm:$0xff]   ;;  %v9234_v33 = vld [vmem:[#allocation5 + $0x1f4] ss:$8 sps:$4 sm:$0xff]   ;;  %v9236_v34 = vld [vmem:[#allocation5 + $0xf0] ss:$8 sps:$4 sm:$0xff]  }
  0x60   :  { %3309 = vmatprep.subr.bf16.mxu1 %v9204_v13  ;;  %v9237_v35 = vld [vmem:[#allocation5 + $0x1f0] ss:$8 sps:$4 sm:$0xff]   ;;  %v9238_v36 = vld [vmem:[#allocation5 + $0xe4] ss:$8 sps:$4 sm:$0xff]   ;;  %v9242_v38 = vld [vmem:[#allocation5 + $0xe0] ss:$8 sps:$4 sm:$0xff]  }
  0x61   :  { %v9240_v37 = vld [vmem:[#allocation5 + $0x1e4] ss:$8 sps:$4 sm:$0xff]   ;;  %v9243_v39 = vld [vmem:[#allocation5 + $0x1e0] ss:$8 sps:$4 sm:$0xff]   ;;  %v9244_v40 = vld [vmem:[#allocation5 + $0xd4] ss:$8 sps:$4 sm:$0xff]  }
  0x62   :  { %3269 = vmatpush1.bf16.msra.mxu0 %v9206_v14  ;;  %v9246_v41 = vld [vmem:[#allocation5 + $0x1d4] ss:$8 sps:$4 sm:$0xff]   ;;  %v9248_v42 = vld [vmem:[#allocation5 + $0xd0] ss:$8 sps:$4 sm:$0xff]   ;;  %v9250_v44 = vld [vmem:[#allocation5 + $0xc4] ss:$8 sps:$4 sm:$0xff]  }
  0x63   :  { %3310 = vmatpush1.bf16.msra.mxu1 %v9207_v15  ;;  %3270 = vmatprep.subr.bf16.mxu0 %v9208_v16  ;;  %v9249_v43 = vld [vmem:[#allocation5 + $0x1d0] ss:$8 sps:$4 sm:$0xff]   ;;  %v9252_v45 = vld [vmem:[#allocation5 + $0x1c4] ss:$8 sps:$4 sm:$0xff]   ;;  %v9254_v47 = vld [vmem:[#allocation5 + $0xc0] ss:$8 sps:$4 sm:$0xff]  }
  0x64   :  { %3311 = vmatprep.subr.bf16.mxu1 %v9210_v17  ;;  %v115_v46 = vld [vmem:[#allocation2 + $0x8] sm:$0xff]  ;;  %v117_v50 = vld [vmem:[#allocation2 + $0x18] sm:$0xff]  ;;  %v114_v4 = vld [vmem:[#allocation2] sm:$0xff]  ;;  %s10180_s4 = smov [#allocation14]  }
  0x65   :  { %v9255_v48 = vld [vmem:[#allocation5 + $0x1c0] ss:$8 sps:$4 sm:$0xff]   ;;  %v147_v49 = vpack.c.bf16 %v115_v46, %v115_v46  ;;  %v9256_v51 = vld [vmem:[#allocation5 + $0xb4] ss:$8 sps:$4 sm:$0xff]   ;;  %v149_v52 = vpack.c.bf16 %v117_v50, %v117_v50  ;;  %v9260_v54 = vld [vmem:[#allocation5 + $0xb0] ss:$8 sps:$4 sm:$0xff]   ;;  %v146_v8 = vpack.c.bf16 %v114_v4, %v114_v4 }
  0x66   :  { %3271 = vmatpush1.bf16.msra.mxu0 %v9212_v18  ;;  %v9258_v53 = vld [vmem:[#allocation5 + $0x1b4] ss:$8 sps:$4 sm:$0xff]   ;;  %v9261_v55 = vld [vmem:[#allocation5 + $0x1b0] ss:$8 sps:$4 sm:$0xff]   ;;  %v9262_v56 = vld [vmem:[#allocation5 + $0xa4] ss:$8 sps:$4 sm:$0xff]  }
  0x67   :  { %3312 = vmatpush1.bf16.msra.mxu1 %v9213_v19  ;;  %3272 = vmatprep.subr.bf16.mxu0 %v9214_v20  ;;  %v9264_v57 = vld [vmem:[#allocation5 + $0x1a4] ss:$8 sps:$4 sm:$0xff]   ;;  %v9266_v58 = vld [vmem:[#allocation5 + $0xa0] ss:$8 sps:$4 sm:$0xff]   ;;  %v9268_v60 = vld [vmem:[#allocation5 + $0x94] ss:$8 sps:$4 sm:$0xff]  }
  0x68   :  { %3313 = vmatprep.subr.bf16.mxu1 %v9216_v21  ;;  %3294 = vmatprep.mubr.bf16.mxu0 %v147_v49  ;;  %v9267_v59 = vld [vmem:[#allocation5 + $0x1a0] ss:$8 sps:$4 sm:$0xff]   ;;  %v9270_v61 = vld [vmem:[#allocation5 + $0x194] ss:$8 sps:$4 sm:$0xff]   ;;  %v9272_v62 = vld [vmem:[#allocation5 + $0x90] ss:$8 sps:$4 sm:$0xff]  }
  0x69   :  { %3335 = vmatprep.mubr.bf16.mxu1 %v149_v52  ;;  %v9273_v63 = vld [vmem:[#allocation5 + $0x190] ss:$8 sps:$4 sm:$0xff]   ;;  %v9274_v0 = vld [vmem:[#allocation5 + $0x84] ss:$8 sps:$4 sm:$0xff]   ;;  %v9278_v2 = vld [vmem:[#allocation5 + $0x80] ss:$8 sps:$4 sm:$0xff]  }
  0x6a   :  { %3273 = vmatpush1.bf16.msra.mxu0 %v9218_v22  ;;  %v9276_v1 = vld [vmem:[#allocation5 + $0x184] ss:$8 sps:$4 sm:$0xff]   ;;  %v9279_v3 = vld [vmem:[#allocation5 + $0x180] ss:$8 sps:$4 sm:$0xff]   ;;  %v116_v5 = vld [vmem:[#allocation2 + $0x10] sm:$0xff]  ;;  %s8105_s6 = sshll.u32 %s10180_s4, 4  ;;  %s8106_s6 = int_to_ptr.vmem [resolvable:$true] %s8105_s6 }
  0x6b   :  { %3314 = vmatpush1.bf16.msra.mxu1 %v9219_v23  ;;  %3274 = vmatprep.subr.bf16.mxu0 %v9220_v24  ;;  %v9282_v6 = vld [vmem:[#allocation5 + $0x274] ss:$8 sps:$4 sm:$0xff]   ;;  %v148_v9 = vpack.c.bf16 %v116_v5, %v116_v5  ;;  %v9280_v10 = vld [vmem:[#allocation5 + $0x270] ss:$8 sps:$4 sm:$0xff]   ;;  %v9288_v12 = vld [vmem:[#allocation5 + $0x264] ss:$8 sps:$4 sm:$0xff]   ;;  %p10145_p8 = scmp.lt.s32.totalorder %s8106_s6, %s8106_s6 }
  0x6c   :  { %3315 = vmatprep.subr.bf16.mxu1 %v9222_v25  ;;  %v9285_v7 = vld [vmem:[#allocation5 + $0x374] ss:$8 sps:$4 sm:$0xff]   ;;  %v9283_v11 = vld [vmem:[#allocation5 + $0x370] ss:$8 sps:$4 sm:$0xff]   ;;  %v9291_v13 = vld [vmem:[#allocation5 + $0x364] ss:$8 sps:$4 sm:$0xff]  }
  0x6d   :  { %v9286_v14 = vld [vmem:[#allocation5 + $0x260] ss:$8 sps:$4 sm:$0xff]   ;;  %v9294_v16 = vld [vmem:[#allocation5 + $0x254] ss:$8 sps:$4 sm:$0xff]   ;;  %v9292_v18 = vld [vmem:[#allocation5 + $0x250] ss:$8 sps:$4 sm:$0xff]  }
  0x6e   :  { %3275 = vmatpush1.bf16.msra.mxu0 %v9224_v26  ;;  %v9289_v15 = vld [vmem:[#allocation5 + $0x360] ss:$8 sps:$4 sm:$0xff]   ;;  %v9297_v17 = vld [vmem:[#allocation5 + $0x354] ss:$8 sps:$4 sm:$0xff]   ;;  %v9295_v19 = vld [vmem:[#allocation5 + $0x350] ss:$8 sps:$4 sm:$0xff]  }
  0x6f   :  { %3316 = vmatpush1.bf16.msra.mxu1 %v9225_v27  ;;  %3276 = vmatprep.subr.bf16.mxu0 %v9226_v28  ;;  %v9300_v20 = vld [vmem:[#allocation5 + $0x244] ss:$8 sps:$4 sm:$0xff]   ;;  %v9298_v22 = vld [vmem:[#allocation5 + $0x240] ss:$8 sps:$4 sm:$0xff]   ;;  %v9306_v24 = vld [vmem:[#allocation5 + $0x234] ss:$8 sps:$4 sm:$0xff]  }
  0x70   :  { %3317 = vmatprep.subr.bf16.mxu1 %v9228_v29  ;;  %v9303_v21 = vld [vmem:[#allocation5 + $0x344] ss:$8 sps:$4 sm:$0xff]   ;;  %v9301_v23 = vld [vmem:[#allocation5 + $0x340] ss:$8 sps:$4 sm:$0xff]   ;;  %v9309_v25 = vld [vmem:[#allocation5 + $0x334] ss:$8 sps:$4 sm:$0xff]  }
  0x71   :  { %v9304_v26 = vld [vmem:[#allocation5 + $0x230] ss:$8 sps:$4 sm:$0xff]   ;;  %v9312_v28 = vld [vmem:[#allocation5 + $0x224] ss:$8 sps:$4 sm:$0xff]   ;;  %v9334_v50 = vld [vmem:[#allocation5 + $0x2e0] ss:$8 sps:$4 sm:$0xff]  }
  0x72   :  { %3277 = vmatpush1.bf16.msra.mxu0 %v9230_v30  ;;  %v9307_v27 = vld [vmem:[#allocation5 + $0x330] ss:$8 sps:$4 sm:$0xff]   ;;  %v9315_v29 = vld [vmem:[#allocation5 + $0x324] ss:$8 sps:$4 sm:$0xff]   ;;  %v9310_v30 = vld [vmem:[#allocation5 + $0x220] ss:$8 sps:$4 sm:$0xff]  }
  0x73   :  { %3318 = vmatpush1.bf16.msra.mxu1 %v9231_v31  ;;  %3278 = vmatprep.subr.bf16.mxu0 %v9232_v32  ;;  %v9313_v31 = vld [vmem:[#allocation5 + $0x320] ss:$8 sps:$4 sm:$0xff]   ;;  %v9318_v32 = vld [vmem:[#allocation5 + $0x214] ss:$8 sps:$4 sm:$0xff]   ;;  %v9328_v46 = vld [vmem:[#allocation5 + $0x2f0] ss:$8 sps:$4 sm:$0xff]  }
  0x74   :  { %3319 = vmatprep.subr.bf16.mxu1 %v9234_v33  ;;  %v9321_v33 = vld [vmem:[#allocation5 + $0x314] ss:$8 sps:$4 sm:$0xff]   ;;  %v9339_v49 = vld [vmem:[#allocation5 + $0x3e4] ss:$8 sps:$4 sm:$0xff]   ;;  %s10140_s11 = scalar_lea.vmem %s8106_s6, 4096 }
  0x75   :  { %v9342_v52 = vld [vmem:[#allocation5 + $0x2d4] ss:$8 sps:$4 sm:$0xff]   ;;  %p10141_p7 = scmp.ne.s32.totalorder %s8106_s6, %s10140_s11  ;;  %p10146_p9 = scmp.lt.s32.totalorder %s10140_s11, %s10140_s11 }
  0x76   :  { %3279 = vmatpush2.bf16.msra.mxu0 %v9236_v34  ;;  %v119_v34 = vld [vmem:[#allocation2 + $0x28] sm:$0xff]  ;;  %v9366_v4 = vld [vmem:[#allocation5 + $0x294] ss:$8 sps:$4 sm:$0xff]  }
  0x77   :  { %3320 = vmatpush2.bf16.msra.mxu1 %v9237_v35  ;;  %3280 = vmatprep.subr.bf16.mxu0 %v9238_v36  ;;  %v9316_v35 = vld [vmem:[#allocation5 + $0x210] ss:$8 sps:$4 sm:$0xff]   ;;  %v9369_v5 = vld [vmem:[#allocation5 + $0x394] ss:$8 sps:$4 sm:$0xff]   ;;  %p10147_p10 = por %p10146_p9, %p10145_p8 }
  0x78   :  { %3321 = vmatprep.subr.bf16.mxu1 %v9240_v37  ;;  %v9319_v36 = vld [vmem:[#allocation5 + $0x310] ss:$8 sps:$4 sm:$0xff]   ;;  %v151_v37 = vpack.c.bf16 %v119_v34, %v119_v34  ;;  %v9394_v34 = vld [vmem:[#allocation5 + $0x440] ss:$8 sps:$4 sm:$0xff]  }
  0x79   :  { %p10148_p11 = pnand %p10147_p10, %p10141_p7 }
  0x7a   :  { %3281 = vmatpush2.bf16.msra.mxu0 %v9242_v38  ;;  %v121_v38 = vld [vmem:[#allocation2 + $0x38] sm:$0xff] }
  0x7b   :  { %3322 = vmatpush2.bf16.msra.mxu1 %v9243_v39  ;;  %3282 = vmatprep.subr.bf16.mxu0 %v9244_v40  ;;  %v9324_v39 = vld [vmem:[#allocation5 + $0x204] ss:$8 sps:$4 sm:$0xff]   ;;  %v153_v40 = vpack.c.bf16 %v121_v38, %v121_v38  ;;  %v9400_v38 = vld [vmem:[#allocation5 + $0x430] ss:$8 sps:$4 sm:$0xff]  }
  0x7c   :  { %3323 = vmatprep.subr.bf16.mxu1 %v9246_v41  ;;  %v9327_v41 = vld [vmem:[#allocation5 + $0x304] ss:$8 sps:$4 sm:$0xff]  }
  0x7e   :  { %3283 = vmatpush2.bf16.msra.mxu0 %v9248_v42  ;;  %v9322_v42 = vld [vmem:[#allocation5 + $0x200] ss:$8 sps:$4 sm:$0xff]  }
  0x7f   :  { %3324 = vmatpush2.bf16.msra.mxu1 %v9249_v43  ;;  %3284 = vmatprep.subr.bf16.mxu0 %v9250_v44  ;;  %v9325_v43 = vld [vmem:[#allocation5 + $0x300] ss:$8 sps:$4 sm:$0xff]   ;;  %v9330_v44 = vld [vmem:[#allocation5 + $0x2f4] ss:$8 sps:$4 sm:$0xff]  }
  0x80   :  { %3325 = vmatprep.subr.bf16.mxu1 %v9252_v45  ;;  %v9333_v45 = vld [vmem:[#allocation5 + $0x3f4] ss:$8 sps:$4 sm:$0xff]  }
  0x82   :  { %3285 = vmatpush2.bf16.msra.mxu0 %v9254_v47  ;;  %v9331_v47 = vld [vmem:[#allocation5 + $0x3f0] ss:$8 sps:$4 sm:$0xff]  }
  0x83   :  { %3326 = vmatpush2.bf16.msra.mxu1 %v9255_v48  ;;  %3286 = vmatprep.subr.bf16.mxu0 %v9256_v51  ;;  %v9336_v48 = vld [vmem:[#allocation5 + $0x2e4] ss:$8 sps:$4 sm:$0xff]   ;;  %v9337_v51 = vld [vmem:[#allocation5 + $0x3e0] ss:$8 sps:$4 sm:$0xff]  }
  0x84   :  { %3327 = vmatprep.subr.bf16.mxu1 %v9258_v53  ;;  %v9345_v53 = vld [vmem:[#allocation5 + $0x3d4] ss:$8 sps:$4 sm:$0xff]  }
  0x86   :  { %3287 = vmatpush2.bf16.msra.mxu0 %v9260_v54  ;;  %v9340_v54 = vld [vmem:[#allocation5 + $0x2d0] ss:$8 sps:$4 sm:$0xff]  }
  0x87   :  { %3328 = vmatpush2.bf16.msra.mxu1 %v9261_v55  ;;  %3288 = vmatprep.subr.bf16.mxu0 %v9262_v56  ;;  %v9343_v55 = vld [vmem:[#allocation5 + $0x3d0] ss:$8 sps:$4 sm:$0xff]   ;;  %v9348_v56 = vld [vmem:[#allocation5 + $0x2c4] ss:$8 sps:$4 sm:$0xff]  }
  0x88   :  { %3329 = vmatprep.subr.bf16.mxu1 %v9264_v57  ;;  %v9351_v57 = vld [vmem:[#allocation5 + $0x3c4] ss:$8 sps:$4 sm:$0xff]  }
  0x8a   :  { %3289 = vmatpush2.bf16.msra.mxu0 %v9266_v58  ;;  %v9346_v58 = vld [vmem:[#allocation5 + $0x2c0] ss:$8 sps:$4 sm:$0xff]  }
  0x8b   :  { %3330 = vmatpush2.bf16.msra.mxu1 %v9267_v59  ;;  %3290 = vmatprep.subr.bf16.mxu0 %v9268_v60  ;;  %v9349_v59 = vld [vmem:[#allocation5 + $0x3c0] ss:$8 sps:$4 sm:$0xff]   ;;  %v9354_v60 = vld [vmem:[#allocation5 + $0x2b4] ss:$8 sps:$4 sm:$0xff]  }
  0x8c   :  { %3331 = vmatprep.subr.bf16.mxu1 %v9270_v61  ;;  %v9357_v61 = vld [vmem:[#allocation5 + $0x3b4] ss:$8 sps:$4 sm:$0xff]  }
  0x8e   :  { %3291 = vmatpush2.bf16.msra.mxu0 %v9272_v62  ;;  %v9352_v62 = vld [vmem:[#allocation5 + $0x2b0] ss:$8 sps:$4 sm:$0xff]  }
  0x8f   :  { %3332 = vmatpush2.bf16.msra.mxu1 %v9273_v63  ;;  %3292 = vmatprep.subr.bf16.mxu0 %v9274_v0  ;;  %v9355_v63 = vld [vmem:[#allocation5 + $0x3b0] ss:$8 sps:$4 sm:$0xff]   ;;  %v9360_v0 = vld [vmem:[#allocation5 + $0x2a4] ss:$8 sps:$4 sm:$0xff]  }
  0x90   :  { %3333 = vmatprep.subr.bf16.mxu1 %v9276_v1  ;;  %v9363_v1 = vld [vmem:[#allocation5 + $0x3a4] ss:$8 sps:$4 sm:$0xff]  }
  0x92   :  { %3293 = vmatpush2.bf16.msra.mxu0 %v9278_v2  ;;  %v9358_v2 = vld [vmem:[#allocation5 + $0x2a0] ss:$8 sps:$4 sm:$0xff]  }
  0x93   :  { %3334 = vmatpush2.bf16.msra.mxu1 %v9279_v3  ;;  %3344 = vmatprep.subr.bf16.mxu0 %v9282_v6  ;;  %v9361_v3 = vld [vmem:[#allocation5 + $0x3a0] ss:$8 sps:$4 sm:$0xff]   ;;  %v9364_v6 = vld [vmem:[#allocation5 + $0x290] ss:$8 sps:$4 sm:$0xff]  }
  0x94   :  { %3385 = vmatprep.subr.bf16.mxu1 %v9285_v7  ;;  %v9367_v7 = vld [vmem:[#allocation5 + $0x390] ss:$8 sps:$4 sm:$0xff]  }
  0x95   :  { %3295 = vmatmul.mubr.bf16.vlgmr.msra.gmra.mxu0 %v146_v8  ;;  %v9372_v8 = vld [vmem:[#allocation5 + $0x284] ss:$8 sps:$4 sm:$0xff]  }
  0x96   :  { %3336 = vmatmul.mubr.bf16.vlgmr.msra.gmra.mxu1 %v148_v9  ;;  %3345 = vmatpush1.bf16.msra.mxu0 %v9280_v10  ;;  %v9375_v9 = vld [vmem:[#allocation5 + $0x384] ss:$8 sps:$4 sm:$0xff]   ;;  %v9370_v10 = vld [vmem:[#allocation5 + $0x280] ss:$8 sps:$4 sm:$0xff]  }
  0x97   :  { %3386 = vmatpush1.bf16.msra.mxu1 %v9283_v11  ;;  %3346 = vmatprep.subr.bf16.mxu0 %v9288_v12  ;;  %v9373_v11 = vld [vmem:[#allocation5 + $0x380] ss:$8 sps:$4 sm:$0xff]  }
  0x98   :  { %3387 = vmatprep.subr.bf16.mxu1 %v9291_v13  ;;  %3376 = vmatprep.mubr.bf16.mxu0 %v151_v37  ;;  %v118_v12 = vld [vmem:[#allocation2 + $0x20] sm:$0xff]  ;;  %v120_v13 = vld [vmem:[#allocation2 + $0x30] sm:$0xff] }
  0x99   :  { %3417 = vmatprep.mubr.bf16.mxu1 %v153_v40  ;;  %v9405_v37 = vld [vmem:[#allocation5 + $0x534] ss:$8 sps:$4 sm:$0xff]   ;;  %v9408_v40 = vld [vmem:[#allocation5 + $0x424] ss:$8 sps:$4 sm:$0xff]  }
  0x9a   :  { %3347 = vmatpush1.bf16.msra.mxu0 %v9286_v14  ;;  %v9378_v14 = vld [vmem:[#allocation5 + $0x474] ss:$8 sps:$4 sm:$0xff]  }
  0x9b   :  { %3388 = vmatpush1.bf16.msra.mxu1 %v9289_v15  ;;  %3348 = vmatprep.subr.bf16.mxu0 %v9294_v16  ;;  %v9381_v15 = vld [vmem:[#allocation5 + $0x574] ss:$8 sps:$4 sm:$0xff]   ;;  %v150_v16 = vpack.c.bf16 %v118_v12, %v118_v12 }
  0x9c   :  { %3389 = vmatprep.subr.bf16.mxu1 %v9297_v17  ;;  %v152_v17 = vpack.c.bf16 %v120_v13, %v120_v13  ;;  %v9462_v12 = vld [vmem:[#allocation5 + $0x494] ss:$8 sps:$4 sm:$0xff]  }
  0x9d   :  { %v9465_v13 = vld [vmem:[#allocation5 + $0x594] ss:$8 sps:$4 sm:$0xff]  }
  0x9e   :  { %3349 = vmatpush1.bf16.msra.mxu0 %v9292_v18  ;;  %v9376_v18 = vld [vmem:[#allocation5 + $0x470] ss:$8 sps:$4 sm:$0xff]  }
  0x9f   :  { %3390 = vmatpush1.bf16.msra.mxu1 %v9295_v19  ;;  %3350 = vmatprep.subr.bf16.mxu0 %v9300_v20  ;;  %v9379_v19 = vld [vmem:[#allocation5 + $0x570] ss:$8 sps:$4 sm:$0xff]   ;;  %v9384_v20 = vld [vmem:[#allocation5 + $0x464] ss:$8 sps:$4 sm:$0xff]  }
  0xa0   :  { %3391 = vmatprep.subr.bf16.mxu1 %v9303_v21  ;;  %v9387_v21 = vld [vmem:[#allocation5 + $0x564] ss:$8 sps:$4 sm:$0xff]  }
  0xa2   :  { %3351 = vmatpush1.bf16.msra.mxu0 %v9298_v22  ;;  %v123_v22 = vld [vmem:[#allocation2 + $0x48] sm:$0xff] }
  0xa3   :  { %3392 = vmatpush1.bf16.msra.mxu1 %v9301_v23  ;;  %3352 = vmatprep.subr.bf16.mxu0 %v9306_v24  ;;  %v9382_v23 = vld [vmem:[#allocation5 + $0x460] ss:$8 sps:$4 sm:$0xff]  }
  0xa4   :  { %3393 = vmatprep.subr.bf16.mxu1 %v9309_v25  ;;  %v9385_v24 = vld [vmem:[#allocation5 + $0x560] ss:$8 sps:$4 sm:$0xff]   ;;  %v155_v25 = vpack.c.bf16 %v123_v22, %v123_v22  ;;  %v9474_v22 = vld [vmem:[#allocation5 + $0x674] ss:$8 sps:$4 sm:$0xff]  }
  0xa6   :  { %3353 = vmatpush1.bf16.msra.mxu0 %v9304_v26  ;;  %v125_v26 = vld [vmem:[#allocation2 + $0x58] sm:$0xff] }
  0xa7   :  { %3394 = vmatpush1.bf16.msra.mxu1 %v9307_v27  ;;  %3354 = vmatprep.subr.bf16.mxu0 %v9312_v28  ;;  %v9390_v27 = vld [vmem:[#allocation5 + $0x454] ss:$8 sps:$4 sm:$0xff]   ;;  %v157_v28 = vpack.c.bf16 %v125_v26, %v125_v26 }
  0xa8   :  { %3395 = vmatprep.subr.bf16.mxu1 %v9315_v29  ;;  %v9393_v29 = vld [vmem:[#allocation5 + $0x554] ss:$8 sps:$4 sm:$0xff]  }
  0xaa   :  { %3355 = vmatpush1.bf16.msra.mxu0 %v9310_v30  ;;  %v9388_v30 = vld [vmem:[#allocation5 + $0x450] ss:$8 sps:$4 sm:$0xff]  }
  0xab   :  { %3396 = vmatpush1.bf16.msra.mxu1 %v9313_v31  ;;  %3356 = vmatprep.subr.bf16.mxu0 %v9318_v32  ;;  %v9391_v31 = vld [vmem:[#allocation5 + $0x550] ss:$8 sps:$4 sm:$0xff]   ;;  %v9396_v32 = vld [vmem:[#allocation5 + $0x444] ss:$8 sps:$4 sm:$0xff]  }
  0xac   :  { %3397 = vmatprep.subr.bf16.mxu1 %v9321_v33  ;;  %v9399_v33 = vld [vmem:[#allocation5 + $0x544] ss:$8 sps:$4 sm:$0xff]  }
  0xae   :  { %3357 = vmatpush1.bf16.msra.mxu0 %v9316_v35  ;;  %v9397_v35 = vld [vmem:[#allocation5 + $0x540] ss:$8 sps:$4 sm:$0xff]  }
  0xaf   :  { %3398 = vmatpush1.bf16.msra.mxu1 %v9319_v36  ;;  %3358 = vmatprep.subr.bf16.mxu0 %v9324_v39  ;;  %v9402_v36 = vld [vmem:[#allocation5 + $0x434] ss:$8 sps:$4 sm:$0xff]   ;;  %v9403_v39 = vld [vmem:[#allocation5 + $0x530] ss:$8 sps:$4 sm:$0xff]  }
  0xb0   :  { %3399 = vmatprep.subr.bf16.mxu1 %v9327_v41  ;;  %v9411_v41 = vld [vmem:[#allocation5 + $0x524] ss:$8 sps:$4 sm:$0xff]  }
  0xb2   :  { %3359 = vmatpush1.bf16.msra.mxu0 %v9322_v42  ;;  %v9406_v42 = vld [vmem:[#allocation5 + $0x420] ss:$8 sps:$4 sm:$0xff]  }
  0xb3   :  { %3400 = vmatpush1.bf16.msra.mxu1 %v9325_v43  ;;  %3360 = vmatprep.subr.bf16.mxu0 %v9330_v44  ;;  %v9409_v43 = vld [vmem:[#allocation5 + $0x520] ss:$8 sps:$4 sm:$0xff]   ;;  %v9414_v44 = vld [vmem:[#allocation5 + $0x414] ss:$8 sps:$4 sm:$0xff]  }
  0xb4   :  { %3401 = vmatprep.subr.bf16.mxu1 %v9333_v45  ;;  %v9417_v45 = vld [vmem:[#allocation5 + $0x514] ss:$8 sps:$4 sm:$0xff]  }
  0xb6   :  { %3361 = vmatpush2.bf16.msra.mxu0 %v9328_v46  ;;  %v9412_v46 = vld [vmem:[#allocation5 + $0x410] ss:$8 sps:$4 sm:$0xff]  }
  0xb7   :  { %3402 = vmatpush2.bf16.msra.mxu1 %v9331_v47  ;;  %3362 = vmatprep.subr.bf16.mxu0 %v9336_v48  ;;  %v9415_v47 = vld [vmem:[#allocation5 + $0x510] ss:$8 sps:$4 sm:$0xff]   ;;  %v9420_v48 = vld [vmem:[#allocation5 + $0x404] ss:$8 sps:$4 sm:$0xff]  }
  0xb8   :  { %3403 = vmatprep.subr.bf16.mxu1 %v9339_v49  ;;  %v9423_v49 = vld [vmem:[#allocation5 + $0x504] ss:$8 sps:$4 sm:$0xff]  }
  0xba   :  { %3363 = vmatpush2.bf16.msra.mxu0 %v9334_v50  ;;  %v9418_v50 = vld [vmem:[#allocation5 + $0x400] ss:$8 sps:$4 sm:$0xff]  }
  0xbb   :  { %3404 = vmatpush2.bf16.msra.mxu1 %v9337_v51  ;;  %3364 = vmatprep.subr.bf16.mxu0 %v9342_v52  ;;  %v9421_v51 = vld [vmem:[#allocation5 + $0x500] ss:$8 sps:$4 sm:$0xff]   ;;  %v9426_v52 = vld [vmem:[#allocation5 + $0x4f4] ss:$8 sps:$4 sm:$0xff]  }
  0xbc   :  { %3405 = vmatprep.subr.bf16.mxu1 %v9345_v53  ;;  %v9429_v53 = vld [vmem:[#allocation5 + $0x5f4] ss:$8 sps:$4 sm:$0xff]  }
  0xbe   :  { %3365 = vmatpush2.bf16.msra.mxu0 %v9340_v54  ;;  %v9424_v54 = vld [vmem:[#allocation5 + $0x4f0] ss:$8 sps:$4 sm:$0xff]  }
  0xbf   :  { %3406 = vmatpush2.bf16.msra.mxu1 %v9343_v55  ;;  %3366 = vmatprep.subr.bf16.mxu0 %v9348_v56  ;;  %v9427_v55 = vld [vmem:[#allocation5 + $0x5f0] ss:$8 sps:$4 sm:$0xff]   ;;  %v9432_v56 = vld [vmem:[#allocation5 + $0x4e4] ss:$8 sps:$4 sm:$0xff]  }
  0xc0   :  { %3407 = vmatprep.subr.bf16.mxu1 %v9351_v57  ;;  %v9435_v57 = vld [vmem:[#allocation5 + $0x5e4] ss:$8 sps:$4 sm:$0xff]  }
  0xc2   :  { %3367 = vmatpush2.bf16.msra.mxu0 %v9346_v58  ;;  %v9430_v58 = vld [vmem:[#allocation5 + $0x4e0] ss:$8 sps:$4 sm:$0xff]  }
  0xc3   :  { %3408 = vmatpush2.bf16.msra.mxu1 %v9349_v59  ;;  %3368 = vmatprep.subr.bf16.mxu0 %v9354_v60  ;;  %v9433_v59 = vld [vmem:[#allocation5 + $0x5e0] ss:$8 sps:$4 sm:$0xff]   ;;  %v9438_v60 = vld [vmem:[#allocation5 + $0x4d4] ss:$8 sps:$4 sm:$0xff]  }
  0xc4   :  { %3409 = vmatprep.subr.bf16.mxu1 %v9357_v61  ;;  %v9441_v61 = vld [vmem:[#allocation5 + $0x5d4] ss:$8 sps:$4 sm:$0xff]  }
  0xc6   :  { %3369 = vmatpush2.bf16.msra.mxu0 %v9352_v62  ;;  %v9436_v62 = vld [vmem:[#allocation5 + $0x4d0] ss:$8 sps:$4 sm:$0xff]  }
  0xc7   :  { %3410 = vmatpush2.bf16.msra.mxu1 %v9355_v63  ;;  %3370 = vmatprep.subr.bf16.mxu0 %v9360_v0  ;;  %v9439_v63 = vld [vmem:[#allocation5 + $0x5d0] ss:$8 sps:$4 sm:$0xff]   ;;  %v9444_v0 = vld [vmem:[#allocation5 + $0x4c4] ss:$8 sps:$4 sm:$0xff]  }
  0xc8   :  { %3411 = vmatprep.subr.bf16.mxu1 %v9363_v1  ;;  %v9447_v1 = vld [vmem:[#allocation5 + $0x5c4] ss:$8 sps:$4 sm:$0xff]  }
  0xca   :  { %3371 = vmatpush2.bf16.msra.mxu0 %v9358_v2  ;;  %v9442_v2 = vld [vmem:[#allocation5 + $0x4c0] ss:$8 sps:$4 sm:$0xff]  }
  0xcb   :  { %3412 = vmatpush2.bf16.msra.mxu1 %v9361_v3  ;;  %3372 = vmatprep.subr.bf16.mxu0 %v9366_v4  ;;  %v9445_v3 = vld [vmem:[#allocation5 + $0x5c0] ss:$8 sps:$4 sm:$0xff]   ;;  %v9450_v4 = vld [vmem:[#allocation5 + $0x4b4] ss:$8 sps:$4 sm:$0xff]  }
  0xcc   :  { %3413 = vmatprep.subr.bf16.mxu1 %v9369_v5  ;;  %v9453_v5 = vld [vmem:[#allocation5 + $0x5b4] ss:$8 sps:$4 sm:$0xff]  }
  0xce   :  { %3373 = vmatpush2.bf16.msra.mxu0 %v9364_v6  ;;  %v9448_v6 = vld [vmem:[#allocation5 + $0x4b0] ss:$8 sps:$4 sm:$0xff]  }
  0xcf   :  { %3414 = vmatpush2.bf16.msra.mxu1 %v9367_v7  ;;  %3374 = vmatprep.subr.bf16.mxu0 %v9372_v8  ;;  %v9451_v7 = vld [vmem:[#allocation5 + $0x5b0] ss:$8 sps:$4 sm:$0xff]   ;;  %v9456_v8 = vld [vmem:[#allocation5 + $0x4a4] ss:$8 sps:$4 sm:$0xff]  }
  0xd0   :  { %3415 = vmatprep.subr.bf16.mxu1 %v9375_v9  ;;  %v9459_v9 = vld [vmem:[#allocation5 + $0x5a4] ss:$8 sps:$4 sm:$0xff]  }
  0xd2   :  { %3375 = vmatpush2.bf16.msra.mxu0 %v9370_v10  ;;  %v9454_v10 = vld [vmem:[#allocation5 + $0x4a0] ss:$8 sps:$4 sm:$0xff]  }
  0xd3   :  { %3416 = vmatpush2.bf16.msra.mxu1 %v9373_v11  ;;  %3426 = vmatprep.subr.bf16.mxu0 %v9378_v14  ;;  %v9457_v11 = vld [vmem:[#allocation5 + $0x5a0] ss:$8 sps:$4 sm:$0xff]   ;;  %v9460_v14 = vld [vmem:[#allocation5 + $0x490] ss:$8 sps:$4 sm:$0xff]  }
  0xd4   :  { %3467 = vmatprep.subr.bf16.mxu1 %v9381_v15  ;;  %v9463_v15 = vld [vmem:[#allocation5 + $0x590] ss:$8 sps:$4 sm:$0xff]  }
  0xd5   :  { %3377 = vmatmul.mubr.bf16.vlgmr.msra.gmra.mxu0 %v150_v16  ;;  %v9468_v16 = vld [vmem:[#allocation5 + $0x484] ss:$8 sps:$4 sm:$0xff]  }
  0xd6   :  { %3418 = vmatmul.mubr.bf16.vlgmr.msra.gmra.mxu1 %v152_v17  ;;  %3427 = vmatpush1.bf16.msra.mxu0 %v9376_v18  ;;  %v9471_v17 = vld [vmem:[#allocation5 + $0x584] ss:$8 sps:$4 sm:$0xff]   ;;  %v9466_v18 = vld [vmem:[#allocation5 + $0x480] ss:$8 sps:$4 sm:$0xff]  }
  0xd7   :  { %3468 = vmatpush1.bf16.msra.mxu1 %v9379_v19  ;;  %3428 = vmatprep.subr.bf16.mxu0 %v9384_v20  ;;  %v9469_v19 = vld [vmem:[#allocation5 + $0x580] ss:$8 sps:$4 sm:$0xff]  }
  0xd8   :  { %3469 = vmatprep.subr.bf16.mxu1 %v9387_v21  ;;  %3458 = vmatprep.mubr.bf16.mxu0 %v155_v25  ;;  %v122_v20 = vld [vmem:[#allocation2 + $0x40] sm:$0xff]  ;;  %v124_v21 = vld [vmem:[#allocation2 + $0x50] sm:$0xff]  ;;  %v127_v25 = vld [vmem:[#allocation2 + $0x68] sm:$0xff] }
  0xd9   :  { %3499 = vmatprep.mubr.bf16.mxu1 %v157_v28  ;;  %v154_v26 = vpack.c.bf16 %v122_v20, %v122_v20  ;;  %v129_v28 = vld [vmem:[#allocation2 + $0x78] sm:$0xff]  ;;  %v692_v20 = vlaneseq }
  0xda   :  { %3429 = vmatpush1.bf16.msra.mxu0 %v9382_v23  ;;  %v9477_v23 = vld [vmem:[#allocation5 + $0x774] ss:$8 sps:$4 sm:$0xff]  }
  0xdb   :  { %3470 = vmatpush1.bf16.msra.mxu1 %v9385_v24  ;;  %3430 = vmatprep.subr.bf16.mxu0 %v9390_v27  ;;  %v9472_v24 = vld [vmem:[#allocation5 + $0x670] ss:$8 sps:$4 sm:$0xff]   ;;  %v156_v27 = vpack.c.bf16 %v124_v21, %v124_v21  ;;  %v9558_v21 = vld [vmem:[#allocation5 + $0x694] ss:$8 sps:$4 sm:$0xff]  }
  0xdc   :  { %3471 = vmatprep.subr.bf16.mxu1 %v9393_v29  ;;  %v9475_v29 = vld [vmem:[#allocation5 + $0x770] ss:$8 sps:$4 sm:$0xff]  }
  0xde   :  { %3431 = vmatpush1.bf16.msra.mxu0 %v9388_v30  ;;  %v9480_v30 = vld [vmem:[#allocation5 + $0x664] ss:$8 sps:$4 sm:$0xff]  }
  0xdf   :  { %3472 = vmatpush1.bf16.msra.mxu1 %v9391_v31  ;;  %3432 = vmatprep.subr.bf16.mxu0 %v9396_v32  ;;  %v9483_v31 = vld [vmem:[#allocation5 + $0x764] ss:$8 sps:$4 sm:$0xff]   ;;  %v159_v32 = vpack.c.bf16 %v127_v25, %v127_v25  ;;  %v10242_v25 = vshrl.u32 %v692_v20, 7 }
  0xe0   :  { %3473 = vmatprep.subr.bf16.mxu1 %v9399_v33  ;;  %v161_v33 = vpack.c.bf16 %v129_v28, %v129_v28  ;;  %v9562_v28 = vld [vmem:[#allocation5 + $0x680] ss:$8 sps:$4 sm:$0xff]   ;;  %v9615_v20 = vld [vmem:[#allocation5 + $0x904] ss:$8 sps:$4 sm:$0xff]  }
  0xe2   :  { %3433 = vmatpush1.bf16.msra.mxu0 %v9394_v34  ;;  %v9478_v34 = vld [vmem:[#allocation5 + $0x660] ss:$8 sps:$4 sm:$0xff]  }
  0xe3   :  { %3474 = vmatpush1.bf16.msra.mxu1 %v9397_v35  ;;  %3434 = vmatprep.subr.bf16.mxu0 %v9402_v36  ;;  %v9481_v35 = vld [vmem:[#allocation5 + $0x760] ss:$8 sps:$4 sm:$0xff]   ;;  %v9486_v36 = vld [vmem:[#allocation5 + $0x654] ss:$8 sps:$4 sm:$0xff]  }
  0xe4   :  { %3475 = vmatprep.subr.bf16.mxu1 %v9405_v37  ;;  %v9489_v37 = vld [vmem:[#allocation5 + $0x754] ss:$8 sps:$4 sm:$0xff]  }
  0xe6   :  { %3435 = vmatpush1.bf16.msra.mxu0 %v9400_v38  ;;  %v9484_v38 = vld [vmem:[#allocation5 + $0x650] ss:$8 sps:$4 sm:$0xff]  }
  0xe7   :  { %3476 = vmatpush1.bf16.msra.mxu1 %v9403_v39  ;;  %3436 = vmatprep.subr.bf16.mxu0 %v9408_v40  ;;  %v9487_v39 = vld [vmem:[#allocation5 + $0x750] ss:$8 sps:$4 sm:$0xff]   ;;  %v9492_v40 = vld [vmem:[#allocation5 + $0x644] ss:$8 sps:$4 sm:$0xff]  }
  0xe8   :  { %3477 = vmatprep.subr.bf16.mxu1 %v9411_v41  ;;  %v9495_v41 = vld [vmem:[#allocation5 + $0x744] ss:$8 sps:$4 sm:$0xff]  }
  0xea   :  { %3437 = vmatpush1.bf16.msra.mxu0 %v9406_v42  ;;  %v9490_v42 = vld [vmem:[#allocation5 + $0x640] ss:$8 sps:$4 sm:$0xff]  }
  0xeb   :  { %3478 = vmatpush1.bf16.msra.mxu1 %v9409_v43  ;;  %3438 = vmatprep.subr.bf16.mxu0 %v9414_v44  ;;  %v9493_v43 = vld [vmem:[#allocation5 + $0x740] ss:$8 sps:$4 sm:$0xff]   ;;  %v9498_v44 = vld [vmem:[#allocation5 + $0x634] ss:$8 sps:$4 sm:$0xff]  }
  0xec   :  { %3479 = vmatprep.subr.bf16.mxu1 %v9417_v45  ;;  %v9501_v45 = vld [vmem:[#allocation5 + $0x734] ss:$8 sps:$4 sm:$0xff]  }
  0xee   :  { %3439 = vmatpush1.bf16.msra.mxu0 %v9412_v46  ;;  %v9496_v46 = vld [vmem:[#allocation5 + $0x630] ss:$8 sps:$4 sm:$0xff]  }
  0xef   :  { %3480 = vmatpush1.bf16.msra.mxu1 %v9415_v47  ;;  %3440 = vmatprep.subr.bf16.mxu0 %v9420_v48  ;;  %v9499_v47 = vld [vmem:[#allocation5 + $0x730] ss:$8 sps:$4 sm:$0xff]   ;;  %v9504_v48 = vld [vmem:[#allocation5 + $0x624] ss:$8 sps:$4 sm:$0xff]  }
  0xf0   :  { %3481 = vmatprep.subr.bf16.mxu1 %v9423_v49  ;;  %v9507_v49 = vld [vmem:[#allocation5 + $0x724] ss:$8 sps:$4 sm:$0xff]  }
  0xf2   :  { %3441 = vmatpush1.bf16.msra.mxu0 %v9418_v50  ;;  %v9502_v50 = vld [vmem:[#allocation5 + $0x620] ss:$8 sps:$4 sm:$0xff]  }
  0xf3   :  { %3482 = vmatpush1.bf16.msra.mxu1 %v9421_v51  ;;  %3442 = vmatprep.subr.bf16.mxu0 %v9426_v52  ;;  %v9505_v51 = vld [vmem:[#allocation5 + $0x720] ss:$8 sps:$4 sm:$0xff]   ;;  %v9510_v52 = vld [vmem:[#allocation5 + $0x614] ss:$8 sps:$4 sm:$0xff]  }
  0xf4   :  { %3483 = vmatprep.subr.bf16.mxu1 %v9429_v53  ;;  %v9513_v53 = vld [vmem:[#allocation5 + $0x714] ss:$8 sps:$4 sm:$0xff]  }
  0xf6   :  { %3443 = vmatpush2.bf16.msra.mxu0 %v9424_v54  ;;  %v9508_v54 = vld [vmem:[#allocation5 + $0x610] ss:$8 sps:$4 sm:$0xff]  }
  0xf7   :  { %3484 = vmatpush2.bf16.msra.mxu1 %v9427_v55  ;;  %3444 = vmatprep.subr.bf16.mxu0 %v9432_v56  ;;  %v9511_v55 = vld [vmem:[#allocation5 + $0x710] ss:$8 sps:$4 sm:$0xff]   ;;  %v9516_v56 = vld [vmem:[#allocation5 + $0x604] ss:$8 sps:$4 sm:$0xff]  }
  0xf8   :  { %3485 = vmatprep.subr.bf16.mxu1 %v9435_v57  ;;  %v9519_v57 = vld [vmem:[#allocation5 + $0x704] ss:$8 sps:$4 sm:$0xff]  }
  0xfa   :  { %3445 = vmatpush2.bf16.msra.mxu0 %v9430_v58  ;;  %v9514_v58 = vld [vmem:[#allocation5 + $0x600] ss:$8 sps:$4 sm:$0xff]  }
  0xfb   :  { %3486 = vmatpush2.bf16.msra.mxu1 %v9433_v59  ;;  %3446 = vmatprep.subr.bf16.mxu0 %v9438_v60  ;;  %v9517_v59 = vld [vmem:[#allocation5 + $0x700] ss:$8 sps:$4 sm:$0xff]   ;;  %v9522_v60 = vld [vmem:[#allocation5 + $0x6f4] ss:$8 sps:$4 sm:$0xff]  }
  0xfc   :  { %3487 = vmatprep.subr.bf16.mxu1 %v9441_v61  ;;  %v9525_v61 = vld [vmem:[#allocation5 + $0x7f4] ss:$8 sps:$4 sm:$0xff]  }
  0xfe   :  { %3447 = vmatpush2.bf16.msra.mxu0 %v9436_v62  ;;  %v9520_v62 = vld [vmem:[#allocation5 + $0x6f0] ss:$8 sps:$4 sm:$0xff]  }
  0xff   :  { %3488 = vmatpush2.bf16.msra.mxu1 %v9439_v63  ;;  %3448 = vmatprep.subr.bf16.mxu0 %v9444_v0  ;;  %v9523_v63 = vld [vmem:[#allocation5 + $0x7f0] ss:$8 sps:$4 sm:$0xff]   ;;  %v9528_v0 = vld [vmem:[#allocation5 + $0x6e4] ss:$8 sps:$4 sm:$0xff]  }
 0x100   :  { %3489 = vmatprep.subr.bf16.mxu1 %v9447_v1  ;;  %v9531_v1 = vld [vmem:[#allocation5 + $0x7e4] ss:$8 sps:$4 sm:$0xff]  }
 0x102   :  { %3449 = vmatpush2.bf16.msra.mxu0 %v9442_v2  ;;  %v9526_v2 = vld [vmem:[#allocation5 + $0x6e0] ss:$8 sps:$4 sm:$0xff]  }
 0x103   :  { %3490 = vmatpush2.bf16.msra.mxu1 %v9445_v3  ;;  %3450 = vmatprep.subr.bf16.mxu0 %v9450_v4  ;;  %v9529_v3 = vld [vmem:[#allocation5 + $0x7e0] ss:$8 sps:$4 sm:$0xff]   ;;  %v9534_v4 = vld [vmem:[#allocation5 + $0x6d4] ss:$8 sps:$4 sm:$0xff]  }
 0x104   :  { %3491 = vmatprep.subr.bf16.mxu1 %v9453_v5  ;;  %v9537_v5 = vld [vmem:[#allocation5 + $0x7d4] ss:$8 sps:$4 sm:$0xff]  }
 0x106   :  { %3451 = vmatpush2.bf16.msra.mxu0 %v9448_v6  ;;  %v9532_v6 = vld [vmem:[#allocation5 + $0x6d0] ss:$8 sps:$4 sm:$0xff]  }
 0x107   :  { %3492 = vmatpush2.bf16.msra.mxu1 %v9451_v7  ;;  %3452 = vmatprep.subr.bf16.mxu0 %v9456_v8  ;;  %v9535_v7 = vld [vmem:[#allocation5 + $0x7d0] ss:$8 sps:$4 sm:$0xff]   ;;  %v9540_v8 = vld [vmem:[#allocation5 + $0x6c4] ss:$8 sps:$4 sm:$0xff]  }
 0x108   :  { %3493 = vmatprep.subr.bf16.mxu1 %v9459_v9  ;;  %v9543_v9 = vld [vmem:[#allocation5 + $0x7c4] ss:$8 sps:$4 sm:$0xff]  }
 0x10a   :  { %3453 = vmatpush2.bf16.msra.mxu0 %v9454_v10  ;;  %v9538_v10 = vld [vmem:[#allocation5 + $0x6c0] ss:$8 sps:$4 sm:$0xff]  }
 0x10b   :  { %3494 = vmatpush2.bf16.msra.mxu1 %v9457_v11  ;;  %3454 = vmatprep.subr.bf16.mxu0 %v9462_v12  ;;  %v9541_v11 = vld [vmem:[#allocation5 + $0x7c0] ss:$8 sps:$4 sm:$0xff]   ;;  %v9546_v12 = vld [vmem:[#allocation5 + $0x6b4] ss:$8 sps:$4 sm:$0xff]  }
 0x10c   :  { %3495 = vmatprep.subr.bf16.mxu1 %v9465_v13  ;;  %v9549_v13 = vld [vmem:[#allocation5 + $0x7b4] ss:$8 sps:$4 sm:$0xff]  }
 0x10e   :  { %3455 = vmatpush2.bf16.msra.mxu0 %v9460_v14  ;;  %v9544_v14 = vld [vmem:[#allocation5 + $0x6b0] ss:$8 sps:$4 sm:$0xff]  }
 0x10f   :  { %3496 = vmatpush2.bf16.msra.mxu1 %v9463_v15  ;;  %3456 = vmatprep.subr.bf16.mxu0 %v9468_v16  ;;  %v9547_v15 = vld [vmem:[#allocation5 + $0x7b0] ss:$8 sps:$4 sm:$0xff]   ;;  %v9552_v16 = vld [vmem:[#allocation5 + $0x6a4] ss:$8 sps:$4 sm:$0xff]  }
 0x110   :  { %3497 = vmatprep.subr.bf16.mxu1 %v9471_v17  ;;  %v9555_v17 = vld [vmem:[#allocation5 + $0x7a4] ss:$8 sps:$4 sm:$0xff]  }
 0x112   :  { %3457 = vmatpush2.bf16.msra.mxu0 %v9466_v18  ;;  %v9550_v18 = vld [vmem:[#allocation5 + $0x6a0] ss:$8 sps:$4 sm:$0xff]  }
 0x113   :  { %3498 = vmatpush2.bf16.msra.mxu1 %v9469_v19  ;;  %3508 = vmatprep.subr.bf16.mxu0 %v9474_v22  ;;  %v9553_v19 = vld [vmem:[#allocation5 + $0x7a0] ss:$8 sps:$4 sm:$0xff]   ;;  %v9561_v22 = vld [vmem:[#allocation5 + $0x794] ss:$8 sps:$4 sm:$0xff]  }
 0x114   :  { %3549 = vmatprep.subr.bf16.mxu1 %v9477_v23  ;;  %v9556_v23 = vld [vmem:[#allocation5 + $0x690] ss:$8 sps:$4 sm:$0xff]  }
 0x115   :  { %3459 = vmatmul.mubr.bf16.vlgmr.msra.gmra.mxu0 %v154_v26  ;;  %v9564_v26 = vld [vmem:[#allocation5 + $0x684] ss:$8 sps:$4 sm:$0xff]  }
 0x116   :  { %3500 = vmatmul.mubr.bf16.vlgmr.msra.gmra.mxu1 %v156_v27  ;;  %3509 = vmatpush1.bf16.msra.mxu0 %v9472_v24  ;;  %v9559_v24 = vld [vmem:[#allocation5 + $0x790] ss:$8 sps:$4 sm:$0xff]   ;;  %v9567_v27 = vld [vmem:[#allocation5 + $0x784] ss:$8 sps:$4 sm:$0xff]  }
 0x117   :  { %3550 = vmatpush1.bf16.msra.mxu1 %v9475_v29  ;;  %3510 = vmatprep.subr.bf16.mxu0 %v9480_v30  ;;  %v9565_v29 = vld [vmem:[#allocation5 + $0x780] ss:$8 sps:$4 sm:$0xff]  }
 0x118   :  { %3551 = vmatprep.subr.bf16.mxu1 %v9483_v31  ;;  %3540 = vmatprep.mubr.bf16.mxu0 %v159_v32  ;;  %v690_v30 = vld [vmem:[#allocation7] sm:$0x3]  ;;  %v10245_v32 = vsub.s32 0, %v10242_v25 }
 0x119   :  { %3581 = vmatprep.mubr.bf16.mxu1 %v161_v33  ;;  %v126_v31 = vld [vmem:[#allocation2 + $0x60] sm:$0xff]  ;;  %v128_v33 = vld [vmem:[#allocation2 + $0x70] sm:$0xff] }
 0x11a   :  { %3511 = vmatpush1.bf16.msra.mxu0 %v9478_v34  ;;  %v9570_v34 = vld [vmem:[#allocation5 + $0x874] ss:$8 sps:$4 sm:$0xff]  }
 0x11b   :  { %3552 = vmatpush1.bf16.msra.mxu1 %v9481_v35  ;;  %3512 = vmatprep.subr.bf16.mxu0 %v9486_v36  ;;  %v9573_v35 = vld [vmem:[#allocation5 + $0x974] ss:$8 sps:$4 sm:$0xff]   ;;  %v9568_v36 = vld [vmem:[#allocation5 + $0x870] ss:$8 sps:$4 sm:$0xff]  }
 0x11c   :  { %3553 = vmatprep.subr.bf16.mxu1 %v9489_v37  ;;  %v10248_v37 = vsub.s32 1, %v10242_v25 }
 0x11e   :  { %3513 = vmatpush1.bf16.msra.mxu0 %v9484_v38  ;;  %v131_v38 = vld [vmem:[#allocation2 + $0x88] sm:$0xff] }
 0x11f   :  { %3554 = vmatpush1.bf16.msra.mxu1 %v9487_v39  ;;  %3514 = vmatprep.subr.bf16.mxu0 %v9492_v40  ;;  %v158_v39 = vpack.c.bf16 %v126_v31, %v126_v31  ;;  %v160_v40 = vpack.c.bf16 %v128_v33, %v128_v33  ;;  %v9625_v31 = vld [vmem:[#allocation5 + $0x9e0] ss:$8 sps:$4 sm:$0xff]   ;;  %v9630_v33 = vld [vmem:[#allocation5 + $0x8d4] ss:$8 sps:$4 sm:$0xff]  }
 0x120   :  { %3555 = vmatprep.subr.bf16.mxu1 %v9495_v41  ;;  %v133_v41 = vld [vmem:[#allocation2 + $0x98] sm:$0xff] }
 0x122   :  { %3515 = vmatpush1.bf16.msra.mxu0 %v9490_v42  ;;  %v695_v42 = vrot.slane %v690_v30, %v10245_v32 }
 0x123   :  { %3556 = vmatpush1.bf16.msra.mxu1 %v9493_v43  ;;  %3516 = vmatprep.subr.bf16.mxu0 %v9498_v44  ;;  %v9571_v43 = vld [vmem:[#allocation5 + $0x970] ss:$8 sps:$4 sm:$0xff]   ;;  %v9576_v44 = vld [vmem:[#allocation5 + $0x864] ss:$8 sps:$4 sm:$0xff]  }
 0x124   :  { %3557 = vmatprep.subr.bf16.mxu1 %v9501_v45  ;;  %v9579_v45 = vld [vmem:[#allocation5 + $0x964] ss:$8 sps:$4 sm:$0xff]  }
 0x126   :  { %3517 = vmatpush1.bf16.msra.mxu0 %v9496_v46  ;;  %v699_v46 = vrot.slane %v690_v30, %v10248_v37  ;;  %v9622_v30 = vld [vmem:[#allocation5 + $0x8e0] ss:$8 sps:$4 sm:$0xff]  }
 0x127   :  { %3558 = vmatpush1.bf16.msra.mxu1 %v9499_v47  ;;  %3518 = vmatprep.subr.bf16.mxu0 %v9504_v48  ;;  %v163_v47 = vpack.c.bf16 %v131_v38, %v131_v38  ;;  %v165_v48 = vpack.c.bf16 %v133_v41, %v133_v41  ;;  %v9636_v38 = vld [vmem:[#allocation5 + $0x8c4] ss:$8 sps:$4 sm:$0xff]   ;;  %v9637_v41 = vld [vmem:[#allocation5 + $0x9c0] ss:$8 sps:$4 sm:$0xff]  }
 0x128   :  { %3559 = vmatprep.subr.bf16.mxu1 %v9507_v49 }
 0x12a   :  { %3519 = vmatpush1.bf16.msra.mxu0 %v9502_v50 }
 0x12b   :  { %3560 = vmatpush1.bf16.msra.mxu1 %v9505_v51  ;;  %3520 = vmatprep.subr.bf16.mxu0 %v9510_v52  ;;  %v9574_v51 = vld [vmem:[#allocation5 + $0x860] ss:$8 sps:$4 sm:$0xff]  }
 0x12c   :  { %3561 = vmatprep.subr.bf16.mxu1 %v9513_v53  ;;  %v9577_v53 = vld [vmem:[#allocation5 + $0x960] ss:$8 sps:$4 sm:$0xff]  }
 0x12e   :  { %3521 = vmatpush1.bf16.msra.mxu0 %v9508_v54 }
 0x12f   :  { %3562 = vmatpush1.bf16.msra.mxu1 %v9511_v55  ;;  %3522 = vmatprep.subr.bf16.mxu0 %v9516_v56  ;;  %v9582_v56 = vld [vmem:[#allocation5 + $0x854] ss:$8 sps:$4 sm:$0xff]  }
 0x130   :  { %3563 = vmatprep.subr.bf16.mxu1 %v9519_v57  ;;  %v9585_v57 = vld [vmem:[#allocation5 + $0x954] ss:$8 sps:$4 sm:$0xff]  }
 0x132   :  { %3523 = vmatpush1.bf16.msra.mxu0 %v9514_v58 }
 0x133   :  { %3564 = vmatpush1.bf16.msra.mxu1 %v9517_v59  ;;  %3524 = vmatprep.subr.bf16.mxu0 %v9522_v60 }
 0x134   :  { %3565 = vmatprep.subr.bf16.mxu1 %v9525_v61 }
 0x136   :  { %3525 = vmatpush2.bf16.msra.mxu0 %v9520_v62  ;;  %v9580_v62 = vld [vmem:[#allocation5 + $0x850] ss:$8 sps:$4 sm:$0xff]  }
 0x137   :  { %3566 = vmatpush2.bf16.msra.mxu1 %v9523_v63  ;;  %3526 = vmatprep.subr.bf16.mxu0 %v9528_v0  ;;  %v9583_v0 = vld [vmem:[#allocation5 + $0x950] ss:$8 sps:$4 sm:$0xff]  }
 0x138   :  { %3567 = vmatprep.subr.bf16.mxu1 %v9531_v1 }
 0x13a   :  { %3527 = vmatpush2.bf16.msra.mxu0 %v9526_v2 }
 0x13b   :  { %3568 = vmatpush2.bf16.msra.mxu1 %v9529_v3  ;;  %3528 = vmatprep.subr.bf16.mxu0 %v9534_v4  ;;  %v9588_v3 = vld [vmem:[#allocation5 + $0x844] ss:$8 sps:$4 sm:$0xff]  }
 0x13c   :  { %3569 = vmatprep.subr.bf16.mxu1 %v9537_v5  ;;  %v9591_v4 = vld [vmem:[#allocation5 + $0x944] ss:$8 sps:$4 sm:$0xff]   ;;  %v9586_v5 = vld [vmem:[#allocation5 + $0x840] ss:$8 sps:$4 sm:$0xff]  }
 0x13e   :  { %3529 = vmatpush2.bf16.msra.mxu0 %v9532_v6  ;;  %v9589_v6 = vld [vmem:[#allocation5 + $0x940] ss:$8 sps:$4 sm:$0xff]  }
 0x13f   :  { %3570 = vmatpush2.bf16.msra.mxu1 %v9535_v7  ;;  %3530 = vmatprep.subr.bf16.mxu0 %v9540_v8  ;;  %v9594_v7 = vld [vmem:[#allocation5 + $0x834] ss:$8 sps:$4 sm:$0xff]  }
 0x140   :  { %3571 = vmatprep.subr.bf16.mxu1 %v9543_v9  ;;  %v9597_v8 = vld [vmem:[#allocation5 + $0x934] ss:$8 sps:$4 sm:$0xff]   ;;  %v9592_v9 = vld [vmem:[#allocation5 + $0x830] ss:$8 sps:$4 sm:$0xff]  }
 0x142   :  { %3531 = vmatpush2.bf16.msra.mxu0 %v9538_v10  ;;  %v9595_v10 = vld [vmem:[#allocation5 + $0x930] ss:$8 sps:$4 sm:$0xff]  }
 0x143   :  { %3572 = vmatpush2.bf16.msra.mxu1 %v9541_v11  ;;  %3532 = vmatprep.subr.bf16.mxu0 %v9546_v12  ;;  %v9600_v11 = vld [vmem:[#allocation5 + $0x824] ss:$8 sps:$4 sm:$0xff]  }
 0x144   :  { %3573 = vmatprep.subr.bf16.mxu1 %v9549_v13  ;;  %v9603_v12 = vld [vmem:[#allocation5 + $0x924] ss:$8 sps:$4 sm:$0xff]   ;;  %v9598_v13 = vld [vmem:[#allocation5 + $0x820] ss:$8 sps:$4 sm:$0xff]  }
 0x146   :  { %3533 = vmatpush2.bf16.msra.mxu0 %v9544_v14  ;;  %v9601_v14 = vld [vmem:[#allocation5 + $0x920] ss:$8 sps:$4 sm:$0xff]  }
 0x147   :  { %3574 = vmatpush2.bf16.msra.mxu1 %v9547_v15  ;;  %3534 = vmatprep.subr.bf16.mxu0 %v9552_v16  ;;  %v9606_v15 = vld [vmem:[#allocation5 + $0x814] ss:$8 sps:$4 sm:$0xff]  }
 0x148   :  { %3575 = vmatprep.subr.bf16.mxu1 %v9555_v17  ;;  %v9609_v16 = vld [vmem:[#allocation5 + $0x914] ss:$8 sps:$4 sm:$0xff]   ;;  %v9604_v17 = vld [vmem:[#allocation5 + $0x810] ss:$8 sps:$4 sm:$0xff]  }
 0x14a   :  { %3535 = vmatpush2.bf16.msra.mxu0 %v9550_v18  ;;  %v9607_v18 = vld [vmem:[#allocation5 + $0x910] ss:$8 sps:$4 sm:$0xff]  }
 0x14b   :  { %3576 = vmatpush2.bf16.msra.mxu1 %v9553_v19  ;;  %3536 = vmatprep.subr.bf16.mxu0 %v9558_v21  ;;  %v9612_v19 = vld [vmem:[#allocation5 + $0x804] ss:$8 sps:$4 sm:$0xff]   ;;  %v9610_v21 = vld [vmem:[#allocation5 + $0x800] ss:$8 sps:$4 sm:$0xff]  }
 0x14c   :  { %3577 = vmatprep.subr.bf16.mxu1 %v9561_v22  ;;  %v9613_v22 = vld [vmem:[#allocation5 + $0x900] ss:$8 sps:$4 sm:$0xff]  }
 0x14e   :  { %3537 = vmatpush2.bf16.msra.mxu0 %v9556_v23  ;;  %v9618_v23 = vld [vmem:[#allocation5 + $0x8f4] ss:$8 sps:$4 sm:$0xff]  }
 0x14f   :  { %3578 = vmatpush2.bf16.msra.mxu1 %v9559_v24  ;;  %3538 = vmatprep.subr.bf16.mxu0 %v9564_v26  ;;  %v9621_v24 = vld [vmem:[#allocation5 + $0x9f4] ss:$8 sps:$4 sm:$0xff]   ;;  %v9616_v26 = vld [vmem:[#allocation5 + $0x8f0] ss:$8 sps:$4 sm:$0xff]  }
 0x150   :  { %3579 = vmatprep.subr.bf16.mxu1 %v9567_v27  ;;  %v9619_v27 = vld [vmem:[#allocation5 + $0x9f0] ss:$8 sps:$4 sm:$0xff]  }
 0x152   :  { %3539 = vmatpush2.bf16.msra.mxu0 %v9562_v28  ;;  %v9624_v28 = vld [vmem:[#allocation5 + $0x8e4] ss:$8 sps:$4 sm:$0xff]  }
 0x153   :  { %3580 = vmatpush2.bf16.msra.mxu1 %v9565_v29  ;;  %3590 = vmatprep.subr.bf16.mxu0 %v9570_v34  ;;  %v9627_v29 = vld [vmem:[#allocation5 + $0x9e4] ss:$8 sps:$4 sm:$0xff]   ;;  %v9633_v34 = vld [vmem:[#allocation5 + $0x9d4] ss:$8 sps:$4 sm:$0xff]  }
 0x154   :  { %3631 = vmatprep.subr.bf16.mxu1 %v9573_v35  ;;  %v9628_v35 = vld [vmem:[#allocation5 + $0x8d0] ss:$8 sps:$4 sm:$0xff]  }
 0x155   :  { %v3296_v49 = vpop.f32.mrf.mxu0  ;;  %3541 = vmatmul.mubr.bf16.vlgmr.msra.gmra.mxu0 %v158_v39  ;;  %v9639_v39 = vld [vmem:[#allocation5 + $0x9c4] ss:$8 sps:$4 sm:$0xff]  }
 0x156   :  { %v3337_v50 = vpop.f32.mrf.mxu1  ;;  %3582 = vmatmul.mubr.bf16.vlgmr.msra.gmra.mxu1 %v160_v40  ;;  %v3297_v52 = vadd.f32 %v3296_v49, %v695_v42  ;;  %3591 = vmatpush1.bf16.msra.mxu0 %v9568_v36  ;;  %v9631_v36 = vld [vmem:[#allocation5 + $0x9d0] ss:$8 sps:$4 sm:$0xff]   ;;  %v9634_v40 = vld [vmem:[#allocation5 + $0x8c0] ss:$8 sps:$4 sm:$0xff]   ;;  %v9642_v42 = vld [vmem:[#allocation5 + $0x8b4] ss:$8 sps:$4 sm:$0xff]  }
 0x157   :  { %3632 = vmatpush1.bf16.msra.mxu1 %v9571_v43  ;;  %v3298_v54 = vpop.f32.mrf.mxu0  ;;  %3592 = vmatprep.subr.bf16.mxu0 %v9576_v44  ;;  %v9645_v43 = vld [vmem:[#allocation5 + $0x9b4] ss:$8 sps:$4 sm:$0xff]   ;;  %v9640_v44 = vld [vmem:[#allocation5 + $0x8b0] ss:$8 sps:$4 sm:$0xff]   ;;  %v9649_v49 = vld [vmem:[#allocation5 + $0x9a0] ss:$8 sps:$4 sm:$0xff]  }
 0x158   :  { %v3339_v55 = vpop.f32.mrf.mxu1  ;;  %3633 = vmatprep.subr.bf16.mxu1 %v9579_v45  ;;  %v10252_v58 = vadd.f32 %v3337_v50, %v3297_v52  ;;  %v3299_v59 = vadd.f32 %v3298_v54, %v699_v46  ;;  %3622 = vmatprep.mubr.bf16.mxu0 %v163_v47  ;;  %v9643_v45 = vld [vmem:[#allocation5 + $0x9b0] ss:$8 sps:$4 sm:$0xff]   ;;  %v9648_v46 = vld [vmem:[#allocation5 + $0x8a4] ss:$8 sps:$4 sm:$0xff]   ;;  %v9654_v50 = vld [vmem:[#allocation5 + $0x894] ss:$8 sps:$4 sm:$0xff]  }
 0x159   :  { %3663 = vmatprep.mubr.bf16.mxu1 %v165_v48  ;;  %v3300_v60 = vpop.f32.mrf.mxu0  ;;  %v9651_v47 = vld [vmem:[#allocation5 + $0x9a4] ss:$8 sps:$4 sm:$0xff]   ;;  %v9646_v48 = vld [vmem:[#allocation5 + $0x8a0] ss:$8 sps:$4 sm:$0xff]   ;;  %v9652_v52 = vld [vmem:[#allocation5 + $0x890] ss:$8 sps:$4 sm:$0xff]  }
 0x15a   :  { %v3341_v61 = vpop.f32.mrf.mxu1  ;;  %v10254_v63 = vadd.f32 %v3339_v55, %v3299_v59  ;;  %3593 = vmatpush1.bf16.msra.mxu0 %v9574_v51  ;;  %v9657_v51 = vld [vmem:[#allocation5 + $0x994] ss:$8 sps:$4 sm:$0xff]   ;;  %v9660_v54 = vld [vmem:[#allocation5 + $0x884] ss:$8 sps:$4 sm:$0xff]  }
 0x15b   :  { %3634 = vmatpush1.bf16.msra.mxu1 %v9577_v53  ;;  %v3301_v1 = vpop.f32.mrf.mxu0  ;;  %3594 = vmatprep.subr.bf16.mxu0 %v9582_v56  ;;  %v9655_v53 = vld [vmem:[#allocation5 + $0x990] ss:$8 sps:$4 sm:$0xff]   ;;  %v9663_v55 = vld [vmem:[#allocation5 + $0x984] ss:$8 sps:$4 sm:$0xff]   ;;  %v9658_v56 = vld [vmem:[#allocation5 + $0x880] ss:$8 sps:$4 sm:$0xff]  }
 0x15c   :  { %v3342_v2 = vpop.f32.mrf.mxu1  ;;  %3635 = vmatprep.subr.bf16.mxu1 %v9585_v57  ;;  %v9661_v57 = vld [vmem:[#allocation5 + $0x980] ss:$8 sps:$4 sm:$0xff]   ;;  %v132_v60 = vld [vmem:[#allocation2 + $0x90] sm:$0xff] }
 0x15d   :  { %v130_v59 = vld [vmem:[#allocation2 + $0x80] sm:$0xff]  ;;  %v9666_v61 = vld [vmem:[#allocation5 + $0xa74] ss:$8 sps:$4 sm:$0xff]   ;;  %v164_v1 = vpack.c.bf16 %v132_v60, %v132_v60  ;;  %v135_v2 = vld [vmem:[#allocation2 + $0xa8] sm:$0xff] }
 0x15e   :  { %3595 = vmatpush1.bf16.msra.mxu0 %v9580_v62  ;;  %v9669_v62 = vld [vmem:[#allocation5 + $0xb74] ss:$8 sps:$4 sm:$0xff]   ;;  %v9724_v60 = vld [vmem:[#allocation5 + $0xad0] ss:$8 sps:$4 sm:$0xff]  }
 0x15f   :  { %3636 = vmatpush1.bf16.msra.mxu1 %v9583_v0  ;;  %3596 = vmatprep.subr.bf16.mxu0 %v9588_v3  ;;  %v162_v0 = vpack.c.bf16 %v130_v59, %v130_v59  ;;  %v137_v3 = vld [vmem:[#allocation2 + $0xb8] sm:$0xff] }
 0x160   :  { %3637 = vmatprep.subr.bf16.mxu1 %v9591_v4  ;;  %v9664_v4 = vld [vmem:[#allocation5 + $0xa70] ss:$8 sps:$4 sm:$0xff]   ;;  %v9729_v59 = vld [vmem:[#allocation5 + $0xbd4] ss:$8 sps:$4 sm:$0xff]  }
 0x162   :  { %3597 = vmatpush1.bf16.msra.mxu0 %v9586_v5  ;;  %v9667_v5 = vld [vmem:[#allocation5 + $0xb70] ss:$8 sps:$4 sm:$0xff]  }
 0x163   :  { %3638 = vmatpush1.bf16.msra.mxu1 %v9589_v6  ;;  %3598 = vmatprep.subr.bf16.mxu0 %v9594_v7  ;;  %v9672_v6 = vld [vmem:[#allocation5 + $0xa64] ss:$8 sps:$4 sm:$0xff]  }
 0x164   :  { %3639 = vmatprep.subr.bf16.mxu1 %v9597_v8  ;;  %v9675_v7 = vld [vmem:[#allocation5 + $0xb64] ss:$8 sps:$4 sm:$0xff]   ;;  %v9670_v8 = vld [vmem:[#allocation5 + $0xa60] ss:$8 sps:$4 sm:$0xff]  }
 0x166   :  { %3599 = vmatpush1.bf16.msra.mxu0 %v9592_v9  ;;  %v9673_v9 = vld [vmem:[#allocation5 + $0xb60] ss:$8 sps:$4 sm:$0xff]  }
 0x167   :  { %3640 = vmatpush1.bf16.msra.mxu1 %v9595_v10  ;;  %3600 = vmatprep.subr.bf16.mxu0 %v9600_v11  ;;  %v167_v10 = vpack.c.bf16 %v135_v2, %v135_v2  ;;  %v169_v11 = vpack.c.bf16 %v137_v3, %v137_v3  ;;  %v9733_v2 = vld [vmem:[#allocation5 + $0xbc0] ss:$8 sps:$4 sm:$0xff]   ;;  %v9738_v3 = vld [vmem:[#allocation5 + $0xab4] ss:$8 sps:$4 sm:$0xff]  }
 0x168   :  { %3641 = vmatprep.subr.bf16.mxu1 %v9603_v12 }
 0x16a   :  { %3601 = vmatpush1.bf16.msra.mxu0 %v9598_v13 }
 0x16b   :  { %3642 = vmatpush1.bf16.msra.mxu1 %v9601_v14  ;;  %3602 = vmatprep.subr.bf16.mxu0 %v9606_v15 }
 0x16c   :  { %3643 = vmatprep.subr.bf16.mxu1 %v9609_v16 }
 0x16e   :  { %3603 = vmatpush1.bf16.msra.mxu0 %v9604_v17  ;;  %v9678_v17 = vld [vmem:[#allocation5 + $0xa54] ss:$8 sps:$4 sm:$0xff]  }
 0x16f   :  { %3644 = vmatpush1.bf16.msra.mxu1 %v9607_v18  ;;  %3604 = vmatprep.subr.bf16.mxu0 %v9612_v19  ;;  %v9681_v18 = vld [vmem:[#allocation5 + $0xb54] ss:$8 sps:$4 sm:$0xff]  }
 0x170   :  { %3645 = vmatprep.subr.bf16.mxu1 %v9615_v20 }
 0x172   :  { %3605 = vmatpush1.bf16.msra.mxu0 %v9610_v21  ;;  %v9676_v21 = vld [vmem:[#allocation5 + $0xa50] ss:$8 sps:$4 sm:$0xff]  }
 0x173   :  { %3646 = vmatpush1.bf16.msra.mxu1 %v9613_v22  ;;  %3606 = vmatprep.subr.bf16.mxu0 %v9618_v23  ;;  %v9679_v22 = vld [vmem:[#allocation5 + $0xb50] ss:$8 sps:$4 sm:$0xff]  }
 0x174   :  { %3647 = vmatprep.subr.bf16.mxu1 %v9621_v24 }
 0x176   :  { %3607 = vmatpush2.bf16.msra.mxu0 %v9616_v26 }
 0x177   :  { %3648 = vmatpush2.bf16.msra.mxu1 %v9619_v27  ;;  %3608 = vmatprep.subr.bf16.mxu0 %v9624_v28  ;;  %v9684_v28 = vld [vmem:[#allocation5 + $0xa44] ss:$8 sps:$4 sm:$0xff]  }
 0x178   :  { %3649 = vmatprep.subr.bf16.mxu1 %v9627_v29  ;;  %v9687_v29 = vld [vmem:[#allocation5 + $0xb44] ss:$8 sps:$4 sm:$0xff]  }
 0x17a   :  { %3609 = vmatpush2.bf16.msra.mxu0 %v9622_v30  ;;  %v9682_v30 = vld [vmem:[#allocation5 + $0xa40] ss:$8 sps:$4 sm:$0xff]  }
 0x17b   :  { %3650 = vmatpush2.bf16.msra.mxu1 %v9625_v31  ;;  %3610 = vmatprep.subr.bf16.mxu0 %v9630_v33  ;;  %v9690_v31 = vld [vmem:[#allocation5 + $0xa34] ss:$8 sps:$4 sm:$0xff]  }
 0x17c   :  { %3651 = vmatprep.subr.bf16.mxu1 %v9633_v34  ;;  %v9693_v33 = vld [vmem:[#allocation5 + $0xb34] ss:$8 sps:$4 sm:$0xff]   ;;  %v9688_v34 = vld [vmem:[#allocation5 + $0xa30] ss:$8 sps:$4 sm:$0xff]  }
 0x17e   :  { %3611 = vmatpush2.bf16.msra.mxu0 %v9628_v35  ;;  %v9691_v35 = vld [vmem:[#allocation5 + $0xb30] ss:$8 sps:$4 sm:$0xff]  }
 0x17f   :  { %3652 = vmatpush2.bf16.msra.mxu1 %v9631_v36  ;;  %3612 = vmatprep.subr.bf16.mxu0 %v9636_v38  ;;  %v9696_v36 = vld [vmem:[#allocation5 + $0xa24] ss:$8 sps:$4 sm:$0xff]  }
 0x180   :  { %3653 = vmatprep.subr.bf16.mxu1 %v9639_v39  ;;  %v9699_v38 = vld [vmem:[#allocation5 + $0xb24] ss:$8 sps:$4 sm:$0xff]   ;;  %v9694_v39 = vld [vmem:[#allocation5 + $0xa20] ss:$8 sps:$4 sm:$0xff]  }
 0x182   :  { %3613 = vmatpush2.bf16.msra.mxu0 %v9634_v40  ;;  %v9697_v40 = vld [vmem:[#allocation5 + $0xb20] ss:$8 sps:$4 sm:$0xff]  }
 0x183   :  { %3654 = vmatpush2.bf16.msra.mxu1 %v9637_v41  ;;  %3614 = vmatprep.subr.bf16.mxu0 %v9642_v42  ;;  %v9702_v41 = vld [vmem:[#allocation5 + $0xa14] ss:$8 sps:$4 sm:$0xff]  }
 0x184   :  { %3655 = vmatprep.subr.bf16.mxu1 %v9645_v43  ;;  %v9705_v42 = vld [vmem:[#allocation5 + $0xb14] ss:$8 sps:$4 sm:$0xff]   ;;  %v9700_v43 = vld [vmem:[#allocation5 + $0xa10] ss:$8 sps:$4 sm:$0xff]  }
 0x186   :  { %3615 = vmatpush2.bf16.msra.mxu0 %v9640_v44  ;;  %v9703_v44 = vld [vmem:[#allocation5 + $0xb10] ss:$8 sps:$4 sm:$0xff]  }
 0x187   :  { %3656 = vmatpush2.bf16.msra.mxu1 %v9643_v45  ;;  %3616 = vmatprep.subr.bf16.mxu0 %v9648_v46  ;;  %v9708_v45 = vld [vmem:[#allocation5 + $0xa04] ss:$8 sps:$4 sm:$0xff]  }
 0x188   :  { %3657 = vmatprep.subr.bf16.mxu1 %v9651_v47  ;;  %v9711_v46 = vld [vmem:[#allocation5 + $0xb04] ss:$8 sps:$4 sm:$0xff]   ;;  %v9706_v47 = vld [vmem:[#allocation5 + $0xa00] ss:$8 sps:$4 sm:$0xff]  }
 0x18a   :  { %3617 = vmatpush2.bf16.msra.mxu0 %v9646_v48  ;;  %v9709_v48 = vld [vmem:[#allocation5 + $0xb00] ss:$8 sps:$4 sm:$0xff]  }
 0x18b   :  { %3658 = vmatpush2.bf16.msra.mxu1 %v9649_v49  ;;  %3618 = vmatprep.subr.bf16.mxu0 %v9654_v50  ;;  %v9714_v49 = vld [vmem:[#allocation5 + $0xaf4] ss:$8 sps:$4 sm:$0xff]  }
 0x18c   :  { %3659 = vmatprep.subr.bf16.mxu1 %v9657_v51  ;;  %v9717_v50 = vld [vmem:[#allocation5 + $0xbf4] ss:$8 sps:$4 sm:$0xff]   ;;  %v9712_v51 = vld [vmem:[#allocation5 + $0xaf0] ss:$8 sps:$4 sm:$0xff]  }
 0x18e   :  { %3619 = vmatpush2.bf16.msra.mxu0 %v9652_v52  ;;  %v9715_v52 = vld [vmem:[#allocation5 + $0xbf0] ss:$8 sps:$4 sm:$0xff]  }
 0x18f   :  { %3660 = vmatpush2.bf16.msra.mxu1 %v9655_v53  ;;  %3620 = vmatprep.subr.bf16.mxu0 %v9660_v54  ;;  %v9720_v53 = vld [vmem:[#allocation5 + $0xae4] ss:$8 sps:$4 sm:$0xff]  }
 0x190   :  { %3661 = vmatprep.subr.bf16.mxu1 %v9663_v55  ;;  %v9723_v54 = vld [vmem:[#allocation5 + $0xbe4] ss:$8 sps:$4 sm:$0xff]   ;;  %v9718_v55 = vld [vmem:[#allocation5 + $0xae0] ss:$8 sps:$4 sm:$0xff]  }
 0x192   :  { %3621 = vmatpush2.bf16.msra.mxu0 %v9658_v56  ;;  %v9721_v56 = vld [vmem:[#allocation5 + $0xbe0] ss:$8 sps:$4 sm:$0xff]  }
 0x193   :  { %3662 = vmatpush2.bf16.msra.mxu1 %v9661_v57  ;;  %3672 = vmatprep.subr.bf16.mxu0 %v9666_v61  ;;  %v9726_v57 = vld [vmem:[#allocation5 + $0xad4] ss:$8 sps:$4 sm:$0xff]   ;;  %v9727_v61 = vld [vmem:[#allocation5 + $0xbd0] ss:$8 sps:$4 sm:$0xff]  }
 0x194   :  { %3713 = vmatprep.subr.bf16.mxu1 %v9669_v62  ;;  %v9732_v62 = vld [vmem:[#allocation5 + $0xac4] ss:$8 sps:$4 sm:$0xff]  }
 0x195   :  { %v3378_v12 = vpop.f32.mrf.mxu0  ;;  %3623 = vmatmul.mubr.bf16.vlgmr.msra.gmra.mxu0 %v162_v0  ;;  %v9735_v0 = vld [vmem:[#allocation5 + $0xbc4] ss:$8 sps:$4 sm:$0xff]  }
 0x196   :  { %v3419_v13 = vpop.f32.mrf.mxu1  ;;  %3664 = vmatmul.mubr.bf16.vlgmr.msra.gmra.mxu1 %v164_v1  ;;  %v3379_v14 = vadd.f32 %v3378_v12, %v10252_v58  ;;  %3673 = vmatpush1.bf16.msra.mxu0 %v9664_v4  ;;  %v9730_v1 = vld [vmem:[#allocation5 + $0xac0] ss:$8 sps:$4 sm:$0xff]   ;;  %v9741_v4 = vld [vmem:[#allocation5 + $0xbb4] ss:$8 sps:$4 sm:$0xff]  }
 0x197   :  { %3714 = vmatpush1.bf16.msra.mxu1 %v9667_v5  ;;  %v3380_v15 = vpop.f32.mrf.mxu0  ;;  %3674 = vmatprep.subr.bf16.mxu0 %v9672_v6  ;;  %v9736_v5 = vld [vmem:[#allocation5 + $0xab0] ss:$8 sps:$4 sm:$0xff]   ;;  %v9753_v12 = vld [vmem:[#allocation5 + $0xb94] ss:$8 sps:$4 sm:$0xff]  }
 0x198   :  { %v3421_v16 = vpop.f32.mrf.mxu1  ;;  %3715 = vmatprep.subr.bf16.mxu1 %v9675_v7  ;;  %v10257_v19 = vadd.f32 %v3419_v13, %v3379_v14  ;;  %v3381_v20 = vadd.f32 %v3380_v15, %v10254_v63  ;;  %3704 = vmatprep.mubr.bf16.mxu0 %v167_v10  ;;  %v9685_v63 = vld [vmem:[#allocation5 + $0xb40] ss:$8 sps:$4 sm:$0xff]   ;;  %v9739_v6 = vld [vmem:[#allocation5 + $0xbb0] ss:$8 sps:$4 sm:$0xff]   ;;  %v9744_v7 = vld [vmem:[#allocation5 + $0xaa4] ss:$8 sps:$4 sm:$0xff]  }
 0x199   :  { %3745 = vmatprep.mubr.bf16.mxu1 %v169_v11  ;;  %v3382_v23 = vpop.f32.mrf.mxu0  ;;  %v9745_v10 = vld [vmem:[#allocation5 + $0xba0] ss:$8 sps:$4 sm:$0xff]   ;;  %v9750_v11 = vld [vmem:[#allocation5 + $0xa94] ss:$8 sps:$4 sm:$0xff]   ;;  %v9748_v13 = vld [vmem:[#allocation5 + $0xa90] ss:$8 sps:$4 sm:$0xff]  }
 0x19a   :  { %v3423_v24 = vpop.f32.mrf.mxu1  ;;  %v10260_v26 = vadd.f32 %v3421_v16, %v3381_v20  ;;  %3675 = vmatpush1.bf16.msra.mxu0 %v9670_v8  ;;  %v9747_v8 = vld [vmem:[#allocation5 + $0xba4] ss:$8 sps:$4 sm:$0xff]   ;;  %v9751_v14 = vld [vmem:[#allocation5 + $0xb90] ss:$8 sps:$4 sm:$0xff]   ;;  %v9765_v23 = vld [vmem:[#allocation5 + $0xd74] ss:$8 sps:$4 sm:$0xff]  }
 0x19b   :  { %3716 = vmatpush1.bf16.msra.mxu1 %v9673_v9  ;;  %v3383_v58 = vpop.f32.mrf.mxu0  ;;  %3676 = vmatprep.subr.bf16.mxu0 %v9678_v17  ;;  %v9742_v9 = vld [vmem:[#allocation5 + $0xaa0] ss:$8 sps:$4 sm:$0xff]   ;;  %v9756_v15 = vld [vmem:[#allocation5 + $0xa84] ss:$8 sps:$4 sm:$0xff]  }
 0x19c   :  { %v3424_v27 = vpop.f32.mrf.mxu1  ;;  %3717 = vmatprep.subr.bf16.mxu1 %v9681_v18  ;;  %v9759_v16 = vld [vmem:[#allocation5 + $0xb84] ss:$8 sps:$4 sm:$0xff]   ;;  %v9754_v17 = vld [vmem:[#allocation5 + $0xa80] ss:$8 sps:$4 sm:$0xff]  }
 0x19d   :  { %v9757_v18 = vld [vmem:[#allocation5 + $0xb80] ss:$8 sps:$4 sm:$0xff]  }
 0x19e   :  { %3677 = vmatpush1.bf16.msra.mxu0 %v9676_v21  ;;  %v134_v20 = vld [vmem:[#allocation2 + $0xa0] sm:$0xff]  ;;  %v136_v21 = vld [vmem:[#allocation2 + $0xb0] sm:$0xff]  ;;  %v139_v27 = vld [vmem:[#allocation2 + $0xc8] sm:$0xff] }
 0x19f   :  { %3718 = vmatpush1.bf16.msra.mxu1 %v9679_v22  ;;  %3678 = vmatprep.subr.bf16.mxu0 %v9684_v28  ;;  %v9762_v22 = vld [vmem:[#allocation5 + $0xc74] ss:$8 sps:$4 sm:$0xff]   ;;  %v166_v24 = vpack.c.bf16 %v134_v20, %v134_v20  ;;  %v168_v58 = vpack.c.bf16 %v136_v21, %v136_v21  ;;  %v9820_v21 = vld [vmem:[#allocation5 + $0xcd0] ss:$8 sps:$4 sm:$0xff]  }
 0x1a0   :  { %3719 = vmatprep.subr.bf16.mxu1 %v9687_v29  ;;  %v141_v28 = vld [vmem:[#allocation2 + $0xd8] sm:$0xff] }
 0x1a1   :  { %v9760_v29 = vld [vmem:[#allocation5 + $0xc70] ss:$8 sps:$4 sm:$0xff]   ;;  %v9825_v20 = vld [vmem:[#allocation5 + $0xdd4] ss:$8 sps:$4 sm:$0xff]  }
 0x1a2   :  { %3679 = vmatpush1.bf16.msra.mxu0 %v9682_v30  ;;  %v9763_v30 = vld [vmem:[#allocation5 + $0xd70] ss:$8 sps:$4 sm:$0xff]  }
 0x1a3   :  { %3720 = vmatpush1.bf16.msra.mxu1 %v9685_v63  ;;  %3680 = vmatprep.subr.bf16.mxu0 %v9690_v31  ;;  %v9768_v63 = vld [vmem:[#allocation5 + $0xc64] ss:$8 sps:$4 sm:$0xff]  }
 0x1a4   :  { %3721 = vmatprep.subr.bf16.mxu1 %v9693_v33  ;;  %v9771_v31 = vld [vmem:[#allocation5 + $0xd64] ss:$8 sps:$4 sm:$0xff]   ;;  %v171_v33 = vpack.c.bf16 %v139_v27, %v139_v27  ;;  %v9829_v27 = vld [vmem:[#allocation5 + $0xdc0] ss:$8 sps:$4 sm:$0xff]  }
 0x1a6   :  { %3681 = vmatpush1.bf16.msra.mxu0 %v9688_v34  ;;  %v173_v34 = vpack.c.bf16 %v141_v28, %v141_v28  ;;  %v9834_v28 = vld [vmem:[#allocation5 + $0xcb4] ss:$8 sps:$4 sm:$0xff]  }
 0x1a7   :  { %3722 = vmatpush1.bf16.msra.mxu1 %v9691_v35  ;;  %3682 = vmatprep.subr.bf16.mxu0 %v9696_v36 }
 0x1a8   :  { %3723 = vmatprep.subr.bf16.mxu1 %v9699_v38 }
 0x1aa   :  { %3683 = vmatpush1.bf16.msra.mxu0 %v9694_v39  ;;  %v9766_v39 = vld [vmem:[#allocation5 + $0xc60] ss:$8 sps:$4 sm:$0xff]  }
 0x1ab   :  { %3724 = vmatpush1.bf16.msra.mxu1 %v9697_v40  ;;  %3684 = vmatprep.subr.bf16.mxu0 %v9702_v41  ;;  %v9769_v40 = vld [vmem:[#allocation5 + $0xd60] ss:$8 sps:$4 sm:$0xff]  }
 0x1ac   :  { %3725 = vmatprep.subr.bf16.mxu1 %v9705_v42 }
 0x1ae   :  { %3685 = vmatpush1.bf16.msra.mxu0 %v9700_v43  ;;  %v9774_v43 = vld [vmem:[#allocation5 + $0xc54] ss:$8 sps:$4 sm:$0xff]  }
 0x1af   :  { %3726 = vmatpush1.bf16.msra.mxu1 %v9703_v44  ;;  %3686 = vmatprep.subr.bf16.mxu0 %v9708_v45  ;;  %v9777_v44 = vld [vmem:[#allocation5 + $0xd54] ss:$8 sps:$4 sm:$0xff]  }
 0x1b0   :  { %3727 = vmatprep.subr.bf16.mxu1 %v9711_v46 }
 0x1b2   :  { %3687 = vmatpush1.bf16.msra.mxu0 %v9706_v47 }
 0x1b3   :  { %3728 = vmatpush1.bf16.msra.mxu1 %v9709_v48  ;;  %3688 = vmatprep.subr.bf16.mxu0 %v9714_v49 }
 0x1b4   :  { %3729 = vmatprep.subr.bf16.mxu1 %v9717_v50  ;;  %v9775_v50 = vld [vmem:[#allocation5 + $0xd50] ss:$8 sps:$4 sm:$0xff]  }
 0x1b6   :  { %3689 = vmatpush2.bf16.msra.mxu0 %v9712_v51 }
 0x1b7   :  { %3730 = vmatpush2.bf16.msra.mxu1 %v9715_v52  ;;  %3690 = vmatprep.subr.bf16.mxu0 %v9720_v53  ;;  %v9780_v53 = vld [vmem:[#allocation5 + $0xc44] ss:$8 sps:$4 sm:$0xff]  }
 0x1b8   :  { %3731 = vmatprep.subr.bf16.mxu1 %v9723_v54  ;;  %v9783_v54 = vld [vmem:[#allocation5 + $0xd44] ss:$8 sps:$4 sm:$0xff]  }
 0x1ba   :  { %3691 = vmatpush2.bf16.msra.mxu0 %v9718_v55  ;;  %v9778_v55 = vld [vmem:[#allocation5 + $0xc40] ss:$8 sps:$4 sm:$0xff]  }
 0x1bb   :  { %3732 = vmatpush2.bf16.msra.mxu1 %v9721_v56  ;;  %3692 = vmatprep.subr.bf16.mxu0 %v9726_v57  ;;  %v9786_v56 = vld [vmem:[#allocation5 + $0xc34] ss:$8 sps:$4 sm:$0xff]  }
 0x1bc   :  { %3733 = vmatprep.subr.bf16.mxu1 %v9729_v59  ;;  %v9789_v57 = vld [vmem:[#allocation5 + $0xd34] ss:$8 sps:$4 sm:$0xff]   ;;  %v9784_v59 = vld [vmem:[#allocation5 + $0xc30] ss:$8 sps:$4 sm:$0xff]  }
 0x1be   :  { %3693 = vmatpush2.bf16.msra.mxu0 %v9724_v60  ;;  %v9787_v60 = vld [vmem:[#allocation5 + $0xd30] ss:$8 sps:$4 sm:$0xff]  }
 0x1bf   :  { %3734 = vmatpush2.bf16.msra.mxu1 %v9727_v61  ;;  %3694 = vmatprep.subr.bf16.mxu0 %v9732_v62  ;;  %v9792_v61 = vld [vmem:[#allocation5 + $0xc24] ss:$8 sps:$4 sm:$0xff]  }
 0x1c0   :  { %3735 = vmatprep.subr.bf16.mxu1 %v9735_v0  ;;  %v9795_v62 = vld [vmem:[#allocation5 + $0xd24] ss:$8 sps:$4 sm:$0xff]   ;;  %v9790_v0 = vld [vmem:[#allocation5 + $0xc20] ss:$8 sps:$4 sm:$0xff]  }
 0x1c2   :  { %3695 = vmatpush2.bf16.msra.mxu0 %v9730_v1  ;;  %v9793_v1 = vld [vmem:[#allocation5 + $0xd20] ss:$8 sps:$4 sm:$0xff]  }
 0x1c3   :  { %3736 = vmatpush2.bf16.msra.mxu1 %v9733_v2  ;;  %3696 = vmatprep.subr.bf16.mxu0 %v9738_v3  ;;  %v9798_v2 = vld [vmem:[#allocation5 + $0xc14] ss:$8 sps:$4 sm:$0xff]  }
 0x1c4   :  { %3737 = vmatprep.subr.bf16.mxu1 %v9741_v4  ;;  %v9801_v3 = vld [vmem:[#allocation5 + $0xd14] ss:$8 sps:$4 sm:$0xff]   ;;  %v9796_v4 = vld [vmem:[#allocation5 + $0xc10] ss:$8 sps:$4 sm:$0xff]  }
 0x1c6   :  { %3697 = vmatpush2.bf16.msra.mxu0 %v9736_v5  ;;  %v9799_v5 = vld [vmem:[#allocation5 + $0xd10] ss:$8 sps:$4 sm:$0xff]  }
 0x1c7   :  { %3738 = vmatpush2.bf16.msra.mxu1 %v9739_v6  ;;  %3698 = vmatprep.subr.bf16.mxu0 %v9744_v7  ;;  %v9804_v6 = vld [vmem:[#allocation5 + $0xc04] ss:$8 sps:$4 sm:$0xff]  }
 0x1c8   :  { %3739 = vmatprep.subr.bf16.mxu1 %v9747_v8  ;;  %v9807_v7 = vld [vmem:[#allocation5 + $0xd04] ss:$8 sps:$4 sm:$0xff]   ;;  %v9802_v8 = vld [vmem:[#allocation5 + $0xc00] ss:$8 sps:$4 sm:$0xff]  }
 0x1ca   :  { %3699 = vmatpush2.bf16.msra.mxu0 %v9742_v9  ;;  %v9805_v9 = vld [vmem:[#allocation5 + $0xd00] ss:$8 sps:$4 sm:$0xff]  }
 0x1cb   :  { %3740 = vmatpush2.bf16.msra.mxu1 %v9745_v10  ;;  %3700 = vmatprep.subr.bf16.mxu0 %v9750_v11  ;;  %v9810_v10 = vld [vmem:[#allocation5 + $0xcf4] ss:$8 sps:$4 sm:$0xff]  }
 0x1cc   :  { %3741 = vmatprep.subr.bf16.mxu1 %v9753_v12  ;;  %v9813_v11 = vld [vmem:[#allocation5 + $0xdf4] ss:$8 sps:$4 sm:$0xff]   ;;  %v9808_v12 = vld [vmem:[#allocation5 + $0xcf0] ss:$8 sps:$4 sm:$0xff]  }
 0x1ce   :  { %3701 = vmatpush2.bf16.msra.mxu0 %v9748_v13  ;;  %v9811_v13 = vld [vmem:[#allocation5 + $0xdf0] ss:$8 sps:$4 sm:$0xff]  }
 0x1cf   :  { %3742 = vmatpush2.bf16.msra.mxu1 %v9751_v14  ;;  %3702 = vmatprep.subr.bf16.mxu0 %v9756_v15  ;;  %v9816_v14 = vld [vmem:[#allocation5 + $0xce4] ss:$8 sps:$4 sm:$0xff]  }
 0x1d0   :  { %3743 = vmatprep.subr.bf16.mxu1 %v9759_v16  ;;  %v9819_v15 = vld [vmem:[#allocation5 + $0xde4] ss:$8 sps:$4 sm:$0xff]   ;;  %v9814_v16 = vld [vmem:[#allocation5 + $0xce0] ss:$8 sps:$4 sm:$0xff]  }
 0x1d2   :  { %3703 = vmatpush2.bf16.msra.mxu0 %v9754_v17  ;;  %v9817_v17 = vld [vmem:[#allocation5 + $0xde0] ss:$8 sps:$4 sm:$0xff]  }
 0x1d3   :  { %3744 = vmatpush2.bf16.msra.mxu1 %v9757_v18  ;;  %3754 = vmatprep.subr.bf16.mxu0 %v9762_v22  ;;  %v9822_v18 = vld [vmem:[#allocation5 + $0xcd4] ss:$8 sps:$4 sm:$0xff]   ;;  %v9823_v22 = vld [vmem:[#allocation5 + $0xdd0] ss:$8 sps:$4 sm:$0xff]  }
 0x1d4   :  { %3795 = vmatprep.subr.bf16.mxu1 %v9765_v23  ;;  %v9828_v23 = vld [vmem:[#allocation5 + $0xcc4] ss:$8 sps:$4 sm:$0xff]  }
 0x1d5   :  { %v3460_v35 = vpop.f32.mrf.mxu0  ;;  %3705 = vmatmul.mubr.bf16.vlgmr.msra.gmra.mxu0 %v166_v24  ;;  %v9831_v24 = vld [vmem:[#allocation5 + $0xdc4] ss:$8 sps:$4 sm:$0xff]  }
 0x1d6   :  { %v3501_v36 = vpop.f32.mrf.mxu1  ;;  %3746 = vmatmul.mubr.bf16.vlgmr.msra.gmra.mxu1 %v168_v58  ;;  %v3461_v38 = vadd.f32 %v3460_v35, %v10257_v19  ;;  %3755 = vmatpush1.bf16.msra.mxu0 %v9760_v29  ;;  %v9772_v19 = vld [vmem:[#allocation5 + $0xc50] ss:$8 sps:$4 sm:$0xff]   ;;  %v9826_v58 = vld [vmem:[#allocation5 + $0xcc0] ss:$8 sps:$4 sm:$0xff]   ;;  %v9837_v29 = vld [vmem:[#allocation5 + $0xdb4] ss:$8 sps:$4 sm:$0xff]  }
 0x1d7   :  { %3796 = vmatpush1.bf16.msra.mxu1 %v9763_v30  ;;  %v3462_v41 = vpop.f32.mrf.mxu0  ;;  %3756 = vmatprep.subr.bf16.mxu0 %v9768_v63  ;;  %v9832_v30 = vld [vmem:[#allocation5 + $0xcb0] ss:$8 sps:$4 sm:$0xff]   ;;  %v9841_v35 = vld [vmem:[#allocation5 + $0xda0] ss:$8 sps:$4 sm:$0xff]  }
 0x1d8   :  { %v3503_v42 = vpop.f32.mrf.mxu1  ;;  %3797 = vmatprep.subr.bf16.mxu1 %v9771_v31  ;;  %v10263_v45 = vadd.f32 %v3501_v36, %v3461_v38  ;;  %v3463_v46 = vadd.f32 %v3462_v41, %v10260_v26  ;;  %3786 = vmatprep.mubr.bf16.mxu0 %v171_v33  ;;  %v9781_v26 = vld [vmem:[#allocation5 + $0xd40] ss:$8 sps:$4 sm:$0xff]   ;;  %v9835_v63 = vld [vmem:[#allocation5 + $0xdb0] ss:$8 sps:$4 sm:$0xff]   ;;  %v9840_v31 = vld [vmem:[#allocation5 + $0xca4] ss:$8 sps:$4 sm:$0xff]  }
 0x1d9   :  { %3827 = vmatprep.mubr.bf16.mxu1 %v173_v34  ;;  %v3464_v47 = vpop.f32.mrf.mxu0  ;;  %v9843_v33 = vld [vmem:[#allocation5 + $0xda4] ss:$8 sps:$4 sm:$0xff]   ;;  %v9838_v34 = vld [vmem:[#allocation5 + $0xca0] ss:$8 sps:$4 sm:$0xff]   ;;  %v9846_v36 = vld [vmem:[#allocation5 + $0xc94] ss:$8 sps:$4 sm:$0xff]  }
 0x1da   :  { %v3505_v48 = vpop.f32.mrf.mxu1  ;;  %v10266_v49 = vadd.f32 %v3503_v42, %v3463_v46  ;;  %3757 = vmatpush1.bf16.msra.mxu0 %v9766_v39  ;;  %v9849_v38 = vld [vmem:[#allocation5 + $0xd94] ss:$8 sps:$4 sm:$0xff]   ;;  %v9844_v39 = vld [vmem:[#allocation5 + $0xc90] ss:$8 sps:$4 sm:$0xff]   ;;  %v9852_v41 = vld [vmem:[#allocation5 + $0xc84] ss:$8 sps:$4 sm:$0xff]  }
 0x1db   :  { %3798 = vmatpush1.bf16.msra.mxu1 %v9769_v40  ;;  %v3465_v51 = vpop.f32.mrf.mxu0  ;;  %3758 = vmatprep.subr.bf16.mxu0 %v9774_v43  ;;  %v9847_v40 = vld [vmem:[#allocation5 + $0xd90] ss:$8 sps:$4 sm:$0xff]   ;;  %v9855_v42 = vld [vmem:[#allocation5 + $0xd84] ss:$8 sps:$4 sm:$0xff]   ;;  %v9850_v43 = vld [vmem:[#allocation5 + $0xc80] ss:$8 sps:$4 sm:$0xff]  }
 0x1dc   :  { %v3506_v52 = vpop.f32.mrf.mxu1  ;;  %3799 = vmatprep.subr.bf16.mxu1 %v9777_v44  ;;  %v9853_v44 = vld [vmem:[#allocation5 + $0xd80] ss:$8 sps:$4 sm:$0xff]   ;;  %v140_v47 = vld [vmem:[#allocation2 + $0xd0] sm:$0xff] }
 0x1dd   :  { %v138_v46 = vld [vmem:[#allocation2 + $0xc0] sm:$0xff]  ;;  %v9858_v48 = vld [vmem:[#allocation5 + $0xe74] ss:$8 sps:$4 sm:$0xff]   ;;  %v172_v51 = vpack.c.bf16 %v140_v47, %v140_v47  ;;  %v143_v52 = vld [vmem:[#allocation2 + $0xe8] sm:$0xff] }
 0x1de   :  { %3759 = vmatpush1.bf16.msra.mxu0 %v9772_v19  ;;  %v9861_v19 = vld [vmem:[#allocation5 + $0xf74] ss:$8 sps:$4 sm:$0xff]   ;;  %v9916_v47 = vld [vmem:[#allocation5 + $0xed0] ss:$8 sps:$4 sm:$0xff]  }
 0x1df   :  { %3800 = vmatpush1.bf16.msra.mxu1 %v9775_v50  ;;  %3760 = vmatprep.subr.bf16.mxu0 %v9780_v53  ;;  %v170_v50 = vpack.c.bf16 %v138_v46, %v138_v46  ;;  %v145_v53 = vld [vmem:[#allocation2 + $0xf8] sm:$0xff] }
 0x1e0   :  { %3801 = vmatprep.subr.bf16.mxu1 %v9783_v54  ;;  %v9856_v54 = vld [vmem:[#allocation5 + $0xe70] ss:$8 sps:$4 sm:$0xff]   ;;  %v9921_v46 = vld [vmem:[#allocation5 + $0xfd4] ss:$8 sps:$4 sm:$0xff]  }
 0x1e2   :  { %3761 = vmatpush1.bf16.msra.mxu0 %v9778_v55  ;;  %v9859_v55 = vld [vmem:[#allocation5 + $0xf70] ss:$8 sps:$4 sm:$0xff]  }
 0x1e3   :  { %3802 = vmatpush1.bf16.msra.mxu1 %v9781_v26  ;;  %3762 = vmatprep.subr.bf16.mxu0 %v9786_v56  ;;  %v9864_v26 = vld [vmem:[#allocation5 + $0xe64] ss:$8 sps:$4 sm:$0xff]  }
 0x1e4   :  { %3803 = vmatprep.subr.bf16.mxu1 %v9789_v57  ;;  %v9867_v56 = vld [vmem:[#allocation5 + $0xf64] ss:$8 sps:$4 sm:$0xff]   ;;  %v175_v57 = vpack.c.bf16 %v143_v52, %v143_v52  ;;  %v9925_v52 = vld [vmem:[#allocation5 + $0xfc0] ss:$8 sps:$4 sm:$0xff]  }
 0x1e6   :  { %3763 = vmatpush1.bf16.msra.mxu0 %v9784_v59  ;;  %v177_v59 = vpack.c.bf16 %v145_v53, %v145_v53  ;;  %v9930_v53 = vld [vmem:[#allocation5 + $0xeb4] ss:$8 sps:$4 sm:$0xff]  }
 0x1e7   :  { %3804 = vmatpush1.bf16.msra.mxu1 %v9787_v60  ;;  %3764 = vmatprep.subr.bf16.mxu0 %v9792_v61 }
 0x1e8   :  { %3805 = vmatprep.subr.bf16.mxu1 %v9795_v62 }
 0x1ea   :  { %3765 = vmatpush1.bf16.msra.mxu0 %v9790_v0  ;;  %v9862_v0 = vld [vmem:[#allocation5 + $0xe60] ss:$8 sps:$4 sm:$0xff]  }
 0x1eb   :  { %3806 = vmatpush1.bf16.msra.mxu1 %v9793_v1  ;;  %3766 = vmatprep.subr.bf16.mxu0 %v9798_v2  ;;  %v9865_v1 = vld [vmem:[#allocation5 + $0xf60] ss:$8 sps:$4 sm:$0xff]  }
 0x1ec   :  { %3807 = vmatprep.subr.bf16.mxu1 %v9801_v3 }
 0x1ee   :  { %3767 = vmatpush1.bf16.msra.mxu0 %v9796_v4  ;;  %v9870_v4 = vld [vmem:[#allocation5 + $0xe54] ss:$8 sps:$4 sm:$0xff]  }
 0x1ef   :  { %3808 = vmatpush1.bf16.msra.mxu1 %v9799_v5  ;;  %3768 = vmatprep.subr.bf16.mxu0 %v9804_v6  ;;  %v9873_v5 = vld [vmem:[#allocation5 + $0xf54] ss:$8 sps:$4 sm:$0xff]  }
 0x1f0   :  { %3809 = vmatprep.subr.bf16.mxu1 %v9807_v7 }
 0x1f2   :  { %3769 = vmatpush1.bf16.msra.mxu0 %v9802_v8 }
 0x1f3   :  { %3810 = vmatpush1.bf16.msra.mxu1 %v9805_v9  ;;  %3770 = vmatprep.subr.bf16.mxu0 %v9810_v10 }
 0x1f4   :  { %3811 = vmatprep.subr.bf16.mxu1 %v9813_v11  ;;  %v9871_v11 = vld [vmem:[#allocation5 + $0xf50] ss:$8 sps:$4 sm:$0xff]  }
 0x1f6   :  { %3771 = vmatpush2.bf16.msra.mxu0 %v9808_v12 }
 0x1f7   :  { %3812 = vmatpush2.bf16.msra.mxu1 %v9811_v13  ;;  %3772 = vmatprep.subr.bf16.mxu0 %v9816_v14  ;;  %v9876_v14 = vld [vmem:[#allocation5 + $0xe44] ss:$8 sps:$4 sm:$0xff]  }
 0x1f8   :  { %3813 = vmatprep.subr.bf16.mxu1 %v9819_v15  ;;  %v9879_v15 = vld [vmem:[#allocation5 + $0xf44] ss:$8 sps:$4 sm:$0xff]  }
 0x1fa   :  { %3773 = vmatpush2.bf16.msra.mxu0 %v9814_v16  ;;  %v9874_v16 = vld [vmem:[#allocation5 + $0xe40] ss:$8 sps:$4 sm:$0xff]  }
 0x1fb   :  { %3814 = vmatpush2.bf16.msra.mxu1 %v9817_v17  ;;  %3774 = vmatprep.subr.bf16.mxu0 %v9822_v18  ;;  %v9882_v17 = vld [vmem:[#allocation5 + $0xe34] ss:$8 sps:$4 sm:$0xff]  }
 0x1fc   :  { %3815 = vmatprep.subr.bf16.mxu1 %v9825_v20  ;;  %v9885_v18 = vld [vmem:[#allocation5 + $0xf34] ss:$8 sps:$4 sm:$0xff]   ;;  %v9880_v20 = vld [vmem:[#allocation5 + $0xe30] ss:$8 sps:$4 sm:$0xff]  }
 0x1fe   :  { %3775 = vmatpush2.bf16.msra.mxu0 %v9820_v21  ;;  %v9883_v21 = vld [vmem:[#allocation5 + $0xf30] ss:$8 sps:$4 sm:$0xff]  }
 0x1ff   :  { %3816 = vmatpush2.bf16.msra.mxu1 %v9823_v22  ;;  %3776 = vmatprep.subr.bf16.mxu0 %v9828_v23  ;;  %v9888_v22 = vld [vmem:[#allocation5 + $0xe24] ss:$8 sps:$4 sm:$0xff]  }
 0x200   :  { %3817 = vmatprep.subr.bf16.mxu1 %v9831_v24  ;;  %v9891_v23 = vld [vmem:[#allocation5 + $0xf24] ss:$8 sps:$4 sm:$0xff]   ;;  %v9886_v24 = vld [vmem:[#allocation5 + $0xe20] ss:$8 sps:$4 sm:$0xff]  }
 0x202   :  { %3777 = vmatpush2.bf16.msra.mxu0 %v9826_v58  ;;  %v9889_v58 = vld [vmem:[#allocation5 + $0xf20] ss:$8 sps:$4 sm:$0xff]  }
 0x203   :  { %3818 = vmatpush2.bf16.msra.mxu1 %v9829_v27  ;;  %3778 = vmatprep.subr.bf16.mxu0 %v9834_v28  ;;  %v9894_v27 = vld [vmem:[#allocation5 + $0xe14] ss:$8 sps:$4 sm:$0xff]  }
 0x204   :  { %3819 = vmatprep.subr.bf16.mxu1 %v9837_v29  ;;  %v9897_v28 = vld [vmem:[#allocation5 + $0xf14] ss:$8 sps:$4 sm:$0xff]   ;;  %v9892_v29 = vld [vmem:[#allocation5 + $0xe10] ss:$8 sps:$4 sm:$0xff]  }
 0x206   :  { %3779 = vmatpush2.bf16.msra.mxu0 %v9832_v30  ;;  %v9895_v30 = vld [vmem:[#allocation5 + $0xf10] ss:$8 sps:$4 sm:$0xff]  }
 0x207   :  { %3820 = vmatpush2.bf16.msra.mxu1 %v9835_v63  ;;  %3780 = vmatprep.subr.bf16.mxu0 %v9840_v31  ;;  %v9900_v63 = vld [vmem:[#allocation5 + $0xe04] ss:$8 sps:$4 sm:$0xff]  }
 0x208   :  { %3821 = vmatprep.subr.bf16.mxu1 %v9843_v33  ;;  %v9903_v31 = vld [vmem:[#allocation5 + $0xf04] ss:$8 sps:$4 sm:$0xff]   ;;  %v9898_v33 = vld [vmem:[#allocation5 + $0xe00] ss:$8 sps:$4 sm:$0xff]  }
 0x20a   :  { %3781 = vmatpush2.bf16.msra.mxu0 %v9838_v34  ;;  %v9901_v34 = vld [vmem:[#allocation5 + $0xf00] ss:$8 sps:$4 sm:$0xff]  }
 0x20b   :  { %3822 = vmatpush2.bf16.msra.mxu1 %v9841_v35  ;;  %3782 = vmatprep.subr.bf16.mxu0 %v9846_v36  ;;  %v9906_v35 = vld [vmem:[#allocation5 + $0xef4] ss:$8 sps:$4 sm:$0xff]  }
 0x20c   :  { %3823 = vmatprep.subr.bf16.mxu1 %v9849_v38  ;;  %v9909_v36 = vld [vmem:[#allocation5 + $0xff4] ss:$8 sps:$4 sm:$0xff]   ;;  %v9904_v38 = vld [vmem:[#allocation5 + $0xef0] ss:$8 sps:$4 sm:$0xff]  }
 0x20e   :  { %3783 = vmatpush2.bf16.msra.mxu0 %v9844_v39  ;;  %v9907_v39 = vld [vmem:[#allocation5 + $0xff0] ss:$8 sps:$4 sm:$0xff]  }
 0x20f   :  { %3824 = vmatpush2.bf16.msra.mxu1 %v9847_v40  ;;  %3784 = vmatprep.subr.bf16.mxu0 %v9852_v41  ;;  %v9912_v40 = vld [vmem:[#allocation5 + $0xee4] ss:$8 sps:$4 sm:$0xff]  }
 0x210   :  { %3825 = vmatprep.subr.bf16.mxu1 %v9855_v42  ;;  %v9915_v41 = vld [vmem:[#allocation5 + $0xfe4] ss:$8 sps:$4 sm:$0xff]   ;;  %v9910_v42 = vld [vmem:[#allocation5 + $0xee0] ss:$8 sps:$4 sm:$0xff]  }
 0x212   :  { %3785 = vmatpush2.bf16.msra.mxu0 %v9850_v43  ;;  %v9913_v43 = vld [vmem:[#allocation5 + $0xfe0] ss:$8 sps:$4 sm:$0xff]  }
 0x213   :  { %3826 = vmatpush2.bf16.msra.mxu1 %v9853_v44  ;;  %3836 = vmatprep.subr.bf16.mxu0 %v9858_v48  ;;  %v9918_v44 = vld [vmem:[#allocation5 + $0xed4] ss:$8 sps:$4 sm:$0xff]   ;;  %v9919_v48 = vld [vmem:[#allocation5 + $0xfd0] ss:$8 sps:$4 sm:$0xff]  }
 0x214   :  { %3877 = vmatprep.subr.bf16.mxu1 %v9861_v19  ;;  %v9924_v19 = vld [vmem:[#allocation5 + $0xec4] ss:$8 sps:$4 sm:$0xff]  }
 0x215   :  { %v3542_v60 = vpop.f32.mrf.mxu0  ;;  %3787 = vmatmul.mubr.bf16.vlgmr.msra.gmra.mxu0 %v170_v50  ;;  %v9927_v50 = vld [vmem:[#allocation5 + $0xfc4] ss:$8 sps:$4 sm:$0xff]  }
 0x216   :  { %v3583_v61 = vpop.f32.mrf.mxu1  ;;  %3828 = vmatmul.mubr.bf16.vlgmr.msra.gmra.mxu1 %v172_v51  ;;  %v3543_v62 = vadd.f32 %v3542_v60, %v10263_v45  ;;  %3837 = vmatpush1.bf16.msra.mxu0 %v9856_v54  ;;  %v9868_v45 = vld [vmem:[#allocation5 + $0xe50] ss:$8 sps:$4 sm:$0xff]   ;;  %v9922_v51 = vld [vmem:[#allocation5 + $0xec0] ss:$8 sps:$4 sm:$0xff]   ;;  %v9933_v54 = vld [vmem:[#allocation5 + $0xfb4] ss:$8 sps:$4 sm:$0xff]  }
 0x217   :  { %3878 = vmatpush1.bf16.msra.mxu1 %v9859_v55  ;;  %v3544_v2 = vpop.f32.mrf.mxu0  ;;  %3838 = vmatprep.subr.bf16.mxu0 %v9864_v26  ;;  %v9928_v55 = vld [vmem:[#allocation5 + $0xeb0] ss:$8 sps:$4 sm:$0xff]   ;;  %v9937_v60 = vld [vmem:[#allocation5 + $0xfa0] ss:$8 sps:$4 sm:$0xff]  }
 0x218   :  { %v3585_v3 = vpop.f32.mrf.mxu1  ;;  %3879 = vmatprep.subr.bf16.mxu1 %v9867_v56  ;;  %v10269_v6 = vadd.f32 %v3583_v61, %v3543_v62  ;;  %v3545_v7 = vadd.f32 %v3544_v2, %v10266_v49  ;;  %3868 = vmatprep.mubr.bf16.mxu0 %v175_v57  ;;  %v9877_v49 = vld [vmem:[#allocation5 + $0xf40] ss:$8 sps:$4 sm:$0xff]   ;;  %v9931_v26 = vld [vmem:[#allocation5 + $0xfb0] ss:$8 sps:$4 sm:$0xff]   ;;  %v9936_v56 = vld [vmem:[#allocation5 + $0xea4] ss:$8 sps:$4 sm:$0xff]  }
 0x219   :  { %3909 = vmatprep.mubr.bf16.mxu1 %v177_v59  ;;  %v3546_v8 = vpop.f32.mrf.mxu0  ;;  %v9939_v57 = vld [vmem:[#allocation5 + $0xfa4] ss:$8 sps:$4 sm:$0xff]   ;;  %v9934_v59 = vld [vmem:[#allocation5 + $0xea0] ss:$8 sps:$4 sm:$0xff]   ;;  %v9942_v61 = vld [vmem:[#allocation5 + $0xe94] ss:$8 sps:$4 sm:$0xff]  }
 0x21a   :  { %v3587_v9 = vpop.f32.mrf.mxu1  ;;  %v10272_v10 = vadd.f32 %v3585_v3, %v3545_v7  ;;  %3839 = vmatpush1.bf16.msra.mxu0 %v9862_v0  ;;  %v9945_v62 = vld [vmem:[#allocation5 + $0xf94] ss:$8 sps:$4 sm:$0xff]   ;;  %v9940_v0 = vld [vmem:[#allocation5 + $0xe90] ss:$8 sps:$4 sm:$0xff]   ;;  %v9948_v2 = vld [vmem:[#allocation5 + $0xe84] ss:$8 sps:$4 sm:$0xff]  }
 0x21b   :  { %3880 = vmatpush1.bf16.msra.mxu1 %v9865_v1  ;;  %v3547_v12 = vpop.f32.mrf.mxu0  ;;  %3840 = vmatprep.subr.bf16.mxu0 %v9870_v4  ;;  %v9943_v1 = vld [vmem:[#allocation5 + $0xf90] ss:$8 sps:$4 sm:$0xff]   ;;  %v9951_v3 = vld [vmem:[#allocation5 + $0xf84] ss:$8 sps:$4 sm:$0xff]   ;;  %v9946_v4 = vld [vmem:[#allocation5 + $0xe80] ss:$8 sps:$4 sm:$0xff]  }
 0x21c   :  { %v3588_v13 = vpop.f32.mrf.mxu1  ;;  %3881 = vmatprep.subr.bf16.mxu1 %v9873_v5  ;;  %v9949_v5 = vld [vmem:[#allocation5 + $0xf80] ss:$8 sps:$4 sm:$0xff]   ;;  %v144_v8 = vld [vmem:[#allocation2 + $0xf0] sm:$0xff] }
 0x21d   :  { %v142_v7 = vld [vmem:[#allocation2 + $0xe0] sm:$0xff] }
 0x21e   :  { %3841 = vmatpush1.bf16.msra.mxu0 %v9868_v45  ;;  %v174_v9 = vpack.c.bf16 %v142_v7, %v142_v7  ;;  %v176_v45 = vpack.c.bf16 %v144_v8, %v144_v8  ;;  %v4231_v7 = vld [vmem:[#allocation11 + $0x780] sm:$0xff]  ;;  %v10286_v8 = vld [vmem:[#allocation11 + $0x708] sm:$0xff] }
 0x21f   :  { %3882 = vmatpush1.bf16.msra.mxu1 %v9871_v11  ;;  %3842 = vmatprep.subr.bf16.mxu0 %v9876_v14 }
 0x220   :  { %3883 = vmatprep.subr.bf16.mxu1 %v9879_v15 }
 0x222   :  { %3843 = vmatpush1.bf16.msra.mxu0 %v9874_v16 }
 0x223   :  { %3884 = vmatpush1.bf16.msra.mxu1 %v9877_v49  ;;  %3844 = vmatprep.subr.bf16.mxu0 %v9882_v17 }
 0x224   :  { %3885 = vmatprep.subr.bf16.mxu1 %v9885_v18 }
 0x226   :  { %3845 = vmatpush1.bf16.msra.mxu0 %v9880_v20 }
 0x227   :  { %3886 = vmatpush1.bf16.msra.mxu1 %v9883_v21  ;;  %3846 = vmatprep.subr.bf16.mxu0 %v9888_v22 }
 0x228   :  { %3887 = vmatprep.subr.bf16.mxu1 %v9891_v23  ;;  %v9952_v23 = vld [vmem:[#allocation8 + $0x70] ss:$8 sps:$4 sm:$0xff]  }
 0x22a   :  { %3847 = vmatpush1.bf16.msra.mxu0 %v9886_v24  ;;  %v9954_v24 = vld [vmem:[#allocation8 + $0x74] ss:$8 sps:$4 sm:$0xff]  }
 0x22b   :  { %3888 = vmatpush1.bf16.msra.mxu1 %v9889_v58  ;;  %3848 = vmatprep.subr.bf16.mxu0 %v9894_v27  ;;  %v9957_v58 = vld [vmem:[#allocation8 + $0x64] ss:$8 sps:$4 sm:$0xff]   ;;  %v9955_v27 = vld [vmem:[#allocation8 + $0x60] ss:$8 sps:$4 sm:$0xff]  }
 0x22c   :  { %3889 = vmatprep.subr.bf16.mxu1 %v9897_v28  ;;  %v9958_v28 = vld [vmem:[#allocation8 + $0x50] ss:$8 sps:$4 sm:$0xff]  }
 0x22e   :  { %3849 = vmatpush1.bf16.msra.mxu0 %v9892_v29  ;;  %v9963_v29 = vld [vmem:[#allocation8 + $0x44] ss:$8 sps:$4 sm:$0xff]  }
 0x22f   :  { %3890 = vmatpush1.bf16.msra.mxu1 %v9895_v30  ;;  %3850 = vmatprep.subr.bf16.mxu0 %v9900_v63  ;;  %v9966_v30 = vld [vmem:[#allocation8 + $0x34] ss:$8 sps:$4 sm:$0xff]   ;;  %v9964_v63 = vld [vmem:[#allocation8 + $0x30] ss:$8 sps:$4 sm:$0xff]  }
 0x230   :  { %3891 = vmatprep.subr.bf16.mxu1 %v9903_v31  ;;  %v9969_v31 = vld [vmem:[#allocation8 + $0x24] ss:$8 sps:$4 sm:$0xff]  }
 0x232   :  { %3851 = vmatpush1.bf16.msra.mxu0 %v9898_v33  ;;  %v9967_v33 = vld [vmem:[#allocation8 + $0x20] ss:$8 sps:$4 sm:$0xff]  }
 0x233   :  { %3892 = vmatpush1.bf16.msra.mxu1 %v9901_v34  ;;  %3852 = vmatprep.subr.bf16.mxu0 %v9906_v35  ;;  %v9972_v34 = vld [vmem:[#allocation8 + $0x14] ss:$8 sps:$4 sm:$0xff]   ;;  %v9970_v35 = vld [vmem:[#allocation8 + $0x10] ss:$8 sps:$4 sm:$0xff]  }
 0x234   :  { %3893 = vmatprep.subr.bf16.mxu1 %v9909_v36  ;;  %v9975_v36 = vld [vmem:[#allocation8 + $0x4] ss:$8 sps:$4 sm:$0xff]  }
 0x236   :  { %3853 = vmatpush2.bf16.msra.mxu0 %v9904_v38  ;;  %v9973_v38 = vld [vmem:[#allocation8] ss:$8 sps:$4 sm:$0xff]  }
 0x237   :  { %3894 = vmatpush2.bf16.msra.mxu1 %v9907_v39  ;;  %3854 = vmatprep.subr.bf16.mxu0 %v9912_v40  ;;  %v9978_v39 = vld [vmem:[#allocation8 + $0xf4] ss:$8 sps:$4 sm:$0xff]   ;;  %v9976_v40 = vld [vmem:[#allocation8 + $0xf0] ss:$8 sps:$4 sm:$0xff]  }
 0x238   :  { %3895 = vmatprep.subr.bf16.mxu1 %v9915_v41  ;;  %v9981_v41 = vld [vmem:[#allocation8 + $0xe4] ss:$8 sps:$4 sm:$0xff]  }
 0x23a   :  { %3855 = vmatpush2.bf16.msra.mxu0 %v9910_v42  ;;  %v9979_v42 = vld [vmem:[#allocation8 + $0xe0] ss:$8 sps:$4 sm:$0xff]  }
 0x23b   :  { %3896 = vmatpush2.bf16.msra.mxu1 %v9913_v43  ;;  %3856 = vmatprep.subr.bf16.mxu0 %v9918_v44  ;;  %v9984_v43 = vld [vmem:[#allocation8 + $0xd4] ss:$8 sps:$4 sm:$0xff]   ;;  %v9982_v44 = vld [vmem:[#allocation8 + $0xd0] ss:$8 sps:$4 sm:$0xff]  }
 0x23c   :  { %3897 = vmatprep.subr.bf16.mxu1 %v9921_v46  ;;  %v9987_v46 = vld [vmem:[#allocation8 + $0xc4] ss:$8 sps:$4 sm:$0xff]  }
 0x23e   :  { %3857 = vmatpush2.bf16.msra.mxu0 %v9916_v47  ;;  %v9985_v47 = vld [vmem:[#allocation8 + $0xc0] ss:$8 sps:$4 sm:$0xff]  }
 0x23f   :  { %3898 = vmatpush2.bf16.msra.mxu1 %v9919_v48  ;;  %3858 = vmatprep.subr.bf16.mxu0 %v9924_v19  ;;  %v9990_v48 = vld [vmem:[#allocation8 + $0xb4] ss:$8 sps:$4 sm:$0xff]   ;;  %v9988_v19 = vld [vmem:[#allocation8 + $0xb0] ss:$8 sps:$4 sm:$0xff]  }
 0x240   :  { %3899 = vmatprep.subr.bf16.mxu1 %v9927_v50  ;;  %v9993_v50 = vld [vmem:[#allocation8 + $0xa4] ss:$8 sps:$4 sm:$0xff]  }
 0x242   :  { %3859 = vmatpush2.bf16.msra.mxu0 %v9922_v51  ;;  %v9991_v51 = vld [vmem:[#allocation8 + $0xa0] ss:$8 sps:$4 sm:$0xff]  }
 0x243   :  { %3900 = vmatpush2.bf16.msra.mxu1 %v9925_v52  ;;  %3860 = vmatprep.subr.bf16.mxu0 %v9930_v53 }
 0x244   :  { %3901 = vmatprep.subr.bf16.mxu1 %v9933_v54 }
 0x246   :  { %3861 = vmatpush2.bf16.msra.mxu0 %v9928_v55 }
 0x247   :  { %3902 = vmatpush2.bf16.msra.mxu1 %v9931_v26  ;;  %3862 = vmatprep.subr.bf16.mxu0 %v9936_v56  ;;  %v9996_v56 = vld [vmem:[#allocation8 + $0x94] ss:$8 sps:$4 sm:$0xff]  }
 0x248   :  { %3903 = vmatprep.subr.bf16.mxu1 %v9939_v57 }
 0x24a   :  { %3863 = vmatpush2.bf16.msra.mxu0 %v9934_v59 }
 0x24b   :  { %3904 = vmatpush2.bf16.msra.mxu1 %v9937_v60  ;;  %3864 = vmatprep.subr.bf16.mxu0 %v9942_v61  ;;  %v9994_v60 = vld [vmem:[#allocation8 + $0x90] ss:$8 sps:$4 sm:$0xff]  }
 0x24c   :  { %3905 = vmatprep.subr.bf16.mxu1 %v9945_v62 }
 0x24e   :  { %3865 = vmatpush2.bf16.msra.mxu0 %v9940_v0 }
 0x24f   :  { %3906 = vmatpush2.bf16.msra.mxu1 %v9943_v1  ;;  %3866 = vmatprep.subr.bf16.mxu0 %v9948_v2 }
 0x250   :  { %3907 = vmatprep.subr.bf16.mxu1 %v9951_v3  ;;  %v9999_v3 = vld [vmem:[#allocation8 + $0x84] ss:$8 sps:$4 sm:$0xff]  }
 0x252   :  { %3867 = vmatpush2.bf16.msra.mxu0 %v9946_v4  ;;  %v9997_v4 = vld [vmem:[#allocation8 + $0x80] ss:$8 sps:$4 sm:$0xff]  }
 0x253   :  { %3908 = vmatpush2.bf16.msra.mxu1 %v9949_v5  ;;  %4126 = vmatprep.subr.bf16.mxu0 %v9954_v24  ;;  %v4227_v5 = vld [vmem:[#allocation11 + $0x700] sm:$0xff] }
 0x255   :  { %v3624_v11 = vpop.f32.mrf.mxu0  ;;  %3869 = vmatmul.mubr.bf16.vlgmr.msra.gmra.mxu0 %v174_v9  ;;  %v8717_v9 = vcombine.low %v4227_v5, %v4231_v7 }
 0x256   :  { %v3665_v12 = vpop.f32.mrf.mxu1  ;;  %3910 = vmatmul.mubr.bf16.vlgmr.msra.gmra.mxu1 %v176_v45  ;;  %v3625_v13 = vadd.f32 %v3624_v11, %v10269_v6  ;;  %4127 = vmatpush1.bf16.msra.mxu0 %v9952_v23  ;;  %v9960_v6 = vld [vmem:[#allocation8 + $0x54] ss:$8 sps:$4 sm:$0xff]   ;;  %v8718_v45 = vcombine.high %v4227_v5, %v4231_v7  ;;  %v10288_v11 = vld [vmem:[#allocation11 + $0x788] sm:$0xff]  ;;  %v4207_v23 = vld [vmem:[#allocation11 + $0x480] sm:$0xff] }
 0x257   :  { %v3626_v14 = vpop.f32.mrf.mxu0  ;;  %4128 = vmatprep.subr.bf16.mxu0 %v9957_v58 }
 0x258   :  { %v3667_v15 = vpop.f32.mrf.mxu1  ;;  %v10275_v16 = vadd.f32 %v3665_v12, %v3625_v13  ;;  %v3627_v49 = vadd.f32 %v3626_v14, %v10272_v10  ;;  %v9961_v10 = vld [vmem:[#allocation8 + $0x40] ss:$8 sps:$4 sm:$0xff]   ;;  %v8719_v14 = vcombine.low %v10286_v8, %v10288_v11  ;;  %4981 = vmatprep.subr.bf16.mxu1 %v8718_v45 }
 0x259   :  { %v3628_v17 = vpop.f32.mrf.mxu0  ;;  %v4219_v12 = vld [vmem:[#allocation11 + $0x600] sm:$0xff]  ;;  %4982 = vmatpush1.bf16.msra.mxu1 %v8717_v9 }
 0x25a   :  { %v3669_v18 = vpop.f32.mrf.mxu1  ;;  %v10278_v20 = vadd.f32 %v3667_v15, %v3627_v49  ;;  %4129 = vmatpush1.bf16.msra.mxu0 %v9955_v27  ;;  %v4223_v13 = vld [vmem:[#allocation11 + $0x680] sm:$0xff]  ;;  %v8720_v15 = vcombine.high %v10286_v8, %v10288_v11 }
 0x25b   :  { %v3629_v21 = vpop.f32.mrf.mxu0  ;;  %4130 = vmatprep.subr.bf16.mxu0 %v9960_v6  ;;  %v8709_v49 = vcombine.low %v4219_v12, %v4223_v13  ;;  %v4211_v17 = vld [vmem:[#allocation11 + $0x500] sm:$0xff] }
 0x25c   :  { %v3670_v22 = vpop.f32.mrf.mxu1  ;;  %v4215_v18 = vld [vmem:[#allocation11 + $0x580] sm:$0xff] }
 0x25d   :  { %v8701_v21 = vcombine.low %v4211_v17, %v4215_v18  ;;  %v4203_v22 = vld [vmem:[#allocation11 + $0x400] sm:$0xff] }
 0x25e   :  { %4131 = vmatpush1.bf16.msra.mxu0 %v9958_v28  ;;  %v8694_v24 = vcombine.high %v4203_v22, %v4207_v23  ;;  %v8693_v58 = vcombine.low %v4203_v22, %v4207_v23  ;;  %v4195_v27 = vld [vmem:[#allocation11 + $0x300] sm:$0xff] }
 0x25f   :  { %4132 = vmatprep.subr.bf16.mxu0 %v9963_v29  ;;  %v4199_v6 = vld [vmem:[#allocation11 + $0x380] sm:$0xff] }
 0x260   :  { %v8686_v28 = vcombine.high %v4195_v27, %v4199_v6  ;;  %v8685_v29 = vcombine.low %v4195_v27, %v4199_v6 }
 0x262   :  { %4133 = vmatpush1.bf16.msra.mxu0 %v9961_v10  ;;  %v4187_v10 = vld [vmem:[#allocation11 + $0x200] sm:$0xff] }
 0x263   :  { %4134 = vmatprep.subr.bf16.mxu0 %v9966_v30  ;;  %v4191_v30 = vld [vmem:[#allocation11 + $0x280] sm:$0xff] }
 0x266   :  { %4135 = vmatpush1.bf16.msra.mxu0 %v9964_v63  ;;  %v8678_v63 = vcombine.high %v4187_v10, %v4191_v30 }
 0x267   :  { %4136 = vmatprep.subr.bf16.mxu0 %v9969_v31  ;;  %v8677_v31 = vcombine.low %v4187_v10, %v4191_v30 }
 0x26a   :  { %4137 = vmatpush1.bf16.msra.mxu0 %v9967_v33  ;;  %v4179_v33 = vld [vmem:[#allocation11 + $0x100] sm:$0xff] }
 0x26b   :  { %4138 = vmatprep.subr.bf16.mxu0 %v9972_v34  ;;  %v4183_v34 = vld [vmem:[#allocation11 + $0x180] sm:$0xff] }
 0x26e   :  { %4139 = vmatpush1.bf16.msra.mxu0 %v9970_v35  ;;  %v8670_v35 = vcombine.high %v4179_v33, %v4183_v34 }
 0x26f   :  { %4140 = vmatprep.subr.bf16.mxu0 %v9975_v36  ;;  %v8669_v36 = vcombine.low %v4179_v33, %v4183_v34  ;;  %v4220_v34 = vld [vmem:[#allocation11 + $0x608] sm:$0xff] }
 0x272   :  { %4141 = vmatpush1.bf16.msra.mxu0 %v9973_v38  ;;  %v4171_v38 = vld [vmem:[#allocation11] sm:$0xff] }
 0x273   :  { %4142 = vmatprep.subr.bf16.mxu0 %v9978_v39  ;;  %v4175_v39 = vld [vmem:[#allocation11 + $0x80] sm:$0xff] }
 0x276   :  { %4143 = vmatpush2.bf16.msra.mxu0 %v9976_v40  ;;  %v8662_v40 = vcombine.high %v4171_v38, %v4175_v39 }
 0x277   :  { %4144 = vmatprep.subr.bf16.mxu0 %v9981_v41  ;;  %v8661_v41 = vcombine.low %v4171_v38, %v4175_v39  ;;  %v4212_v39 = vld [vmem:[#allocation11 + $0x508] sm:$0xff] }
 0x27a   :  { %4145 = vmatpush2.bf16.msra.mxu0 %v9979_v42  ;;  %v4291_v42 = vld [vmem:[#allocation11 + $0xf00] sm:$0xff] }
 0x27b   :  { %4146 = vmatprep.subr.bf16.mxu0 %v9984_v43  ;;  %v4295_v43 = vld [vmem:[#allocation11 + $0xf80] sm:$0xff] }
 0x27e   :  { %4147 = vmatpush2.bf16.msra.mxu0 %v9982_v44  ;;  %v8782_v44 = vcombine.high %v4291_v42, %v4295_v43 }
 0x27f   :  { %4148 = vmatprep.subr.bf16.mxu0 %v9987_v46  ;;  %v8781_v46 = vcombine.low %v4291_v42, %v4295_v43  ;;  %v4204_v43 = vld [vmem:[#allocation11 + $0x408] sm:$0xff] }
 0x282   :  { %4149 = vmatpush2.bf16.msra.mxu0 %v9985_v47  ;;  %v4283_v47 = vld [vmem:[#allocation11 + $0xe00] sm:$0xff] }
 0x283   :  { %4150 = vmatprep.subr.bf16.mxu0 %v9990_v48  ;;  %v4287_v48 = vld [vmem:[#allocation11 + $0xe80] sm:$0xff] }
 0x286   :  { %4151 = vmatpush2.bf16.msra.mxu0 %v9988_v19  ;;  %v8774_v19 = vcombine.high %v4283_v47, %v4287_v48 }
 0x287   :  { %4152 = vmatprep.subr.bf16.mxu0 %v9993_v50  ;;  %v8773_v50 = vcombine.low %v4283_v47, %v4287_v48  ;;  %v4196_v48 = vld [vmem:[#allocation11 + $0x308] sm:$0xff] }
 0x28a   :  { %4153 = vmatpush2.bf16.msra.mxu0 %v9991_v51  ;;  %v4275_v51 = vld [vmem:[#allocation11 + $0xd00] sm:$0xff] }
 0x28b   :  { %4154 = vmatprep.subr.bf16.mxu0 %v9996_v56 }
 0x28e   :  { %4155 = vmatpush2.bf16.msra.mxu0 %v9994_v60  ;;  %v4259_v60 = vld [vmem:[#allocation11 + $0xb00] sm:$0xff] }
 0x28f   :  { %4156 = vmatprep.subr.bf16.mxu0 %v9999_v3  ;;  %v4255_v3 = vld [vmem:[#allocation11 + $0xa80] sm:$0xff] }
 0x292   :  { %4157 = vmatpush2.bf16.msra.mxu0 %v9997_v4 }
 0x293   :  { %5022 = vmatprep.subr.bf16.mxu0 %v8720_v15 }
 0x295   :  { %v3706_v52 = vpop.f32.mrf.mxu0 }
 0x296   :  { %v3747_v53 = vpop.f32.mrf.mxu1  ;;  %v3707_v54 = vadd.f32 %v3706_v52, %v10275_v16  ;;  %v8710_v16 = vcombine.high %v4219_v12, %v4223_v13  ;;  %v4279_v52 = vld [vmem:[#allocation11 + $0xd80] sm:$0xff] }
 0x297   :  { %v3708_v55 = vpop.f32.mrf.mxu0 }
 0x298   :  { %v3749_v26 = vpop.f32.mrf.mxu1  ;;  %v10281_v57 = vadd.f32 %v3747_v53, %v3707_v54  ;;  %v3709_v59 = vadd.f32 %v3708_v55, %v10278_v20  ;;  %4983 = vmatprep.subr.bf16.mxu1 %v8710_v16  ;;  %v8702_v20 = vcombine.high %v4211_v17, %v4215_v18  ;;  %v8766_v53 = vcombine.high %v4275_v51, %v4279_v52  ;;  %v4267_v55 = vld [vmem:[#allocation11 + $0xc00] sm:$0xff] }
 0x299   :  { %v3710_v61 = vpop.f32.mrf.mxu0  ;;  %4984 = vmatpush1.bf16.msra.mxu1 %v8709_v49  ;;  %v8765_v54 = vcombine.low %v4275_v51, %v4279_v52  ;;  %v4188_v52 = vld [vmem:[#allocation11 + $0x208] sm:$0xff] }
 0x29a   :  { %v3751_v62 = vpop.f32.mrf.mxu1  ;;  %v10284_v0 = vadd.f32 %v3749_v26, %v3709_v59  ;;  %4985 = vmatprep.subr.bf16.mxu1 %v8702_v20  ;;  %v4271_v26 = vld [vmem:[#allocation11 + $0xc80] sm:$0xff] }
 0x29b   :  { %v3711_v1 = vpop.f32.mrf.mxu0  ;;  %v8758_v56 = vcombine.high %v4267_v55, %v4271_v26  ;;  %v8757_v59 = vcombine.low %v4267_v55, %v4271_v26  ;;  %v4263_v61 = vld [vmem:[#allocation11 + $0xb80] sm:$0xff] }
 0x29c   :  { %v3752_v2 = vpop.f32.mrf.mxu1  ;;  %v8750_v62 = vcombine.high %v4259_v60, %v4263_v61  ;;  %v8749_v1 = vcombine.low %v4259_v60, %v4263_v61 }
 0x29d   :  { %4986 = vmatpush1.bf16.msra.mxu1 %v8701_v21  ;;  %v4251_v2 = vld [vmem:[#allocation11 + $0xa00] sm:$0xff] }
 0x29e   :  { %4987 = vmatprep.subr.bf16.mxu1 %v8694_v24  ;;  %v8742_v4 = vcombine.high %v4251_v2, %v4255_v3  ;;  %v8741_v9 = vcombine.low %v4251_v2, %v4255_v3 }
 0x2a1   :  { %4988 = vmatpush1.bf16.msra.mxu1 %v8693_v58 }
 0x2a2   :  { %4989 = vmatprep.subr.bf16.mxu1 %v8686_v28 }
 0x2a5   :  { %4990 = vmatpush1.bf16.msra.mxu1 %v8685_v29 }
 0x2a6   :  { %4991 = vmatprep.subr.bf16.mxu1 %v8678_v63 }
 0x2a9   :  { %4992 = vmatpush1.bf16.msra.mxu1 %v8677_v31 }
 0x2aa   :  { %4993 = vmatprep.subr.bf16.mxu1 %v8670_v35  ;;  %v4224_v35 = vld [vmem:[#allocation11 + $0x688] sm:$0xff] }
 0x2ad   :  { %4994 = vmatpush1.bf16.msra.mxu1 %v8669_v36 }
 0x2ae   :  { %4995 = vmatprep.subr.bf16.mxu1 %v8662_v40  ;;  %v4216_v40 = vld [vmem:[#allocation11 + $0x588] sm:$0xff] }
 0x2af   :  { %v8704_v42 = vcombine.high %v4212_v39, %v4216_v40 }
 0x2b1   :  { %4996 = vmatpush1.bf16.msra.mxu1 %v8661_v41  ;;  %v8711_v41 = vcombine.low %v4220_v34, %v4224_v35 }
 0x2b2   :  { %4997 = vmatprep.subr.bf16.mxu1 %v8782_v44  ;;  %v4208_v44 = vld [vmem:[#allocation11 + $0x488] sm:$0xff] }
 0x2b3   :  { %v8696_v47 = vcombine.high %v4204_v43, %v4208_v44 }
 0x2b5   :  { %4998 = vmatpush2.bf16.msra.mxu1 %v8781_v46  ;;  %v8703_v46 = vcombine.low %v4212_v39, %v4216_v40  ;;  %v4240_v39 = vld [vmem:[#allocation11 + $0x888] sm:$0xff] }
 0x2b6   :  { %4999 = vmatprep.subr.bf16.mxu1 %v8774_v19  ;;  %v4200_v19 = vld [vmem:[#allocation11 + $0x388] sm:$0xff] }
 0x2b7   :  { %v8688_v51 = vcombine.high %v4196_v48, %v4200_v19  ;;  %v8687_v8 = vcombine.low %v4196_v48, %v4200_v19  ;;  %v4234_v48 = vld [vmem:[#allocation11 + $0x798] sm:$0xff] }
 0x2b9   :  { %5000 = vmatpush2.bf16.msra.mxu1 %v8773_v50  ;;  %v8695_v50 = vcombine.low %v4204_v43, %v4208_v44  ;;  %v4229_v43 = vld [vmem:[#allocation11 + $0x710] sm:$0xff] }
 0x2ba   :  { %5001 = vmatprep.subr.bf16.mxu1 %v8766_v53  ;;  %v4192_v53 = vld [vmem:[#allocation11 + $0x288] sm:$0xff]  ;;  %v4233_v44 = vld [vmem:[#allocation11 + $0x790] sm:$0xff] }
 0x2bb   :  { %v8680_v11 = vcombine.high %v4188_v52, %v4192_v53  ;;  %v8679_v55 = vcombine.low %v4188_v52, %v4192_v53  ;;  %v8721_v19 = vcombine.low %v4229_v43, %v4233_v44  ;;  %v3954_v52 = vld [vmem:[#allocation10] sm:$0x3] }
 0x2bc   :  { %v3959_v53 = vrot.slane %v3954_v52, %v10245_v32 }
 0x2bd   :  { %5002 = vmatpush2.bf16.msra.mxu1 %v8765_v54  ;;  %v4184_v54 = vld [vmem:[#allocation11 + $0x188] sm:$0xff] }
 0x2be   :  { %5003 = vmatprep.subr.bf16.mxu1 %v8758_v56  ;;  %v4172_v56 = vld [vmem:[#allocation11 + $0x8] sm:$0xff] }
 0x2c1   :  { %5004 = vmatpush2.bf16.msra.mxu1 %v8757_v59  ;;  %v4176_v59 = vld [vmem:[#allocation11 + $0x88] sm:$0xff] }
 0x2c2   :  { %5005 = vmatprep.subr.bf16.mxu1 %v8750_v62  ;;  %v8664_v61 = vcombine.high %v4172_v56, %v4176_v59  ;;  %v4292_v62 = vld [vmem:[#allocation11 + $0xf08] sm:$0xff]  ;;  %v8663_v2 = vcombine.low %v4172_v56, %v4176_v59 }
 0x2c5   :  { %5006 = vmatpush2.bf16.msra.mxu1 %v8749_v1  ;;  %v4296_v1 = vld [vmem:[#allocation11 + $0xf88] sm:$0xff] }
 0x2c6   :  { %5007 = vmatprep.subr.bf16.mxu1 %v8742_v4  ;;  %v8784_v3 = vcombine.high %v4292_v62, %v4296_v1  ;;  %v4284_v4 = vld [vmem:[#allocation11 + $0xe08] sm:$0xff] }
 0x2c9   :  { %5008 = vmatpush2.bf16.msra.mxu1 %v8741_v9 }
 0x2d5   :  { %v3788_v5 = vpop.f32.mrf.mxu0 }
 0x2d6   :  { %v3829_v7 = vpop.f32.mrf.mxu1  ;;  %v3789_v45 = vadd.f32 %v3788_v5, %v10281_v57  ;;  %v4288_v5 = vld [vmem:[#allocation11 + $0xe88] sm:$0xff] }
 0x2d7   :  { %v3790_v12 = vpop.f32.mrf.mxu0  ;;  %v8776_v9 = vcombine.high %v4284_v4, %v4288_v5 }
 0x2d8   :  { %v3831_v13 = vpop.f32.mrf.mxu1  ;;  %v3830_v15 = vadd.f32 %v3829_v7, %v3789_v45  ;;  %v3791_v20 = vadd.f32 %v3790_v12, %v10284_v0  ;;  %v8712_v0 = vcombine.high %v4220_v34, %v4224_v35  ;;  %v8783_v7 = vcombine.low %v4292_v62, %v4296_v1  ;;  %v4276_v45 = vld [vmem:[#allocation11 + $0xd08] sm:$0xff]  ;;  %v4235_v35 = vld [vmem:[#allocation11 + $0x800] sm:$0xff]  ;;  %v4225_v62 = vld [vmem:[#allocation11 + $0x690] sm:$0xff] }
 0x2d9   :  { %v3792_v16 = vpop.f32.mrf.mxu0  ;;  %v4280_v12 = vld [vmem:[#allocation11 + $0xd88] sm:$0xff]  ;;  %v4222_v1 = vld [vmem:[#allocation11 + $0x618] sm:$0xff] }
 0x2da   :  { %v3833_v49 = vpop.f32.mrf.mxu1  ;;  %v3832_v23 = vadd.f32 %v3831_v13, %v3791_v20  ;;  %v8775_v13 = vcombine.low %v4284_v4, %v4288_v5  ;;  %v4268_v16 = vld [vmem:[#allocation11 + $0xc08] sm:$0xff]  ;;  %v4213_v5 = vld [vmem:[#allocation11 + $0x510] sm:$0xff] }
 0x2db   :  { %v3793_v17 = vpop.f32.mrf.mxu0  ;;  %v4272_v49 = vld [vmem:[#allocation11 + $0xc88] sm:$0xff] }
 0x2dc   :  { %v3834_v18 = vpop.f32.mrf.mxu1  ;;  %v8767_v17 = vcombine.low %v4276_v45, %v4280_v12  ;;  %v4260_v20 = vld [vmem:[#allocation11 + $0xb08] sm:$0xff] }
 0x2dd   :  { %v8760_v18 = vcombine.high %v4268_v16, %v4272_v49 }
 0x315   :  { %v3870_v21 = vpop.f32.mrf.mxu0 }
 0x316   :  { %v3911_v22 = vpop.f32.mrf.mxu1  ;;  %v3871_v24 = vadd.f32 %v3870_v21, %v3830_v15  ;;  %v8768_v15 = vcombine.high %v4276_v45, %v4280_v12  ;;  %v4264_v21 = vld [vmem:[#allocation11 + $0xb88] sm:$0xff]  ;;  %v4217_v45 = vld [vmem:[#allocation11 + $0x590] sm:$0xff]  ;;  %v4214_v12 = vld [vmem:[#allocation11 + $0x518] sm:$0xff] }
 0x317   :  { %v3872_v58 = vpop.f32.mrf.mxu0 }
 0x318   :  { %v3913_v27 = vpop.f32.mrf.mxu1  ;;  %v3912_v6 = vadd.f32 %v3911_v22, %v3871_v24  ;;  %v3873_v28 = vadd.f32 %v3872_v58, %v3832_v23  ;;  %v8759_v22 = vcombine.low %v4268_v16, %v4272_v49  ;;  %v8752_v23 = vcombine.high %v4260_v20, %v4264_v21  ;;  %v4252_v24 = vld [vmem:[#allocation11 + $0xa08] sm:$0xff] }
 0x319   :  { %v3874_v57 = vpop.f32.mrf.mxu0  ;;  %v4256_v58 = vld [vmem:[#allocation11 + $0xa88] sm:$0xff]  ;;  %v8706_v49 = vcombine.high %v4213_v5, %v4217_v45 }
 0x31a   :  { %v3915_v29 = vpop.f32.mrf.mxu1  ;;  %v3914_v10 = vadd.f32 %v3913_v27, %v3873_v28  ;;  %v3918_v30 = vmax.f32 %v3912_v6, 0.0  ;;  %v8751_v27 = vcombine.low %v4260_v20, %v4264_v21  ;;  %v8744_v6 = vcombine.high %v4252_v24, %v4256_v58  ;;  %v4243_v57 = vld [vmem:[#allocation11 + $0x900] sm:$0xff]  ;;  %v4209_v20 = vld [vmem:[#allocation11 + $0x490] sm:$0xff]  ;;  %v4206_v21 = vld [vmem:[#allocation11 + $0x418] sm:$0xff] }
 0x31b   :  { %v3875_v63 = vpop.f32.mrf.mxu0  ;;  %v8743_v28 = vcombine.low %v4252_v24, %v4256_v58  ;;  %v4247_v29 = vld [vmem:[#allocation11 + $0x980] sm:$0xff] }
 0x31c   :  { %v3916_v31 = vpop.f32.mrf.mxu1  ;;  %v3919_v33 = vmax.f32 %v3914_v10, 0.0  ;;  %v3920_v38 = vpack.c.bf16 %v3918_v30, %v3918_v30  ;;  %v4244_v10 = vld [vmem:[#allocation11 + $0x908] sm:$0xff]  ;;  %v8734_v30 = vcombine.high %v4243_v57, %v4247_v29 }
 0x31d   :  { %v4248_v63 = vld [vmem:[#allocation11 + $0x988] sm:$0xff]  ;;  %v8733_v31 = vcombine.low %v4243_v57, %v4247_v29  ;;  %v4198_v57 = vld [vmem:[#allocation11 + $0x318] sm:$0xff] }
 0x31e   :  { %v3921_v36 = vpack.c.bf16 %v3919_v33, %v3919_v33  ;;  %v8735_v33 = vcombine.low %v4244_v10, %v4248_v63  ;;  %v8736_v34 = vcombine.high %v4244_v10, %v4248_v63  ;;  %5009 = vmatprep.subr.bf16.mxu1 %v8734_v30  ;;  %v4202_v29 = vld [vmem:[#allocation11 + $0x398] sm:$0xff] }
 0x31f   :  { %5010 = vmatpush2.bf16.msra.mxu1 %v8733_v31  ;;  %v8692_v31 = vcombine.high %v4198_v57, %v4202_v29 }
 0x320   :  { %4158 = vmatprep.mubr.bf16.mxu0 %v3921_v36  ;;  %v4239_v36 = vld [vmem:[#allocation11 + $0x880] sm:$0xff] }
 0x321   :  { %4159 = vmatmul.mubr.bf16.vlgmr.msra.gmra.mxu0 %v3920_v38  ;;  %v4236_v38 = vld [vmem:[#allocation11 + $0x808] sm:$0xff]  ;;  %v8725_v40 = vcombine.low %v4235_v35, %v4239_v36 }
 0x322   :  { %5023 = vmatpush1.bf16.msra.mxu0 %v8719_v14  ;;  %v4180_v14 = vld [vmem:[#allocation11 + $0x108] sm:$0xff] }
 0x323   :  { %5024 = vmatprep.subr.bf16.mxu0 %v8712_v0  ;;  %v8672_v26 = vcombine.high %v4180_v14, %v4184_v54  ;;  %v8671_v60 = vcombine.low %v4180_v14, %v4184_v54  ;;  %v8726_v0 = vcombine.high %v4235_v35, %v4239_v36  ;;  %v4190_v35 = vld [vmem:[#allocation11 + $0x218] sm:$0xff] }
 0x324   :  { %v4194_v36 = vld [vmem:[#allocation11 + $0x298] sm:$0xff] }
 0x325   :  { %5011 = vmatprep.subr.bf16.mxu1 %v8726_v0  ;;  %v8691_v0 = vcombine.low %v4198_v57, %v4202_v29 }
 0x326   :  { %5025 = vmatpush1.bf16.msra.mxu0 %v8711_v41  ;;  %v8727_v41 = vcombine.low %v4236_v38, %v4240_v39  ;;  %5012 = vmatpush2.bf16.msra.mxu1 %v8725_v40  ;;  %v8684_v40 = vcombine.high %v4190_v35, %v4194_v36 }
 0x327   :  { %5026 = vmatprep.subr.bf16.mxu0 %v8704_v42  ;;  %v8728_v42 = vcombine.high %v4236_v38, %v4240_v39 }
 0x32a   :  { %5027 = vmatpush1.bf16.msra.mxu0 %v8703_v46  ;;  %v4230_v46 = vld [vmem:[#allocation11 + $0x718] sm:$0xff] }
 0x32b   :  { %5028 = vmatprep.subr.bf16.mxu0 %v8696_v47  ;;  %v8722_v47 = vcombine.high %v4229_v43, %v4233_v44  ;;  %v4182_v43 = vld [vmem:[#allocation11 + $0x118] sm:$0xff] }
 0x32c   :  { %v4186_v44 = vld [vmem:[#allocation11 + $0x198] sm:$0xff] }
 0x32d   :  { %5063 = vmatprep.subr.bf16.mxu1 %v8722_v47  ;;  %v8683_v47 = vcombine.low %v4190_v35, %v4194_v36 }
 0x32e   :  { %5029 = vmatpush1.bf16.msra.mxu0 %v8695_v50  ;;  %v8723_v50 = vcombine.low %v4230_v46, %v4234_v48 }
 0x32f   :  { %5030 = vmatprep.subr.bf16.mxu0 %v8688_v51  ;;  %v8724_v51 = vcombine.high %v4230_v46, %v4234_v48 }
 0x332   :  { %5031 = vmatpush1.bf16.msra.mxu0 %v8687_v8  ;;  %v3963_v8 = vrot.slane %v3954_v52, %v10248_v37  ;;  %v4174_v52 = vld [vmem:[#allocation11 + $0x18] sm:$0xff] }
 0x333   :  { %5032 = vmatprep.subr.bf16.mxu0 %v8680_v11 }
 0x336   :  { %5033 = vmatpush1.bf16.msra.mxu0 %v8679_v55 }
 0x337   :  { %5034 = vmatprep.subr.bf16.mxu0 %v8672_v26 }
 0x33a   :  { %5035 = vmatpush1.bf16.msra.mxu0 %v8671_v60  ;;  %v4221_v60 = vld [vmem:[#allocation11 + $0x610] sm:$0xff] }
 0x33b   :  { %5036 = vmatprep.subr.bf16.mxu0 %v8664_v61 }
 0x33e   :  { %5037 = vmatpush1.bf16.msra.mxu0 %v8663_v2  ;;  %v4226_v2 = vld [vmem:[#allocation11 + $0x698] sm:$0xff] }
 0x33f   :  { %5038 = vmatprep.subr.bf16.mxu0 %v8784_v3  ;;  %v8715_v16 = vcombine.low %v4222_v1, %v4226_v2 }
 0x342   :  { %5039 = vmatpush2.bf16.msra.mxu0 %v8783_v7  ;;  %v8714_v7 = vcombine.high %v4221_v60, %v4225_v62 }
 0x343   :  { %5040 = vmatprep.subr.bf16.mxu0 %v8776_v9  ;;  %v8716_v9 = vcombine.high %v4222_v1, %v4226_v2  ;;  %v4285_v2 = vld [vmem:[#allocation11 + $0xe10] sm:$0xff] }
 0x346   :  { %5041 = vmatpush2.bf16.msra.mxu0 %v8775_v13  ;;  %v4218_v13 = vld [vmem:[#allocation11 + $0x598] sm:$0xff] }
 0x347   :  { %5042 = vmatprep.subr.bf16.mxu0 %v8768_v15  ;;  %v8713_v15 = vcombine.low %v4221_v60, %v4225_v62  ;;  %v8707_v24 = vcombine.low %v4214_v12, %v4218_v13 }
 0x34a   :  { %5043 = vmatpush2.bf16.msra.mxu0 %v8767_v17  ;;  %v8708_v17 = vcombine.high %v4214_v12, %v4218_v13 }
 0x34b   :  { %5044 = vmatprep.subr.bf16.mxu0 %v8760_v18  ;;  %v4205_v18 = vld [vmem:[#allocation11 + $0x410] sm:$0xff] }
 0x34c   :  { %v8698_v58 = vcombine.high %v4205_v18, %v4209_v20  ;;  %v8697_v10 = vcombine.low %v4205_v18, %v4209_v20  ;;  %v4282_v18 = vld [vmem:[#allocation11 + $0xd98] sm:$0xff] }
 0x34e   :  { %5045 = vmatpush2.bf16.msra.mxu0 %v8759_v22  ;;  %v4210_v22 = vld [vmem:[#allocation11 + $0x498] sm:$0xff] }
 0x34f   :  { %5046 = vmatprep.subr.bf16.mxu0 %v8752_v23  ;;  %v8705_v23 = vcombine.low %v4213_v5, %v4217_v45  ;;  %v8699_v30 = vcombine.low %v4206_v21, %v4210_v22  ;;  %v4289_v5 = vld [vmem:[#allocation11 + $0xe90] sm:$0xff] }
 0x350   :  { %v8778_v13 = vcombine.high %v4285_v2, %v4289_v5  ;;  %v8777_v20 = vcombine.low %v4285_v2, %v4289_v5  ;;  %v5214_v2 = vld [vmem:[#allocation11 + $0x7a8] sm:$0xff] }
 0x352   :  { %5047 = vmatpush2.bf16.msra.mxu0 %v8751_v27  ;;  %v8700_v27 = vcombine.high %v4206_v21, %v4210_v22 }
 0x353   :  { %5048 = vmatprep.subr.bf16.mxu0 %v8744_v6  ;;  %v4197_v6 = vld [vmem:[#allocation11 + $0x310] sm:$0xff] }
 0x356   :  { %5049 = vmatpush2.bf16.msra.mxu0 %v8743_v28  ;;  %v4201_v28 = vld [vmem:[#allocation11 + $0x390] sm:$0xff] }
 0x357   :  { %5050 = vmatprep.subr.bf16.mxu0 %v8736_v34  ;;  %v8690_v63 = vcombine.high %v4197_v6, %v4201_v28  ;;  %v4193_v34 = vld [vmem:[#allocation11 + $0x290] sm:$0xff]  ;;  %v8689_v38 = vcombine.low %v4197_v6, %v4201_v28  ;;  %v4274_v6 = vld [vmem:[#allocation11 + $0xc98] sm:$0xff] }
 0x35a   :  { %5051 = vmatpush2.bf16.msra.mxu0 %v8735_v33  ;;  %v4189_v33 = vld [vmem:[#allocation11 + $0x210] sm:$0xff] }
 0x35b   :  { %5052 = vmatprep.subr.bf16.mxu0 %v8728_v42  ;;  %v8682_v39 = vcombine.high %v4189_v33, %v4193_v34  ;;  %v4185_v42 = vld [vmem:[#allocation11 + $0x190] sm:$0xff]  ;;  %v8681_v46 = vcombine.low %v4189_v33, %v4193_v34  ;;  %v4266_v33 = vld [vmem:[#allocation11 + $0xb98] sm:$0xff] }
 0x35e   :  { %5053 = vmatpush2.bf16.msra.mxu0 %v8727_v41  ;;  %v4181_v41 = vld [vmem:[#allocation11 + $0x110] sm:$0xff] }
 0x35f   :  { %5104 = vmatprep.subr.bf16.mxu0 %v8724_v51  ;;  %v8674_v48 = vcombine.high %v4181_v41, %v4185_v42  ;;  %v4177_v51 = vld [vmem:[#allocation11 + $0x90] sm:$0xff] }
 0x3e1   :  { %v4160_v11 = vpop.f32.mrf.mxu0 }
 0x3e2   :  { %v4161_v14 = vadd.f32 %v4160_v11, %v3959_v53  ;;  %v4178_v53 = vld [vmem:[#allocation11 + $0x98] sm:$0xff]  ;;  %v8675_v11 = vcombine.low %v4182_v43, %v4186_v44 }
 0x3e3   :  { %v4162_v54 = vpop.f32.mrf.mxu0 }
 0x3e4   :  { %v4163_v55 = vadd.f32 %v4162_v54, %v3963_v8  ;;  %v4167_v26 = vmax.f32 %v4161_v14, 0.0  ;;  %v8673_v8 = vcombine.low %v4181_v41, %v4185_v42  ;;  %v8668_v54 = vcombine.high %v4174_v52, %v4178_v53  ;;  %v4258_v41 = vld [vmem:[#allocation11 + $0xa98] sm:$0xff] }
 0x3e5   :  { %v4164_v56 = vpop.f32.mrf.mxu0 }
 0x3e6   :  { %v4168_v59 = vmax.f32 %v4163_v55, 0.0  ;;  %v10303_v4 = vpack.c.bf16 %v4167_v26, %v4167_v26  ;;  %v4293_v55 = vld [vmem:[#allocation11 + $0xf10] sm:$0xff]  ;;  %v4294_v56 = vld [vmem:[#allocation11 + $0xf18] sm:$0xff] }
 0x3e7   :  { %v4165_v61 = vpop.f32.mrf.mxu0  ;;  %v4297_v26 = vld [vmem:[#allocation11 + $0xf90] sm:$0xff] }
 0x3e8   :  { %v10301_v3 = vpack.c.bf16 %v4168_v59, %v4168_v59  ;;  %v4298_v59 = vld [vmem:[#allocation11 + $0xf98] sm:$0xff]  ;;  %v8667_v61 = vcombine.low %v4174_v52, %v4178_v53  ;;  %v8786_v62 = vcombine.high %v4293_v55, %v4297_v26  ;;  %v8785_v45 = vcombine.low %v4293_v55, %v4297_v26 }
 0x3e9   :  { %v8788_v1 = vcombine.high %v4294_v56, %v4298_v59  ;;  %v8787_v12 = vcombine.low %v4294_v56, %v4298_v59  ;;  %v4242_v55 = vld [vmem:[#allocation11 + $0x898] sm:$0xff] }
 0x3ea   :  { %5013 = vmatprep.mubr.bf16.mxu1 %v10301_v3  ;;  %5054 = vmatprep.mubr.bf16.mxu0 %v10301_v3 }
 0x3eb   :  { %5014 = vmatmul.mubr.bf16.vlgmr.msra.gmra.mxu1 %v10303_v4  ;;  %5055 = vmatmul.mubr.bf16.vlgmr.msra.gmra.mxu0 %v10303_v4 }
 0x3ec   :  { %5064 = vmatpush1.bf16.msra.mxu1 %v8721_v19  ;;  %5105 = vmatpush1.bf16.msra.mxu0 %v8723_v50  ;;  %v8676_v19 = vcombine.high %v4182_v43, %v4186_v44  ;;  %v4173_v50 = vld [vmem:[#allocation11 + $0x10] sm:$0xff] }
 0x3ed   :  { %5095 = vmatprep.mubr.bf16.mxu1 %v10301_v3  ;;  %5136 = vmatprep.mubr.bf16.mxu0 %v10301_v3  ;;  %v8666_v14 = vcombine.high %v4173_v50, %v4177_v51  ;;  %v8665_v60 = vcombine.low %v4173_v50, %v4177_v51  ;;  %v4250_v50 = vld [vmem:[#allocation11 + $0x998] sm:$0xff] }
 0x3ee   :  { %5065 = vmatprep.subr.bf16.mxu1 %v8714_v7  ;;  %5106 = vmatprep.subr.bf16.mxu0 %v8716_v9  ;;  %v4286_v7 = vld [vmem:[#allocation11 + $0xe18] sm:$0xff] }
 0x3ef   :  { %v4290_v9 = vld [vmem:[#allocation11 + $0xe98] sm:$0xff] }
 0x3f0   :  { %5066 = vmatpush1.bf16.msra.mxu1 %v8713_v15  ;;  %5107 = vmatpush1.bf16.msra.mxu0 %v8715_v16  ;;  %v8780_v15 = vcombine.high %v4286_v7, %v4290_v9  ;;  %v4277_v16 = vld [vmem:[#allocation11 + $0xd10] sm:$0xff]  ;;  %v8779_v21 = vcombine.low %v4286_v7, %v4290_v9 }
 0x3f1   :  { %5067 = vmatprep.subr.bf16.mxu1 %v8706_v49  ;;  %5108 = vmatprep.subr.bf16.mxu0 %v8708_v17  ;;  %v4281_v49 = vld [vmem:[#allocation11 + $0xd90] sm:$0xff]  ;;  %v4278_v17 = vld [vmem:[#allocation11 + $0xd18] sm:$0xff] }
 0x3f2   :  { %v8770_v22 = vcombine.high %v4277_v16, %v4281_v49  ;;  %v8769_v28 = vcombine.low %v4277_v16, %v4281_v49  ;;  %v8771_v57 = vcombine.low %v4278_v17, %v4282_v18  ;;  %v5206_v16 = vld [vmem:[#allocation11 + $0x6a8] sm:$0xff] }
 0x3f4   :  { %5068 = vmatpush1.bf16.msra.mxu1 %v8705_v23  ;;  %5109 = vmatpush1.bf16.msra.mxu0 %v8707_v24  ;;  %v8772_v23 = vcombine.high %v4278_v17, %v4282_v18  ;;  %v4269_v24 = vld [vmem:[#allocation11 + $0xc10] sm:$0xff] }
 0x3f5   :  { %5069 = vmatprep.subr.bf16.mxu1 %v8698_v58  ;;  %5110 = vmatprep.subr.bf16.mxu0 %v8700_v27  ;;  %v4273_v58 = vld [vmem:[#allocation11 + $0xc90] sm:$0xff]  ;;  %v4270_v27 = vld [vmem:[#allocation11 + $0xc18] sm:$0xff] }
 0x3f6   :  { %v8762_v29 = vcombine.high %v4269_v24, %v4273_v58  ;;  %v8761_v34 = vcombine.low %v4269_v24, %v4273_v58  ;;  %v8763_v35 = vcombine.low %v4270_v27, %v4274_v6  ;;  %v5198_v24 = vld [vmem:[#allocation11 + $0x5a8] sm:$0xff] }
 0x3f8   :  { %5070 = vmatpush1.bf16.msra.mxu1 %v8697_v10  ;;  %5111 = vmatpush1.bf16.msra.mxu0 %v8699_v30  ;;  %v8764_v10 = vcombine.high %v4270_v27, %v4274_v6  ;;  %v4261_v30 = vld [vmem:[#allocation11 + $0xb10] sm:$0xff] }
 0x3f9   :  { %5071 = vmatprep.subr.bf16.mxu1 %v8690_v63  ;;  %5112 = vmatprep.subr.bf16.mxu0 %v8692_v31  ;;  %v4265_v63 = vld [vmem:[#allocation11 + $0xb90] sm:$0xff]  ;;  %v4262_v31 = vld [vmem:[#allocation11 + $0xb18] sm:$0xff] }
 0x3fa   :  { %v8754_v36 = vcombine.high %v4261_v30, %v4265_v63  ;;  %v8753_v42 = vcombine.low %v4261_v30, %v4265_v63  ;;  %v8755_v43 = vcombine.low %v4262_v31, %v4266_v33  ;;  %v5190_v30 = vld [vmem:[#allocation11 + $0x4a8] sm:$0xff] }
 0x3fc   :  { %5072 = vmatpush1.bf16.msra.mxu1 %v8689_v38  ;;  %5113 = vmatpush1.bf16.msra.mxu0 %v8691_v0  ;;  %v8756_v38 = vcombine.high %v4262_v31, %v4266_v33  ;;  %v4253_v0 = vld [vmem:[#allocation11 + $0xa10] sm:$0xff] }
 0x3fd   :  { %5073 = vmatprep.subr.bf16.mxu1 %v8682_v39  ;;  %5114 = vmatprep.subr.bf16.mxu0 %v8684_v40  ;;  %v4257_v39 = vld [vmem:[#allocation11 + $0xa90] sm:$0xff]  ;;  %v4254_v40 = vld [vmem:[#allocation11 + $0xa18] sm:$0xff] }
 0x3fe   :  { %v8746_v44 = vcombine.high %v4253_v0, %v4257_v39  ;;  %v8745_v51 = vcombine.low %v4253_v0, %v4257_v39  ;;  %v8747_v52 = vcombine.low %v4254_v40, %v4258_v41  ;;  %v5182_v0 = vld [vmem:[#allocation11 + $0x3a8] sm:$0xff] }
 0x400   :  { %5074 = vmatpush1.bf16.msra.mxu1 %v8681_v46  ;;  %5115 = vmatpush1.bf16.msra.mxu0 %v8683_v47  ;;  %v8748_v46 = vcombine.high %v4254_v40, %v4258_v41  ;;  %v4245_v47 = vld [vmem:[#allocation11 + $0x910] sm:$0xff] }
 0x401   :  { %5075 = vmatprep.subr.bf16.mxu1 %v8674_v48  ;;  %5116 = vmatprep.subr.bf16.mxu0 %v8676_v19  ;;  %v4249_v48 = vld [vmem:[#allocation11 + $0x990] sm:$0xff]  ;;  %v4246_v19 = vld [vmem:[#allocation11 + $0x918] sm:$0xff] }
 0x402   :  { %v8738_v53 = vcombine.high %v4245_v47, %v4249_v48  ;;  %v8737_v26 = vcombine.low %v4245_v47, %v4249_v48  ;;  %v8739_v56 = vcombine.low %v4246_v19, %v4250_v50  ;;  %v5174_v47 = vld [vmem:[#allocation11 + $0x2a8] sm:$0xff] }
 0x404   :  { %5076 = vmatpush1.bf16.msra.mxu1 %v8673_v8  ;;  %5117 = vmatpush1.bf16.msra.mxu0 %v8675_v11  ;;  %v8740_v8 = vcombine.high %v4246_v19, %v4250_v50  ;;  %v4237_v11 = vld [vmem:[#allocation11 + $0x810] sm:$0xff] }
 0x405   :  { %5077 = vmatprep.subr.bf16.mxu1 %v8666_v14  ;;  %5118 = vmatprep.subr.bf16.mxu0 %v8668_v54  ;;  %v4241_v14 = vld [vmem:[#allocation11 + $0x890] sm:$0xff]  ;;  %v4238_v54 = vld [vmem:[#allocation11 + $0x818] sm:$0xff] }
 0x406   :  { %v8730_v59 = vcombine.high %v4237_v11, %v4241_v14  ;;  %v8729_v5 = vcombine.low %v4237_v11, %v4241_v14  ;;  %v8731_v7 = vcombine.low %v4238_v54, %v4242_v55  ;;  %v5166_v11 = vld [vmem:[#allocation11 + $0x1a8] sm:$0xff] }
 0x408   :  { %5078 = vmatpush1.bf16.msra.mxu1 %v8665_v60  ;;  %5119 = vmatpush1.bf16.msra.mxu0 %v8667_v61  ;;  %v8732_v60 = vcombine.high %v4238_v54, %v4242_v55  ;;  %v5209_v61 = vld [vmem:[#allocation11 + $0x720] sm:$0xff] }
 0x409   :  { %5079 = vmatprep.subr.bf16.mxu1 %v8786_v62  ;;  %5120 = vmatprep.subr.bf16.mxu0 %v8788_v1  ;;  %v5213_v62 = vld [vmem:[#allocation11 + $0x7a0] sm:$0xff]  ;;  %v5210_v1 = vld [vmem:[#allocation11 + $0x728] sm:$0xff] }
 0x40a   :  { %v8846_v9 = vcombine.high %v5209_v61, %v5213_v62  ;;  %v8845_v49 = vcombine.low %v5209_v61, %v5213_v62  ;;  %v8847_v17 = vcombine.low %v5210_v1, %v5214_v2  ;;  %v5158_v61 = vld [vmem:[#allocation11 + $0xa8] sm:$0xff] }
 0x40c   :  { %5080 = vmatpush2.bf16.msra.mxu1 %v8785_v45  ;;  %5121 = vmatpush2.bf16.msra.mxu0 %v8787_v12  ;;  %v8848_v45 = vcombine.high %v5210_v1, %v5214_v2  ;;  %v5201_v12 = vld [vmem:[#allocation11 + $0x620] sm:$0xff] }
 0x40d   :  { %5081 = vmatprep.subr.bf16.mxu1 %v8778_v13  ;;  %5122 = vmatprep.subr.bf16.mxu0 %v8780_v15  ;;  %v5205_v13 = vld [vmem:[#allocation11 + $0x6a0] sm:$0xff]  ;;  %v5202_v15 = vld [vmem:[#allocation11 + $0x628] sm:$0xff] }
 0x40e   :  { %v8838_v18 = vcombine.high %v5201_v12, %v5205_v13  ;;  %v8837_v58 = vcombine.low %v5201_v12, %v5205_v13  ;;  %v8839_v27 = vcombine.low %v5202_v15, %v5206_v16  ;;  %v5278_v12 = vld [vmem:[#allocation11 + $0xfa8] sm:$0xff] }
 0x410   :  { %5082 = vmatpush2.bf16.msra.mxu1 %v8777_v20  ;;  %5123 = vmatpush2.bf16.msra.mxu0 %v8779_v21  ;;  %v8840_v20 = vcombine.high %v5202_v15, %v5206_v16  ;;  %v5193_v21 = vld [vmem:[#allocation11 + $0x520] sm:$0xff] }
 0x411   :  { %5083 = vmatprep.subr.bf16.mxu1 %v8770_v22  ;;  %5124 = vmatprep.subr.bf16.mxu0 %v8772_v23  ;;  %v5197_v22 = vld [vmem:[#allocation11 + $0x5a0] sm:$0xff]  ;;  %v5194_v23 = vld [vmem:[#allocation11 + $0x528] sm:$0xff] }
 0x412   :  { %v8830_v6 = vcombine.high %v5193_v21, %v5197_v22  ;;  %v8829_v63 = vcombine.low %v5193_v21, %v5197_v22  ;;  %v8831_v31 = vcombine.low %v5194_v23, %v5198_v24  ;;  %v5270_v21 = vld [vmem:[#allocation11 + $0xea8] sm:$0xff] }
 0x414   :  { %5084 = vmatpush2.bf16.msra.mxu1 %v8769_v28  ;;  %5125 = vmatpush2.bf16.msra.mxu0 %v8771_v57  ;;  %v8832_v28 = vcombine.high %v5194_v23, %v5198_v24  ;;  %v5185_v57 = vld [vmem:[#allocation11 + $0x420] sm:$0xff] }
 0x415   :  { %5085 = vmatprep.subr.bf16.mxu1 %v8762_v29  ;;  %5126 = vmatprep.subr.bf16.mxu0 %v8764_v10  ;;  %v5189_v29 = vld [vmem:[#allocation11 + $0x4a0] sm:$0xff]  ;;  %v5186_v10 = vld [vmem:[#allocation11 + $0x428] sm:$0xff] }
 0x416   :  { %v8822_v33 = vcombine.high %v5185_v57, %v5189_v29  ;;  %v8821_v39 = vcombine.low %v5185_v57, %v5189_v29  ;;  %v8823_v40 = vcombine.low %v5186_v10, %v5190_v30  ;;  %v5262_v57 = vld [vmem:[#allocation11 + $0xda8] sm:$0xff] }
 0x418   :  { %5086 = vmatpush2.bf16.msra.mxu1 %v8761_v34  ;;  %5127 = vmatpush2.bf16.msra.mxu0 %v8763_v35  ;;  %v8824_v34 = vcombine.high %v5186_v10, %v5190_v30  ;;  %v5177_v35 = vld [vmem:[#allocation11 + $0x320] sm:$0xff] }
 0x419   :  { %5087 = vmatprep.subr.bf16.mxu1 %v8754_v36  ;;  %5128 = vmatprep.subr.bf16.mxu0 %v8756_v38  ;;  %v5181_v36 = vld [vmem:[#allocation11 + $0x3a0] sm:$0xff]  ;;  %v5178_v38 = vld [vmem:[#allocation11 + $0x328] sm:$0xff] }
 0x41a   :  { %v8814_v41 = vcombine.high %v5177_v35, %v5181_v36  ;;  %v8813_v48 = vcombine.low %v5177_v35, %v5181_v36  ;;  %v8815_v19 = vcombine.low %v5178_v38, %v5182_v0  ;;  %v5254_v35 = vld [vmem:[#allocation11 + $0xca8] sm:$0xff] }
 0x41c   :  { %5088 = vmatpush2.bf16.msra.mxu1 %v8753_v42  ;;  %5129 = vmatpush2.bf16.msra.mxu0 %v8755_v43  ;;  %v8816_v42 = vcombine.high %v5178_v38, %v5182_v0  ;;  %v5169_v43 = vld [vmem:[#allocation11 + $0x220] sm:$0xff] }
 0x41d   :  { %5089 = vmatprep.subr.bf16.mxu1 %v8746_v44  ;;  %5130 = vmatprep.subr.bf16.mxu0 %v8748_v46  ;;  %v5173_v44 = vld [vmem:[#allocation11 + $0x2a0] sm:$0xff]  ;;  %v5170_v46 = vld [vmem:[#allocation11 + $0x228] sm:$0xff] }
 0x41e   :  { %v8806_v50 = vcombine.high %v5169_v43, %v5173_v44  ;;  %v8805_v14 = vcombine.low %v5169_v43, %v5173_v44  ;;  %v8807_v54 = vcombine.low %v5170_v46, %v5174_v47  ;;  %v5246_v43 = vld [vmem:[#allocation11 + $0xba8] sm:$0xff] }
 0x420   :  { %5090 = vmatpush2.bf16.msra.mxu1 %v8745_v51  ;;  %5131 = vmatpush2.bf16.msra.mxu0 %v8747_v52  ;;  %v8808_v51 = vcombine.high %v5170_v46, %v5174_v47  ;;  %v5161_v52 = vld [vmem:[#allocation11 + $0x120] sm:$0xff] }
 0x421   :  { %5091 = vmatprep.subr.bf16.mxu1 %v8738_v53  ;;  %5132 = vmatprep.subr.bf16.mxu0 %v8740_v8  ;;  %v5165_v53 = vld [vmem:[#allocation11 + $0x1a0] sm:$0xff]  ;;  %v5162_v8 = vld [vmem:[#allocation11 + $0x128] sm:$0xff] }
 0x422   :  { %v8798_v55 = vcombine.high %v5161_v52, %v5165_v53  ;;  %v8797_v62 = vcombine.low %v5161_v52, %v5165_v53  ;;  %v8799_v1 = vcombine.low %v5162_v8, %v5166_v11  ;;  %v5238_v52 = vld [vmem:[#allocation11 + $0xaa8] sm:$0xff] }
 0x424   :  { %5092 = vmatpush2.bf16.msra.mxu1 %v8737_v26  ;;  %5133 = vmatpush2.bf16.msra.mxu0 %v8739_v56  ;;  %v8800_v26 = vcombine.high %v5162_v8, %v5166_v11  ;;  %v5153_v56 = vld [vmem:[#allocation11 + $0x20] sm:$0xff] }
 0x425   :  { %5093 = vmatprep.subr.bf16.mxu1 %v8730_v59  ;;  %5134 = vmatprep.subr.bf16.mxu0 %v8732_v60  ;;  %v5157_v59 = vld [vmem:[#allocation11 + $0xa0] sm:$0xff]  ;;  %v5154_v60 = vld [vmem:[#allocation11 + $0x28] sm:$0xff] }
 0x426   :  { %v8790_v2 = vcombine.high %v5153_v56, %v5157_v59  ;;  %v8789_v13 = vcombine.low %v5153_v56, %v5157_v59  ;;  %v8791_v15 = vcombine.low %v5154_v60, %v5158_v61  ;;  %v5230_v56 = vld [vmem:[#allocation11 + $0x9a8] sm:$0xff] }
 0x428   :  { %5094 = vmatpush2.bf16.msra.mxu1 %v8729_v5  ;;  %5135 = vmatpush2.bf16.msra.mxu0 %v8731_v7  ;;  %v8792_v5 = vcombine.high %v5154_v60, %v5158_v61  ;;  %v5273_v7 = vld [vmem:[#allocation11 + $0xf20] sm:$0xff] }
 0x429   :  { %5963 = vmatprep.subr.bf16.mxu1 %v8846_v9  ;;  %6004 = vmatprep.subr.bf16.mxu0 %v8848_v45  ;;  %v5277_v9 = vld [vmem:[#allocation11 + $0xfa0] sm:$0xff]  ;;  %v5274_v45 = vld [vmem:[#allocation11 + $0xf28] sm:$0xff] }
 0x42a   :  { %v8910_v16 = vcombine.high %v5273_v7, %v5277_v9  ;;  %v8909_v22 = vcombine.low %v5273_v7, %v5277_v9  ;;  %v8911_v23 = vcombine.low %v5274_v45, %v5278_v12  ;;  %v5222_v7 = vld [vmem:[#allocation11 + $0x8a8] sm:$0xff] }
 0x42b   :  { %5096 = vmatmul.mubr.bf16.vlgmr.msra.gmra.mxu1 %v10303_v4  ;;  %5137 = vmatmul.mubr.bf16.vlgmr.msra.gmra.mxu0 %v10303_v4 }
 0x42c   :  { %5964 = vmatpush1.bf16.msra.mxu1 %v8845_v49  ;;  %5995 = vmatprep.mubr.bf16.mxu1 %v10301_v3  ;;  %v8912_v49 = vcombine.high %v5274_v45, %v5278_v12 }
 0x42d   :  { %6005 = vmatpush1.bf16.msra.mxu0 %v8847_v17  ;;  %6036 = vmatprep.mubr.bf16.mxu0 %v10301_v3  ;;  %v5265_v17 = vld [vmem:[#allocation11 + $0xe20] sm:$0xff] }
 0x42e   :  { %5965 = vmatprep.subr.bf16.mxu1 %v8838_v18  ;;  %6006 = vmatprep.subr.bf16.mxu0 %v8840_v20  ;;  %v5269_v18 = vld [vmem:[#allocation11 + $0xea0] sm:$0xff]  ;;  %v5266_v20 = vld [vmem:[#allocation11 + $0xe28] sm:$0xff] }
 0x42f   :  { %v8902_v24 = vcombine.high %v5265_v17, %v5269_v18  ;;  %v8901_v29 = vcombine.low %v5265_v17, %v5269_v18  ;;  %v8903_v10 = vcombine.low %v5266_v20, %v5270_v21  ;;  %v5216_v17 = vld [vmem:[#allocation11 + $0x7b8] sm:$0xff] }
 0x430   :  { %5966 = vmatpush1.bf16.msra.mxu1 %v8837_v58  ;;  %v8904_v58 = vcombine.high %v5266_v20, %v5270_v21 }
 0x431   :  { %6007 = vmatpush1.bf16.msra.mxu0 %v8839_v27  ;;  %5967 = vmatprep.subr.bf16.mxu1 %v8830_v6  ;;  %v5257_v27 = vld [vmem:[#allocation11 + $0xd20] sm:$0xff] }
 0x432   :  { %6008 = vmatprep.subr.bf16.mxu0 %v8832_v28  ;;  %v5261_v6 = vld [vmem:[#allocation11 + $0xda0] sm:$0xff]  ;;  %v5258_v28 = vld [vmem:[#allocation11 + $0xd28] sm:$0xff] }
 0x433   :  { %v8894_v30 = vcombine.high %v5257_v27, %v5261_v6  ;;  %v8893_v36 = vcombine.low %v5257_v27, %v5261_v6  ;;  %v8895_v38 = vcombine.low %v5258_v28, %v5262_v57  ;;  %v5204_v27 = vld [vmem:[#allocation11 + $0x638] sm:$0xff] }
 0x434   :  { %5968 = vmatpush1.bf16.msra.mxu1 %v8829_v63  ;;  %v8896_v63 = vcombine.high %v5258_v28, %v5262_v57  ;;  %v5208_v6 = vld [vmem:[#allocation11 + $0x6b8] sm:$0xff] }
 0x435   :  { %6009 = vmatpush1.bf16.msra.mxu0 %v8831_v31  ;;  %5969 = vmatprep.subr.bf16.mxu1 %v8822_v33  ;;  %v5249_v31 = vld [vmem:[#allocation11 + $0xc20] sm:$0xff] }
 0x436   :  { %6010 = vmatprep.subr.bf16.mxu0 %v8824_v34  ;;  %v5253_v33 = vld [vmem:[#allocation11 + $0xca0] sm:$0xff]  ;;  %v5250_v34 = vld [vmem:[#allocation11 + $0xc28] sm:$0xff] }
 0x437   :  { %v8886_v0 = vcombine.high %v5249_v31, %v5253_v33  ;;  %v8885_v44 = vcombine.low %v5249_v31, %v5253_v33  ;;  %v8887_v46 = vcombine.low %v5250_v34, %v5254_v35  ;;  %v5200_v31 = vld [vmem:[#allocation11 + $0x5b8] sm:$0xff] }
 0x438   :  { %5970 = vmatpush1.bf16.msra.mxu1 %v8821_v39  ;;  %v8888_v39 = vcombine.high %v5250_v34, %v5254_v35  ;;  %v8843_v34 = vcombine.low %v5204_v27, %v5208_v6 }
 0x439   :  { %6011 = vmatpush1.bf16.msra.mxu0 %v8823_v40  ;;  %5971 = vmatprep.subr.bf16.mxu1 %v8814_v41  ;;  %v5241_v40 = vld [vmem:[#allocation11 + $0xb20] sm:$0xff] }
 0x43a   :  { %6012 = vmatprep.subr.bf16.mxu0 %v8816_v42  ;;  %v5245_v41 = vld [vmem:[#allocation11 + $0xba0] sm:$0xff]  ;;  %v5242_v42 = vld [vmem:[#allocation11 + $0xb28] sm:$0xff] }
 0x43b   :  { %v8878_v47 = vcombine.high %v5241_v40, %v5245_v41  ;;  %v8877_v53 = vcombine.low %v5241_v40, %v5245_v41  ;;  %v8879_v8 = vcombine.low %v5242_v42, %v5246_v43  ;;  %v5192_v40 = vld [vmem:[#allocation11 + $0x4b8] sm:$0xff] }
 0x43c   :  { %5972 = vmatpush1.bf16.msra.mxu1 %v8813_v48  ;;  %v8880_v48 = vcombine.high %v5242_v42, %v5246_v43 }
 0x43d   :  { %6013 = vmatpush1.bf16.msra.mxu0 %v8815_v19  ;;  %5973 = vmatprep.subr.bf16.mxu1 %v8806_v50  ;;  %v5233_v19 = vld [vmem:[#allocation11 + $0xa20] sm:$0xff] }
 0x43e   :  { %6014 = vmatprep.subr.bf16.mxu0 %v8808_v51  ;;  %v5237_v50 = vld [vmem:[#allocation11 + $0xaa0] sm:$0xff]  ;;  %v5234_v51 = vld [vmem:[#allocation11 + $0xa28] sm:$0xff] }
 0x43f   :  { %v8870_v11 = vcombine.high %v5233_v19, %v5237_v50  ;;  %v8869_v59 = vcombine.low %v5233_v19, %v5237_v50  ;;  %v8871_v60 = vcombine.low %v5234_v51, %v5238_v52  ;;  %v5184_v19 = vld [vmem:[#allocation11 + $0x3b8] sm:$0xff] }
 0x440   :  { %5974 = vmatpush1.bf16.msra.mxu1 %v8805_v14  ;;  %v8872_v14 = vcombine.high %v5234_v51, %v5238_v52 }
 0x441   :  { %6015 = vmatpush1.bf16.msra.mxu0 %v8807_v54  ;;  %5975 = vmatprep.subr.bf16.mxu1 %v8798_v55  ;;  %v5225_v54 = vld [vmem:[#allocation11 + $0x920] sm:$0xff] }
 0x442   :  { %6016 = vmatprep.subr.bf16.mxu0 %v8800_v26  ;;  %v5229_v55 = vld [vmem:[#allocation11 + $0x9a0] sm:$0xff]  ;;  %v5226_v26 = vld [vmem:[#allocation11 + $0x928] sm:$0xff] }
 0x443   :  { %v8862_v61 = vcombine.high %v5225_v54, %v5229_v55  ;;  %v8861_v9 = vcombine.low %v5225_v54, %v5229_v55  ;;  %v8863_v45 = vcombine.low %v5226_v26, %v5230_v56  ;;  %v5176_v54 = vld [vmem:[#allocation11 + $0x2b8] sm:$0xff] }
 0x444   :  { %5976 = vmatpush1.bf16.msra.mxu1 %v8797_v62  ;;  %v8864_v62 = vcombine.high %v5226_v26, %v5230_v56 }
 0x445   :  { %6017 = vmatpush1.bf16.msra.mxu0 %v8799_v1  ;;  %5977 = vmatprep.subr.bf16.mxu1 %v8790_v2  ;;  %v5217_v1 = vld [vmem:[#allocation11 + $0x820] sm:$0xff] }
 0x446   :  { %6018 = vmatprep.subr.bf16.mxu0 %v8792_v5  ;;  %v5221_v2 = vld [vmem:[#allocation11 + $0x8a0] sm:$0xff]  ;;  %v5218_v5 = vld [vmem:[#allocation11 + $0x828] sm:$0xff] }
 0x447   :  { %v8854_v12 = vcombine.high %v5217_v1, %v5221_v2  ;;  %v8853_v18 = vcombine.low %v5217_v1, %v5221_v2  ;;  %v8855_v20 = vcombine.low %v5218_v5, %v5222_v7  ;;  %v5168_v1 = vld [vmem:[#allocation11 + $0x1b8] sm:$0xff] }
 0x448   :  { %5978 = vmatpush1.bf16.msra.mxu1 %v8789_v13  ;;  %v8856_v13 = vcombine.high %v5218_v5, %v5222_v7 }
 0x449   :  { %6019 = vmatpush1.bf16.msra.mxu0 %v8791_v15  ;;  %5979 = vmatprep.subr.bf16.mxu1 %v8910_v16  ;;  %v5211_v15 = vld [vmem:[#allocation11 + $0x730] sm:$0xff] }
 0x44a   :  { %6020 = vmatprep.subr.bf16.mxu0 %v8912_v49  ;;  %v5215_v16 = vld [vmem:[#allocation11 + $0x7b0] sm:$0xff]  ;;  %v5212_v49 = vld [vmem:[#allocation11 + $0x738] sm:$0xff] }
 0x44b   :  { %v8850_v21 = vcombine.high %v5211_v15, %v5215_v16  ;;  %v8851_v28 = vcombine.low %v5212_v49, %v5216_v17 }
 0x44c   :  { %5980 = vmatpush2.bf16.msra.mxu1 %v8909_v22  ;;  %v8852_v22 = vcombine.high %v5212_v49, %v5216_v17 }
 0x44d   :  { %6021 = vmatpush2.bf16.msra.mxu0 %v8911_v23  ;;  %5981 = vmatprep.subr.bf16.mxu1 %v8902_v24  ;;  %v5203_v23 = vld [vmem:[#allocation11 + $0x630] sm:$0xff] }
 0x44e   :  { %6022 = vmatprep.subr.bf16.mxu0 %v8904_v58  ;;  %v5207_v24 = vld [vmem:[#allocation11 + $0x6b0] sm:$0xff]  ;;  %v8849_v58 = vcombine.low %v5211_v15, %v5215_v16  ;;  %v5160_v15 = vld [vmem:[#allocation11 + $0xb8] sm:$0xff] }
 0x44f   :  { %v8842_v57 = vcombine.high %v5203_v23, %v5207_v24  ;;  %v8841_v33 = vcombine.low %v5203_v23, %v5207_v24  ;;  %v5280_v23 = vld [vmem:[#allocation11 + $0xfb8] sm:$0xff] }
 0x450   :  { %5982 = vmatpush2.bf16.msra.mxu1 %v8901_v29  ;;  %v5195_v29 = vld [vmem:[#allocation11 + $0x530] sm:$0xff] }
 0x451   :  { %6023 = vmatpush2.bf16.msra.mxu0 %v8903_v10  ;;  %5983 = vmatprep.subr.bf16.mxu1 %v8894_v30  ;;  %v5199_v10 = vld [vmem:[#allocation11 + $0x5b0] sm:$0xff]  ;;  %v8844_v30 = vcombine.high %v5204_v27, %v5208_v6 }
 0x452   :  { %6024 = vmatprep.subr.bf16.mxu0 %v8896_v63  ;;  %v5196_v63 = vld [vmem:[#allocation11 + $0x538] sm:$0xff]  ;;  %v8834_v35 = vcombine.high %v5195_v29, %v5199_v10  ;;  %v8833_v41 = vcombine.low %v5195_v29, %v5199_v10 }
 0x453   :  { %v8835_v42 = vcombine.low %v5196_v63, %v5200_v31  ;;  %v5268_v29 = vld [vmem:[#allocation11 + $0xe38] sm:$0xff] }
 0x454   :  { %5984 = vmatpush2.bf16.msra.mxu1 %v8893_v36  ;;  %v8836_v36 = vcombine.high %v5196_v63, %v5200_v31  ;;  %v5272_v10 = vld [vmem:[#allocation11 + $0xeb8] sm:$0xff] }
 0x455   :  { %6025 = vmatpush2.bf16.msra.mxu0 %v8895_v38  ;;  %5985 = vmatprep.subr.bf16.mxu1 %v8886_v0  ;;  %v5187_v38 = vld [vmem:[#allocation11 + $0x430] sm:$0xff] }
 0x456   :  { %6026 = vmatprep.subr.bf16.mxu0 %v8888_v39  ;;  %v5191_v0 = vld [vmem:[#allocation11 + $0x4b0] sm:$0xff]  ;;  %v5188_v39 = vld [vmem:[#allocation11 + $0x438] sm:$0xff] }
 0x457   :  { %v8826_v43 = vcombine.high %v5187_v38, %v5191_v0  ;;  %v8825_v50 = vcombine.low %v5187_v38, %v5191_v0  ;;  %v8827_v51 = vcombine.low %v5188_v39, %v5192_v40  ;;  %v5264_v38 = vld [vmem:[#allocation11 + $0xdb8] sm:$0xff] }
 0x458   :  { %5986 = vmatpush2.bf16.msra.mxu1 %v8885_v44  ;;  %v8828_v44 = vcombine.high %v5188_v39, %v5192_v40  ;;  %v8907_v39 = vcombine.low %v5268_v29, %v5272_v10 }
 0x459   :  { %6027 = vmatpush2.bf16.msra.mxu0 %v8887_v46  ;;  %5987 = vmatprep.subr.bf16.mxu1 %v8878_v47  ;;  %v5179_v46 = vld [vmem:[#allocation11 + $0x330] sm:$0xff] }
 0x45a   :  { %6028 = vmatprep.subr.bf16.mxu0 %v8880_v48  ;;  %v5183_v47 = vld [vmem:[#allocation11 + $0x3b0] sm:$0xff]  ;;  %v5180_v48 = vld [vmem:[#allocation11 + $0x338] sm:$0xff] }
 0x45b   :  { %v8818_v52 = vcombine.high %v5179_v46, %v5183_v47  ;;  %v8817_v55 = vcombine.low %v5179_v46, %v5183_v47  ;;  %v8819_v26 = vcombine.low %v5180_v48, %v5184_v19  ;;  %v5256_v46 = vld [vmem:[#allocation11 + $0xcb8] sm:$0xff] }
 0x45c   :  { %5988 = vmatpush2.bf16.msra.mxu1 %v8877_v53  ;;  %v8820_v53 = vcombine.high %v5180_v48, %v5184_v19 }
 0x45d   :  { %6029 = vmatpush2.bf16.msra.mxu0 %v8879_v8  ;;  %5989 = vmatprep.subr.bf16.mxu1 %v8870_v11  ;;  %v5171_v8 = vld [vmem:[#allocation11 + $0x230] sm:$0xff] }
 0x45e   :  { %6030 = vmatprep.subr.bf16.mxu0 %v8872_v14  ;;  %v5175_v11 = vld [vmem:[#allocation11 + $0x2b0] sm:$0xff]  ;;  %v5172_v14 = vld [vmem:[#allocation11 + $0x238] sm:$0xff] }
 0x45f   :  { %v8810_v56 = vcombine.high %v5171_v8, %v5175_v11  ;;  %v8809_v2 = vcombine.low %v5171_v8, %v5175_v11  ;;  %v8811_v5 = vcombine.low %v5172_v14, %v5176_v54  ;;  %v5248_v8 = vld [vmem:[#allocation11 + $0xbb8] sm:$0xff] }
 0x460   :  { %5990 = vmatpush2.bf16.msra.mxu1 %v8869_v59  ;;  %v8812_v59 = vcombine.high %v5172_v14, %v5176_v54 }
 0x461   :  { %6031 = vmatpush2.bf16.msra.mxu0 %v8871_v60  ;;  %5991 = vmatprep.subr.bf16.mxu1 %v8862_v61  ;;  %v5163_v60 = vld [vmem:[#allocation11 + $0x130] sm:$0xff] }
 0x462   :  { %6032 = vmatprep.subr.bf16.mxu0 %v8864_v62  ;;  %v5167_v61 = vld [vmem:[#allocation11 + $0x1b0] sm:$0xff]  ;;  %v5164_v62 = vld [vmem:[#allocation11 + $0x138] sm:$0xff] }
 0x463   :  { %v8802_v7 = vcombine.high %v5163_v60, %v5167_v61  ;;  %v8801_v16 = vcombine.low %v5163_v60, %v5167_v61  ;;  %v8803_v49 = vcombine.low %v5164_v62, %v5168_v1  ;;  %v5240_v60 = vld [vmem:[#allocation11 + $0xab8] sm:$0xff] }
 0x464   :  { %5992 = vmatpush2.bf16.msra.mxu1 %v8861_v9  ;;  %v8804_v9 = vcombine.high %v5164_v62, %v5168_v1 }
 0x465   :  { %6033 = vmatpush2.bf16.msra.mxu0 %v8863_v45  ;;  %5993 = vmatprep.subr.bf16.mxu1 %v8854_v12  ;;  %v5155_v45 = vld [vmem:[#allocation11 + $0x30] sm:$0xff] }
 0x466   :  { %6034 = vmatprep.subr.bf16.mxu0 %v8856_v13  ;;  %v5159_v12 = vld [vmem:[#allocation11 + $0xb0] sm:$0xff]  ;;  %v5156_v13 = vld [vmem:[#allocation11 + $0x38] sm:$0xff] }
 0x467   :  { %v8794_v17 = vcombine.high %v5155_v45, %v5159_v12  ;;  %v8793_v24 = vcombine.low %v5155_v45, %v5159_v12  ;;  %v5232_v45 = vld [vmem:[#allocation11 + $0x9b8] sm:$0xff] }
 0x468   :  { %5994 = vmatpush2.bf16.msra.mxu1 %v8853_v18  ;;  %v8796_v18 = vcombine.high %v5156_v13, %v5160_v15 }
 0x469   :  { %6035 = vmatpush2.bf16.msra.mxu0 %v8855_v20  ;;  %6045 = vmatprep.subr.bf16.mxu1 %v8850_v21  ;;  %v5275_v20 = vld [vmem:[#allocation11 + $0xf30] sm:$0xff] }
 0x46a   :  { %6086 = vmatprep.subr.bf16.mxu0 %v8852_v22  ;;  %v5279_v21 = vld [vmem:[#allocation11 + $0xfb0] sm:$0xff]  ;;  %v5276_v22 = vld [vmem:[#allocation11 + $0xf38] sm:$0xff] }
 0x46b   :  { %5996 = vmatmul.mubr.bf16.vlgmr.msra.gmra.mxu1 %v10303_v4  ;;  %v8914_v27 = vcombine.high %v5275_v20, %v5279_v21  ;;  %v8916_v6 = vcombine.high %v5276_v22, %v5280_v23  ;;  %v8915_v63 = vcombine.low %v5276_v22, %v5280_v23 }
 0x46c   :  { %6037 = vmatmul.mubr.bf16.vlgmr.msra.gmra.mxu0 %v10303_v4  ;;  %6046 = vmatpush1.bf16.msra.mxu1 %v8849_v58  ;;  %v8795_v58 = vcombine.low %v5156_v13, %v5160_v15 }
 0x46d   :  { %6077 = vmatprep.mubr.bf16.mxu1 %v10301_v3  ;;  %6087 = vmatpush1.bf16.msra.mxu0 %v8851_v28  ;;  %v5267_v28 = vld [vmem:[#allocation11 + $0xe30] sm:$0xff] }
 0x46e   :  { %6118 = vmatprep.mubr.bf16.mxu0 %v10301_v3  ;;  %6047 = vmatprep.subr.bf16.mxu1 %v8842_v57  ;;  %v5271_v57 = vld [vmem:[#allocation11 + $0xeb0] sm:$0xff] }
 0x46f   :  { %6088 = vmatprep.subr.bf16.mxu0 %v8844_v30  ;;  %v8913_v30 = vcombine.low %v5275_v20, %v5279_v21  ;;  %v8906_v31 = vcombine.high %v5267_v28, %v5271_v57  ;;  %v8905_v0 = vcombine.low %v5267_v28, %v5271_v57  ;;  %v5224_v20 = vld [vmem:[#allocation11 + $0x8b8] sm:$0xff]  ;;  %v6196_v28 = vld [vmem:[#allocation11 + $0x7c8] sm:$0xff] }
 0x470   :  { %6048 = vmatpush1.bf16.msra.mxu1 %v8841_v33  ;;  %v8908_v33 = vcombine.high %v5268_v29, %v5272_v10  ;;  %v10320_v29 = vsub.s32 2, %v10242_v25 }
 0x471   :  { %6089 = vmatpush1.bf16.msra.mxu0 %v8843_v34  ;;  %6049 = vmatprep.subr.bf16.mxu1 %v8834_v35  ;;  %v5259_v34 = vld [vmem:[#allocation11 + $0xd30] sm:$0xff] }
 0x472   :  { %6090 = vmatprep.subr.bf16.mxu0 %v8836_v36  ;;  %v5263_v35 = vld [vmem:[#allocation11 + $0xdb0] sm:$0xff]  ;;  %v5260_v36 = vld [vmem:[#allocation11 + $0xd38] sm:$0xff] }
 0x473   :  { %v8898_v40 = vcombine.high %v5259_v34, %v5263_v35  ;;  %v8897_v47 = vcombine.low %v5259_v34, %v5263_v35  ;;  %v8899_v48 = vcombine.low %v5260_v36, %v5264_v38  ;;  %v6183_v34 = vld [vmem:[#allocation11 + $0x640] sm:$0xff] }
 0x474   :  { %6050 = vmatpush1.bf16.msra.mxu1 %v8833_v41  ;;  %v8900_v41 = vcombine.high %v5260_v36, %v5264_v38  ;;  %v6187_v35 = vld [vmem:[#allocation11 + $0x6c0] sm:$0xff] }
 0x475   :  { %6091 = vmatpush1.bf16.msra.mxu0 %v8835_v42  ;;  %6051 = vmatprep.subr.bf16.mxu1 %v8826_v43  ;;  %v5251_v42 = vld [vmem:[#allocation11 + $0xc30] sm:$0xff] }
 0x476   :  { %6092 = vmatprep.subr.bf16.mxu0 %v8828_v44  ;;  %v5255_v43 = vld [vmem:[#allocation11 + $0xcb0] sm:$0xff]  ;;  %v5252_v44 = vld [vmem:[#allocation11 + $0xc38] sm:$0xff] }
 0x477   :  { %v8890_v19 = vcombine.high %v5251_v42, %v5255_v43  ;;  %v8889_v11 = vcombine.low %v5251_v42, %v5255_v43  ;;  %v8891_v14 = vcombine.low %v5252_v44, %v5256_v46 }
 0x478   :  { %6052 = vmatpush1.bf16.msra.mxu1 %v8825_v50  ;;  %v8892_v50 = vcombine.high %v5252_v44, %v5256_v46  ;;  %v8966_v44 = vcombine.high %v6183_v34, %v6187_v35  ;;  %v6175_v46 = vld [vmem:[#allocation11 + $0x540] sm:$0xff] }
 0x479   :  { %6093 = vmatpush1.bf16.msra.mxu0 %v8827_v51  ;;  %6053 = vmatprep.subr.bf16.mxu1 %v8818_v52  ;;  %v5243_v51 = vld [vmem:[#allocation11 + $0xb30] sm:$0xff] }
 0x47a   :  { %6094 = vmatprep.subr.bf16.mxu0 %v8820_v53  ;;  %v5247_v52 = vld [vmem:[#allocation11 + $0xbb0] sm:$0xff]  ;;  %v5244_v53 = vld [vmem:[#allocation11 + $0xb38] sm:$0xff] }
 0x47b   :  { %v8882_v54 = vcombine.high %v5243_v51, %v5247_v52  ;;  %v8881_v61 = vcombine.low %v5243_v51, %v5247_v52  ;;  %v8883_v62 = vcombine.low %v5244_v53, %v5248_v8  ;;  %v6176_v51 = vld [vmem:[#allocation11 + $0x548] sm:$0xff] }
 0x47c   :  { %6054 = vmatpush1.bf16.msra.mxu1 %v8817_v55  ;;  %v8884_v55 = vcombine.high %v5244_v53, %v5248_v8  ;;  %v6180_v52 = vld [vmem:[#allocation11 + $0x5c8] sm:$0xff] }
 0x47d   :  { %6095 = vmatpush1.bf16.msra.mxu0 %v8819_v26  ;;  %6055 = vmatprep.subr.bf16.mxu1 %v8810_v56  ;;  %v5235_v26 = vld [vmem:[#allocation11 + $0xa30] sm:$0xff] }
 0x47e   :  { %6096 = vmatprep.subr.bf16.mxu0 %v8812_v59  ;;  %v5239_v56 = vld [vmem:[#allocation11 + $0xab0] sm:$0xff]  ;;  %v5236_v59 = vld [vmem:[#allocation11 + $0xa38] sm:$0xff] }
 0x47f   :  { %v8874_v1 = vcombine.high %v5235_v26, %v5239_v56  ;;  %v8873_v12 = vcombine.low %v5235_v26, %v5239_v56  ;;  %v8875_v13 = vcombine.low %v5236_v59, %v5240_v60 }
 0x480   :  { %6056 = vmatpush1.bf16.msra.mxu1 %v8809_v2  ;;  %v8876_v2 = vcombine.high %v5236_v59, %v5240_v60  ;;  %v8960_v60 = vcombine.high %v6176_v51, %v6180_v52 }
 0x481   :  { %6097 = vmatpush1.bf16.msra.mxu0 %v8811_v5  ;;  %6057 = vmatprep.subr.bf16.mxu1 %v8802_v7  ;;  %v5227_v5 = vld [vmem:[#allocation11 + $0x930] sm:$0xff] }
 0x482   :  { %6098 = vmatprep.subr.bf16.mxu0 %v8804_v9  ;;  %v5231_v7 = vld [vmem:[#allocation11 + $0x9b0] sm:$0xff]  ;;  %v5228_v9 = vld [vmem:[#allocation11 + $0x938] sm:$0xff] }
 0x483   :  { %v8866_v15 = vcombine.high %v5227_v5, %v5231_v7  ;;  %v8865_v21 = vcombine.low %v5227_v5, %v5231_v7  ;;  %v8867_v22 = vcombine.low %v5228_v9, %v5232_v45  ;;  %v6168_v5 = vld [vmem:[#allocation11 + $0x448] sm:$0xff] }
 0x484   :  { %6058 = vmatpush1.bf16.msra.mxu1 %v8801_v16  ;;  %v8868_v16 = vcombine.high %v5228_v9, %v5232_v45  ;;  %v6172_v7 = vld [vmem:[#allocation11 + $0x4c8] sm:$0xff] }
 0x485   :  { %6099 = vmatpush1.bf16.msra.mxu0 %v8803_v49  ;;  %6059 = vmatprep.subr.bf16.mxu1 %v8794_v17  ;;  %v5219_v49 = vld [vmem:[#allocation11 + $0x830] sm:$0xff] }
 0x486   :  { %6100 = vmatprep.subr.bf16.mxu0 %v8796_v18  ;;  %v5223_v17 = vld [vmem:[#allocation11 + $0x8b0] sm:$0xff]  ;;  %v5220_v18 = vld [vmem:[#allocation11 + $0x838] sm:$0xff] }
 0x487   :  { %v8858_v23 = vcombine.high %v5219_v49, %v5223_v17  ;;  %v8857_v57 = vcombine.low %v5219_v49, %v5223_v17  ;;  %v8859_v10 = vcombine.low %v5220_v18, %v5224_v20  ;;  %v6159_v49 = vld [vmem:[#allocation11 + $0x340] sm:$0xff] }
 0x488   :  { %6060 = vmatpush1.bf16.msra.mxu1 %v8793_v24  ;;  %v8860_v24 = vcombine.high %v5220_v18, %v5224_v20  ;;  %v6163_v17 = vld [vmem:[#allocation11 + $0x3c0] sm:$0xff]  ;;  %v6160_v18 = vld [vmem:[#allocation11 + $0x348] sm:$0xff] }
 0x489   :  { %6101 = vmatpush1.bf16.msra.mxu0 %v8795_v58  ;;  %6061 = vmatprep.subr.bf16.mxu1 %v8914_v27  ;;  %v6191_v58 = vld [vmem:[#allocation11 + $0x740] sm:$0xff]  ;;  %v6164_v20 = vld [vmem:[#allocation11 + $0x3c8] sm:$0xff] }
 0x48a   :  { %6102 = vmatprep.subr.bf16.mxu0 %v8916_v6  ;;  %v6195_v27 = vld [vmem:[#allocation11 + $0x7c0] sm:$0xff]  ;;  %v6192_v6 = vld [vmem:[#allocation11 + $0x748] sm:$0xff] }
 0x48b   :  { %v8973_v36 = vcombine.low %v6191_v58, %v6195_v27 }
 0x48c   :  { %6062 = vmatpush2.bf16.msra.mxu1 %v8913_v30  ;;  %v8974_v30 = vcombine.high %v6191_v58, %v6195_v27  ;;  %v6151_v58 = vld [vmem:[#allocation11 + $0x240] sm:$0xff] }
 0x48d   :  { %6103 = vmatpush2.bf16.msra.mxu0 %v8915_v63  ;;  %6063 = vmatprep.subr.bf16.mxu1 %v8906_v31  ;;  %v10322_v63 = vld [vmem:[#allocation13] sm:$0xff]  ;;  %v8976_v31 = vcombine.high %v6192_v6, %v6196_v28 }
 0x48e   :  { %6104 = vmatprep.subr.bf16.mxu0 %v8908_v33  ;;  %v10325_v33 = vsub.s32 3, %v10242_v25  ;;  %v4304_v38 = vrot.slane %v10322_v63, %v10245_v32  ;;  %v4308_v42 = vrot.slane %v10322_v63, %v10248_v37  ;;  %v6155_v27 = vld [vmem:[#allocation11 + $0x2c0] sm:$0xff] }
 0x490   :  { %6064 = vmatpush2.bf16.msra.mxu1 %v8905_v0  ;;  %v4312_v0 = vrot.slane %v10322_v63, %v10320_v29  ;;  %v4316_v43 = vrot.slane %v10322_v63, %v10325_v33 }
 0x491   :  { %6105 = vmatpush2.bf16.msra.mxu0 %v8907_v39  ;;  %6065 = vmatprep.subr.bf16.mxu1 %v8898_v40  ;;  %v6184_v39 = vld [vmem:[#allocation11 + $0x648] sm:$0xff] }
 0x492   :  { %6106 = vmatprep.subr.bf16.mxu0 %v8900_v41  ;;  %v6188_v40 = vld [vmem:[#allocation11 + $0x6c8] sm:$0xff]  ;;  %v8975_v41 = vcombine.low %v6192_v6, %v6196_v28 }
 0x493   :  { %v6152_v6 = vld [vmem:[#allocation11 + $0x248] sm:$0xff] }
 0x494   :  { %6066 = vmatpush2.bf16.msra.mxu1 %v8897_v47  ;;  %v6179_v47 = vld [vmem:[#allocation11 + $0x5c0] sm:$0xff]  ;;  %v6156_v28 = vld [vmem:[#allocation11 + $0x2c8] sm:$0xff] }
 0x495   :  { %6107 = vmatpush2.bf16.msra.mxu0 %v8899_v48  ;;  %6067 = vmatprep.subr.bf16.mxu1 %v8890_v19  ;;  %v8958_v26 = vcombine.high %v6175_v46, %v6179_v47  ;;  %v8957_v9 = vcombine.low %v6175_v46, %v6179_v47  ;;  %v6140_v46 = vld [vmem:[#allocation11 + $0xc8] sm:$0xff] }
 0x496   :  { %6108 = vmatprep.subr.bf16.mxu0 %v8892_v50  ;;  %v8968_v50 = vcombine.high %v6184_v39, %v6188_v40 }
 0x498   :  { %6068 = vmatpush2.bf16.msra.mxu1 %v8889_v11  ;;  %v8965_v11 = vcombine.low %v6183_v34, %v6187_v35  ;;  %v6143_v34 = vld [vmem:[#allocation11 + $0x140] sm:$0xff] }
 0x499   :  { %6109 = vmatpush2.bf16.msra.mxu0 %v8891_v14  ;;  %6069 = vmatprep.subr.bf16.mxu1 %v8882_v54  ;;  %v6147_v35 = vld [vmem:[#allocation11 + $0x1c0] sm:$0xff] }
 0x49a   :  { %6110 = vmatprep.subr.bf16.mxu0 %v8884_v55  ;;  %v8967_v55 = vcombine.low %v6184_v39, %v6188_v40  ;;  %v8935_v39 = vcombine.low %v6152_v6, %v6156_v28  ;;  %v8926_v40 = vcombine.high %v6143_v34, %v6147_v35  ;;  %v8925_v47 = vcombine.low %v6143_v34, %v6147_v35  ;;  %v6215_v34 = vld [vmem:[#allocation11 + $0xa40] sm:$0xff] }
 0x49b   :  { %v6219_v35 = vld [vmem:[#allocation11 + $0xac0] sm:$0xff] }
 0x49c   :  { %6070 = vmatpush2.bf16.msra.mxu1 %v8881_v61  ;;  %v6167_v61 = vld [vmem:[#allocation11 + $0x440] sm:$0xff] }
 0x49d   :  { %6111 = vmatpush2.bf16.msra.mxu0 %v8883_v62  ;;  %6071 = vmatprep.subr.bf16.mxu1 %v8874_v1  ;;  %v6171_v62 = vld [vmem:[#allocation11 + $0x4c0] sm:$0xff] }
 0x49e   :  { %6112 = vmatprep.subr.bf16.mxu0 %v8876_v2 }
 0x4a0   :  { %6072 = vmatpush2.bf16.msra.mxu1 %v8873_v12 }
 0x4a1   :  { %6113 = vmatpush2.bf16.msra.mxu0 %v8875_v13  ;;  %6073 = vmatprep.subr.bf16.mxu1 %v8866_v15  ;;  %v8959_v13 = vcombine.low %v6176_v51, %v6180_v52  ;;  %v8950_v15 = vcombine.high %v6167_v61, %v6171_v62  ;;  %v6255_v51 = vld [vmem:[#allocation11 + $0xf40] sm:$0xff] }
 0x4a2   :  { %6114 = vmatprep.subr.bf16.mxu0 %v8868_v16  ;;  %v8952_v16 = vcombine.high %v6168_v5, %v6172_v7  ;;  %v6259_v52 = vld [vmem:[#allocation11 + $0xfc0] sm:$0xff] }
 0x4a4   :  { %6074 = vmatpush2.bf16.msra.mxu1 %v8865_v21  ;;  %v8949_v21 = vcombine.low %v6167_v61, %v6171_v62  ;;  %v9037_v61 = vcombine.low %v6255_v51, %v6259_v52 }
 0x4a5   :  { %6115 = vmatpush2.bf16.msra.mxu0 %v8867_v22  ;;  %6075 = vmatprep.subr.bf16.mxu1 %v8858_v23  ;;  %v8951_v22 = vcombine.low %v6168_v5, %v6172_v7  ;;  %v8942_v23 = vcombine.high %v6159_v49, %v6163_v17  ;;  %v6239_v5 = vld [vmem:[#allocation11 + $0xd40] sm:$0xff] }
 0x4a6   :  { %6116 = vmatprep.subr.bf16.mxu0 %v8860_v24  ;;  %v8944_v24 = vcombine.high %v6160_v18, %v6164_v20  ;;  %v6243_v7 = vld [vmem:[#allocation11 + $0xdc0] sm:$0xff] }
 0x4a8   :  { %6076 = vmatpush2.bf16.msra.mxu1 %v8857_v57  ;;  %v8941_v57 = vcombine.low %v6159_v49, %v6163_v17  ;;  %v6231_v49 = vld [vmem:[#allocation11 + $0xc40] sm:$0xff] }
 0x4a9   :  { %6117 = vmatpush2.bf16.msra.mxu0 %v8859_v10  ;;  %6945 = vmatprep.subr.bf16.mxu1 %v8974_v30  ;;  %v8943_v10 = vcombine.low %v6160_v18, %v6164_v20  ;;  %v8934_v30 = vcombine.high %v6151_v58, %v6155_v27  ;;  %v6235_v17 = vld [vmem:[#allocation11 + $0xcc0] sm:$0xff]  ;;  %v6232_v18 = vld [vmem:[#allocation11 + $0xc48] sm:$0xff] }
 0x4aa   :  { %6986 = vmatprep.subr.bf16.mxu0 %v8976_v31  ;;  %v8936_v31 = vcombine.high %v6152_v6, %v6156_v28  ;;  %v6236_v20 = vld [vmem:[#allocation11 + $0xcc8] sm:$0xff] }
 0x4ab   :  { %6078 = vmatmul.mubr.bf16.vlgmr.msra.gmra.mxu1 %v10303_v4  ;;  %v5015_v48 = vpop.f32.mrf.mxu1  ;;  %v5056_v19 = vpop.f32.mrf.mxu0  ;;  %v6224_v6 = vld [vmem:[#allocation11 + $0xb48] sm:$0xff] }
 0x4ac   :  { %6119 = vmatmul.mubr.bf16.vlgmr.msra.gmra.mxu0 %v10303_v4  ;;  %v5016_v53 = vadd.f32 %v5015_v48, %v4304_v38  ;;  %v5057_v8 = vadd.f32 %v5056_v19, %v4312_v0  ;;  %6946 = vmatpush1.bf16.msra.mxu1 %v8973_v36  ;;  %v6144_v36 = vld [vmem:[#allocation11 + $0x148] sm:$0xff]  ;;  %v8933_v0 = vcombine.low %v6151_v58, %v6155_v27  ;;  %v6223_v58 = vld [vmem:[#allocation11 + $0xb40] sm:$0xff] }
 0x4ad   :  { %6977 = vmatprep.mubr.bf16.mxu1 %v10301_v3  ;;  %6987 = vmatpush1.bf16.msra.mxu0 %v8975_v41  ;;  %v5017_v14 = vpop.f32.mrf.mxu1  ;;  %v5058_v54 = vpop.f32.mrf.mxu0  ;;  %v6148_v38 = vld [vmem:[#allocation11 + $0x1c8] sm:$0xff]  ;;  %v6227_v27 = vld [vmem:[#allocation11 + $0xbc0] sm:$0xff] }
 0x4ae   :  { %5145 = vst [vmem:[#allocation14] sm:$0xff] %v5016_v53  ;;  %5147 = vst [vmem:[#allocation14 + $0x10] sm:$0xff] %v5057_v8  ;;  %7018 = vmatprep.mubr.bf16.mxu0 %v10301_v3  ;;  %v5018_v56 = vadd.f32 %v5017_v14, %v4308_v42  ;;  %v5059_v59 = vadd.f32 %v5058_v54, %v4316_v43  ;;  %6947 = vmatprep.subr.bf16.mxu1 %v8966_v44  ;;  %v6135_v42 = vld [vmem:[#allocation11 + $0x40] sm:$0xff]  ;;  %v6136_v44 = vld [vmem:[#allocation11 + $0x48] sm:$0xff] }
 0x4af   :  { %6988 = vmatprep.subr.bf16.mxu0 %v8968_v50  ;;  %v5019_v1 = vpop.f32.mrf.mxu1  ;;  %v5060_v2 = vpop.f32.mrf.mxu0  ;;  %v8928_v41 = vcombine.high %v6144_v36, %v6148_v38  ;;  %v6139_v43 = vld [vmem:[#allocation11 + $0xc0] sm:$0xff]  ;;  %v8927_v48 = vcombine.low %v6144_v36, %v6148_v38  ;;  %v8920_v50 = vcombine.high %v6136_v44, %v6140_v46  ;;  %v6256_v53 = vld [vmem:[#allocation11 + $0xf48] sm:$0xff]  ;;  %v8919_v14 = vcombine.low %v6136_v44, %v6140_v46 }
 0x4b0   :  { %5146 = vst [vmem:[#allocation14 + $0x8] sm:$0xff] %v5018_v56  ;;  %5148 = vst [vmem:[#allocation14 + $0x18] sm:$0xff] %v5059_v59  ;;  %6948 = vmatpush1.bf16.msra.mxu1 %v8965_v11  ;;  %v8918_v19 = vcombine.high %v6135_v42, %v6139_v43  ;;  %v6260_v8 = vld [vmem:[#allocation11 + $0xfc8] sm:$0xff]  ;;  %v8917_v11 = vcombine.low %v6135_v42, %v6139_v43  ;;  %v9038_v54 = vcombine.high %v6255_v51, %v6259_v52  ;;  %v6251_v56 = vld [vmem:[#allocation11 + $0xec0] sm:$0xff] }
 0x4b1   :  { %6989 = vmatpush1.bf16.msra.mxu0 %v8967_v55  ;;  %v5020_v45 = vpop.f32.mrf.mxu1  ;;  %v5061_v12 = vpop.f32.mrf.mxu0  ;;  %6949 = vmatprep.subr.bf16.mxu1 %v8958_v26  ;;  %v9040_v55 = vcombine.high %v6256_v53, %v6260_v8  ;;  %v6247_v26 = vld [vmem:[#allocation11 + $0xe40] sm:$0xff]  ;;  %v6248_v59 = vld [vmem:[#allocation11 + $0xe48] sm:$0xff]  ;;  %v9039_v62 = vcombine.low %v6256_v53, %v6260_v8 }
 0x4b2   :  { %6990 = vmatprep.subr.bf16.mxu0 %v8960_v60  ;;  %v6252_v60 = vld [vmem:[#allocation11 + $0xec8] sm:$0xff]  ;;  %v9030_v1 = vcombine.high %v6247_v26, %v6251_v56  ;;  %v9029_v12 = vcombine.low %v6247_v26, %v6251_v56  ;;  %v6207_v42 = vld [vmem:[#allocation11 + $0x940] sm:$0xff]  ;;  %v6193_v26 = vld [vmem:[#allocation11 + $0x750] sm:$0xff] }
 0x4b3   :  { %v9032_v2 = vcombine.high %v6248_v59, %v6252_v60  ;;  %v6244_v45 = vld [vmem:[#allocation11 + $0xdc8] sm:$0xff]  ;;  %v6211_v43 = vld [vmem:[#allocation11 + $0x9c0] sm:$0xff]  ;;  %v6197_v56 = vld [vmem:[#allocation11 + $0x7d0] sm:$0xff] }
 0x4b4   :  { %6950 = vmatpush1.bf16.msra.mxu1 %v8957_v9  ;;  %v6240_v9 = vld [vmem:[#allocation11 + $0xd48] sm:$0xff]  ;;  %v6199_v51 = vld [vmem:[#allocation11 + $0x840] sm:$0xff] }
 0x4b5   :  { %6991 = vmatpush1.bf16.msra.mxu0 %v8959_v13  ;;  %6951 = vmatprep.subr.bf16.mxu1 %v8950_v15  ;;  %v9031_v13 = vcombine.low %v6248_v59, %v6252_v60  ;;  %v9022_v15 = vcombine.high %v6239_v5, %v6243_v7  ;;  %v6228_v28 = vld [vmem:[#allocation11 + $0xbc8] sm:$0xff]  ;;  %v6203_v52 = vld [vmem:[#allocation11 + $0x8c0] sm:$0xff]  ;;  %v6194_v59 = vld [vmem:[#allocation11 + $0x758] sm:$0xff] }
 0x4b6   :  { %6992 = vmatprep.subr.bf16.mxu0 %v8952_v16  ;;  %v9024_v16 = vcombine.high %v6240_v9, %v6244_v45  ;;  %v6216_v36 = vld [vmem:[#allocation11 + $0xa48] sm:$0xff]  ;;  %v6198_v60 = vld [vmem:[#allocation11 + $0x7d8] sm:$0xff] }
 0x4b7   :  { %v6220_v38 = vld [vmem:[#allocation11 + $0xac8] sm:$0xff] }
 0x4b8   :  { %6952 = vmatpush1.bf16.msra.mxu1 %v8949_v21  ;;  %v9021_v21 = vcombine.low %v6239_v5, %v6243_v7  ;;  %v6208_v44 = vld [vmem:[#allocation11 + $0x948] sm:$0xff]  ;;  %v8978_v5 = vcombine.high %v6193_v26, %v6197_v56  ;;  %v8980_v7 = vcombine.high %v6194_v59, %v6198_v60 }
 0x4b9   :  { %6993 = vmatpush1.bf16.msra.mxu0 %v8951_v22  ;;  %6953 = vmatprep.subr.bf16.mxu1 %v8942_v23  ;;  %v9023_v22 = vcombine.low %v6240_v9, %v6244_v45  ;;  %v9014_v23 = vcombine.high %v6231_v49, %v6235_v17  ;;  %v6212_v46 = vld [vmem:[#allocation11 + $0x9c8] sm:$0xff]  ;;  %v10346_v9 = vsub.s32 5, %v10242_v25  ;;  %v10349_v45 = vsub.s32 7, %v10242_v25 }
 0x4ba   :  { %6994 = vmatprep.subr.bf16.mxu0 %v8944_v24  ;;  %v9016_v24 = vcombine.high %v6232_v18, %v6236_v20  ;;  %v6200_v53 = vld [vmem:[#allocation11 + $0x848] sm:$0xff] }
 0x4bb   :  { %v6204_v8 = vld [vmem:[#allocation11 + $0x8c8] sm:$0xff] }
 0x4bc   :  { %6954 = vmatpush1.bf16.msra.mxu1 %v8941_v57  ;;  %v9013_v57 = vcombine.low %v6231_v49, %v6235_v17  ;;  %v8977_v49 = vcombine.low %v6193_v26, %v6197_v56  ;;  %v6186_v17 = vld [vmem:[#allocation11 + $0x658] sm:$0xff] }
 0x4bd   :  { %6995 = vmatpush1.bf16.msra.mxu0 %v8943_v10  ;;  %6955 = vmatprep.subr.bf16.mxu1 %v8934_v30  ;;  %v9015_v10 = vcombine.low %v6232_v18, %v6236_v20  ;;  %v9006_v30 = vcombine.high %v6223_v58, %v6227_v27  ;;  %v6190_v18 = vld [vmem:[#allocation11 + $0x6d8] sm:$0xff]  ;;  %v8979_v20 = vcombine.low %v6194_v59, %v6198_v60  ;;  %v6153_v59 = vld [vmem:[#allocation11 + $0x250] sm:$0xff] }
 0x4be   :  { %6996 = vmatprep.subr.bf16.mxu0 %v8936_v31  ;;  %v9008_v31 = vcombine.high %v6224_v6, %v6228_v28  ;;  %v6157_v60 = vld [vmem:[#allocation11 + $0x2d0] sm:$0xff] }
 0x4c0   :  { %6956 = vmatpush1.bf16.msra.mxu1 %v8933_v0  ;;  %v9005_v0 = vcombine.low %v6223_v58, %v6227_v27 }
 0x4c1   :  { %6997 = vmatpush1.bf16.msra.mxu0 %v8935_v39  ;;  %6957 = vmatprep.subr.bf16.mxu1 %v8926_v40  ;;  %v9007_v39 = vcombine.low %v6224_v6, %v6228_v28  ;;  %v8998_v40 = vcombine.high %v6215_v34, %v6219_v35  ;;  %v8972_v6 = vcombine.high %v6186_v17, %v6190_v18  ;;  %v6178_v28 = vld [vmem:[#allocation11 + $0x558] sm:$0xff] }
 0x4c2   :  { %6998 = vmatprep.subr.bf16.mxu0 %v8928_v41  ;;  %v9000_v41 = vcombine.high %v6216_v36, %v6220_v38 }
 0x4c4   :  { %6958 = vmatpush1.bf16.msra.mxu1 %v8925_v47  ;;  %v8997_v47 = vcombine.low %v6215_v34, %v6219_v35  ;;  %v8971_v35 = vcombine.low %v6186_v17, %v6190_v18  ;;  %v6150_v17 = vld [vmem:[#allocation11 + $0x1d8] sm:$0xff]  ;;  %v8937_v18 = vcombine.low %v6153_v59, %v6157_v60 }
 0x4c5   :  { %6999 = vmatpush1.bf16.msra.mxu0 %v8927_v48  ;;  %6959 = vmatprep.subr.bf16.mxu1 %v8918_v19  ;;  %v8999_v48 = vcombine.low %v6216_v36, %v6220_v38  ;;  %v8990_v19 = vcombine.high %v6207_v42, %v6211_v43 }
 0x4c6   :  { %7000 = vmatprep.subr.bf16.mxu0 %v8920_v50  ;;  %v8992_v50 = vcombine.high %v6208_v44, %v6212_v46 }
 0x4c8   :  { %6960 = vmatpush1.bf16.msra.mxu1 %v8917_v11  ;;  %v8989_v11 = vcombine.low %v6207_v42, %v6211_v43 }
 0x4c9   :  { %7001 = vmatpush1.bf16.msra.mxu0 %v8919_v14  ;;  %6961 = vmatprep.subr.bf16.mxu1 %v9038_v54  ;;  %v8991_v14 = vcombine.low %v6208_v44, %v6212_v46  ;;  %v8982_v54 = vcombine.high %v6199_v51, %v6203_v52  ;;  %v6170_v44 = vld [vmem:[#allocation11 + $0x458] sm:$0xff] }
 0x4ca   :  { %7002 = vmatprep.subr.bf16.mxu0 %v9040_v55  ;;  %v8984_v55 = vcombine.high %v6200_v53, %v6204_v8  ;;  %v6174_v46 = vld [vmem:[#allocation11 + $0x4d8] sm:$0xff] }
 0x4cc   :  { %6962 = vmatpush2.bf16.msra.mxu1 %v9037_v61  ;;  %v8981_v61 = vcombine.low %v6199_v51, %v6203_v52  ;;  %v8956_v52 = vcombine.high %v6170_v44, %v6174_v46 }
 0x4cd   :  { %7003 = vmatpush2.bf16.msra.mxu0 %v9039_v62  ;;  %6963 = vmatprep.subr.bf16.mxu1 %v9030_v1  ;;  %v10340_v62 = vsub.s32 4, %v10242_v25  ;;  %v10343_v1 = vsub.s32 6, %v10242_v25  ;;  %v4324_v25 = vrot.slane %v10322_v63, %v10346_v9 }
 0x4ce   :  { %7004 = vmatprep.subr.bf16.mxu0 %v9032_v2  ;;  %v8983_v2 = vcombine.low %v6200_v53, %v6204_v8  ;;  %v6161_v53 = vld [vmem:[#allocation11 + $0x350] sm:$0xff] }
 0x4cf   :  { %v6165_v8 = vld [vmem:[#allocation11 + $0x3d0] sm:$0xff] }
 0x4d0   :  { %6964 = vmatpush2.bf16.msra.mxu1 %v9029_v12  ;;  %v6185_v12 = vld [vmem:[#allocation11 + $0x650] sm:$0xff]  ;;  %v8946_v26 = vcombine.high %v6161_v53, %v6165_v8 }
 0x4d1   :  { %7005 = vmatpush2.bf16.msra.mxu0 %v9031_v13  ;;  %6965 = vmatprep.subr.bf16.mxu1 %v9022_v15  ;;  %v6189_v13 = vld [vmem:[#allocation11 + $0x6d0] sm:$0xff]  ;;  %v4320_v15 = vrot.slane %v10322_v63, %v10340_v62 }
 0x4d2   :  { %7006 = vmatprep.subr.bf16.mxu0 %v9024_v16  ;;  %v4328_v16 = vrot.slane %v10322_v63, %v10343_v1 }
 0x4d4   :  { %6966 = vmatpush2.bf16.msra.mxu1 %v9021_v21  ;;  %v4332_v21 = vrot.slane %v10322_v63, %v10349_v45 }
 0x4d5   :  { %7007 = vmatpush2.bf16.msra.mxu0 %v9023_v22  ;;  %6967 = vmatprep.subr.bf16.mxu1 %v9014_v23  ;;  %v8970_v22 = vcombine.high %v6185_v12, %v6189_v13  ;;  %v6177_v23 = vld [vmem:[#allocation11 + $0x550] sm:$0xff] }
 0x4d6   :  { %7008 = vmatprep.subr.bf16.mxu0 %v9016_v24  ;;  %v6181_v24 = vld [vmem:[#allocation11 + $0x5d0] sm:$0xff] }
 0x4d7   :  { %v8962_v36 = vcombine.high %v6177_v23, %v6181_v24 }
 0x4d8   :  { %6968 = vmatpush2.bf16.msra.mxu1 %v9013_v57  ;;  %v6182_v57 = vld [vmem:[#allocation11 + $0x5d8] sm:$0xff] }
 0x4d9   :  { %7009 = vmatpush2.bf16.msra.mxu0 %v9015_v10  ;;  %6969 = vmatprep.subr.bf16.mxu1 %v9006_v30 }
 0x4da   :  { %7010 = vmatprep.subr.bf16.mxu0 %v9008_v31  ;;  %v8969_v31 = vcombine.low %v6185_v12, %v6189_v13  ;;  %v8938_v12 = vcombine.high %v6153_v59, %v6157_v60 }
 0x4dc   :  { %6970 = vmatpush2.bf16.msra.mxu1 %v9005_v0 }
 0x4dd   :  { %7011 = vmatpush2.bf16.msra.mxu0 %v9007_v39  ;;  %6971 = vmatprep.subr.bf16.mxu1 %v8998_v40  ;;  %v8964_v39 = vcombine.high %v6178_v28, %v6182_v57  ;;  %v6169_v40 = vld [vmem:[#allocation11 + $0x450] sm:$0xff] }
 0x4de   :  { %7012 = vmatprep.subr.bf16.mxu0 %v9000_v41  ;;  %v6173_v41 = vld [vmem:[#allocation11 + $0x4d0] sm:$0xff] }
 0x4df   :  { %v8954_v51 = vcombine.high %v6169_v40, %v6173_v41 }
 0x4e0   :  { %6972 = vmatpush2.bf16.msra.mxu1 %v8997_v47  ;;  %v8961_v47 = vcombine.low %v6177_v23, %v6181_v24  ;;  %v6141_v23 = vld [vmem:[#allocation11 + $0xd0] sm:$0xff]  ;;  %v6138_v24 = vld [vmem:[#allocation11 + $0x58] sm:$0xff] }
 0x4e1   :  { %7013 = vmatpush2.bf16.msra.mxu0 %v8999_v48  ;;  %6973 = vmatprep.subr.bf16.mxu1 %v8990_v19 }
 0x4e2   :  { %7014 = vmatprep.subr.bf16.mxu0 %v8992_v50  ;;  %v8963_v50 = vcombine.low %v6178_v28, %v6182_v57 }
 0x4e4   :  { %6974 = vmatpush2.bf16.msra.mxu1 %v8989_v11  ;;  %v6162_v11 = vld [vmem:[#allocation11 + $0x358] sm:$0xff] }
 0x4e5   :  { %7015 = vmatpush2.bf16.msra.mxu0 %v8991_v14  ;;  %6975 = vmatprep.subr.bf16.mxu1 %v8982_v54  ;;  %v6166_v14 = vld [vmem:[#allocation11 + $0x3d8] sm:$0xff]  ;;  %v8953_v54 = vcombine.low %v6169_v40, %v6173_v41 }
 0x4e6   :  { %7016 = vmatprep.subr.bf16.mxu0 %v8984_v55  ;;  %v8955_v55 = vcombine.low %v6170_v44, %v6174_v46  ;;  %v8948_v56 = vcombine.high %v6162_v11, %v6166_v14  ;;  %v6250_v40 = vld [vmem:[#allocation11 + $0xe58] sm:$0xff] }
 0x4e7   :  { %v6254_v41 = vld [vmem:[#allocation11 + $0xed8] sm:$0xff] }
 0x4e8   :  { %6976 = vmatpush2.bf16.msra.mxu1 %v8981_v61  ;;  %v6154_v61 = vld [vmem:[#allocation11 + $0x258] sm:$0xff]  ;;  %v9036_v46 = vcombine.high %v6250_v40, %v6254_v41 }
 0x4e9   :  { %7017 = vmatpush2.bf16.msra.mxu0 %v8983_v2  ;;  %7027 = vmatprep.subr.bf16.mxu1 %v8978_v5  ;;  %v6158_v2 = vld [vmem:[#allocation11 + $0x2d8] sm:$0xff]  ;;  %v8945_v5 = vcombine.low %v6161_v53, %v6165_v8 }
 0x4ea   :  { %7068 = vmatprep.subr.bf16.mxu0 %v8980_v7  ;;  %v8947_v7 = vcombine.low %v6162_v11, %v6166_v14  ;;  %v8940_v13 = vcombine.high %v6154_v61, %v6158_v2  ;;  %v6233_v11 = vld [vmem:[#allocation11 + $0xc50] sm:$0xff] }
 0x4eb   :  { %v5097_v58 = vpop.f32.mrf.mxu1  ;;  %v5138_v27 = vpop.f32.mrf.mxu0  ;;  %6978 = vmatmul.mubr.bf16.vlgmr.msra.gmra.mxu1 %v10303_v4  ;;  %v6237_v14 = vld [vmem:[#allocation11 + $0xcd0] sm:$0xff] }
 0x4ec   :  { %v5098_v10 = vadd.f32 %v5097_v58, %v4320_v15  ;;  %v5139_v30 = vadd.f32 %v5138_v27, %v4328_v16  ;;  %7019 = vmatmul.mubr.bf16.vlgmr.msra.gmra.mxu0 %v10303_v4  ;;  %7028 = vmatpush1.bf16.msra.mxu1 %v8977_v49  ;;  %v6145_v15 = vld [vmem:[#allocation11 + $0x150] sm:$0xff]  ;;  %v6146_v49 = vld [vmem:[#allocation11 + $0x158] sm:$0xff]  ;;  %v9018_v59 = vcombine.high %v6233_v11, %v6237_v14 }
 0x4ed   :  { %7059 = vmatprep.mubr.bf16.mxu1 %v10301_v3  ;;  %7069 = vmatpush1.bf16.msra.mxu0 %v8979_v20  ;;  %v5099_v63 = vpop.f32.mrf.mxu1  ;;  %v5140_v34 = vpop.f32.mrf.mxu0  ;;  %v6149_v16 = vld [vmem:[#allocation11 + $0x1d0] sm:$0xff]  ;;  %v8939_v20 = vcombine.low %v6154_v61, %v6158_v2  ;;  %v6142_v58 = vld [vmem:[#allocation11 + $0xd8] sm:$0xff] }
 0x4ee   :  { %5149 = vst [vmem:[#allocation14 + $0x20] sm:$0xff] %v5098_v10  ;;  %5151 = vst [vmem:[#allocation14 + $0x30] sm:$0xff] %v5139_v30  ;;  %7100 = vmatprep.mubr.bf16.mxu0 %v10301_v3  ;;  %v5100_v38 = vadd.f32 %v5099_v63, %v4324_v25  ;;  %v5141_v0 = vadd.f32 %v5140_v34, %v4332_v21  ;;  %7029 = vmatprep.subr.bf16.mxu1 %v8970_v22  ;;  %v6137_v22 = vld [vmem:[#allocation11 + $0x50] sm:$0xff]  ;;  %v6262_v63 = vld [vmem:[#allocation11 + $0xfd8] sm:$0xff] }
 0x4ef   :  { %v5101_v42 = vpop.f32.mrf.mxu1  ;;  %v5142_v43 = vpop.f32.mrf.mxu0  ;;  %7070 = vmatprep.subr.bf16.mxu0 %v8972_v6  ;;  %v8930_v25 = vcombine.high %v6145_v15, %v6149_v16  ;;  %v8932_v21 = vcombine.high %v6146_v49, %v6150_v17  ;;  %v8929_v27 = vcombine.low %v6145_v15, %v6149_v16  ;;  %v8931_v6 = vcombine.low %v6146_v49, %v6150_v17  ;;  %v6257_v10 = vld [vmem:[#allocation11 + $0xf50] sm:$0xff] }
 0x4f0   :  { %5150 = vst [vmem:[#allocation14 + $0x28] sm:$0xff] %v5100_v38  ;;  %5152 = vst [vmem:[#allocation14 + $0x38] sm:$0xff] %v5141_v0  ;;  %7030 = vmatpush1.bf16.msra.mxu1 %v8969_v31  ;;  %v8922_v28 = vcombine.high %v6137_v22, %v6141_v23  ;;  %v8924_v57 = vcombine.high %v6138_v24, %v6142_v58  ;;  %v6261_v30 = vld [vmem:[#allocation11 + $0xfd0] sm:$0xff]  ;;  %v6258_v31 = vld [vmem:[#allocation11 + $0xf58] sm:$0xff]  ;;  %v8921_v34 = vcombine.low %v6137_v22, %v6141_v23 }
 0x4f1   :  { %7071 = vmatpush1.bf16.msra.mxu0 %v8971_v35  ;;  %v5102_v48 = vpop.f32.mrf.mxu1  ;;  %v5143_v19 = vpop.f32.mrf.mxu0  ;;  %7031 = vmatprep.subr.bf16.mxu1 %v8962_v36  ;;  %v8923_v35 = vcombine.low %v6138_v24, %v6142_v58  ;;  %v9042_v36 = vcombine.high %v6257_v10, %v6261_v30  ;;  %v9044_v38 = vcombine.high %v6258_v31, %v6262_v63  ;;  %v6249_v0 = vld [vmem:[#allocation11 + $0xe50] sm:$0xff] }
 0x4f2   :  { %7072 = vmatprep.subr.bf16.mxu0 %v8964_v39  ;;  %v6253_v39 = vld [vmem:[#allocation11 + $0xed0] sm:$0xff]  ;;  %v9041_v42 = vcombine.low %v6257_v10, %v6261_v30  ;;  %v9043_v43 = vcombine.low %v6258_v31, %v6262_v63  ;;  %v6242_v19 = vld [vmem:[#allocation11 + $0xd58] sm:$0xff] }
 0x4f3   :  { %v9034_v44 = vcombine.high %v6249_v0, %v6253_v39  ;;  %v6245_v48 = vld [vmem:[#allocation11 + $0xdd0] sm:$0xff] }
 0x4f4   :  { %7032 = vmatpush1.bf16.msra.mxu1 %v8961_v47  ;;  %v6241_v47 = vld [vmem:[#allocation11 + $0xd50] sm:$0xff] }
 0x4f5   :  { %7073 = vmatpush1.bf16.msra.mxu0 %v8963_v50  ;;  %7033 = vmatprep.subr.bf16.mxu1 %v8954_v51  ;;  %v6246_v50 = vld [vmem:[#allocation11 + $0xdd8] sm:$0xff]  ;;  %v9033_v51 = vcombine.low %v6249_v0, %v6253_v39  ;;  %v9026_v53 = vcombine.high %v6241_v47, %v6245_v48  ;;  %v6225_v61 = vld [vmem:[#allocation11 + $0xb50] sm:$0xff] }
 0x4f6   :  { %7074 = vmatprep.subr.bf16.mxu0 %v8956_v52  ;;  %v9035_v52 = vcombine.low %v6250_v40, %v6254_v41  ;;  %v9028_v8 = vcombine.high %v6242_v19, %v6246_v50  ;;  %v6229_v2 = vld [vmem:[#allocation11 + $0xbd0] sm:$0xff]  ;;  %v7173_v40 = vld [vmem:[#allocation11 + $0x760] sm:$0xff] }
 0x4f7   :  { %v9010_v15 = vcombine.high %v6225_v61, %v6229_v2  ;;  %v6217_v49 = vld [vmem:[#allocation11 + $0xa50] sm:$0xff]  ;;  %v7177_v41 = vld [vmem:[#allocation11 + $0x7e0] sm:$0xff] }
 0x4f8   :  { %7034 = vmatpush1.bf16.msra.mxu1 %v8953_v54  ;;  %v6234_v54 = vld [vmem:[#allocation11 + $0xc58] sm:$0xff]  ;;  %v6221_v17 = vld [vmem:[#allocation11 + $0xad0] sm:$0xff] }
 0x4f9   :  { %7075 = vmatpush1.bf16.msra.mxu0 %v8955_v55  ;;  %7035 = vmatprep.subr.bf16.mxu1 %v8946_v26  ;;  %v6238_v55 = vld [vmem:[#allocation11 + $0xcd8] sm:$0xff]  ;;  %v9025_v26 = vcombine.low %v6241_v47, %v6245_v48  ;;  %v9002_v22 = vcombine.high %v6217_v49, %v6221_v17  ;;  %v6209_v24 = vld [vmem:[#allocation11 + $0x950] sm:$0xff]  ;;  %v10363_v47 = vld [vmem:[#allocation13 + $0x8] sm:$0xff]  ;;  %v9102_v48 = vcombine.high %v7173_v40, %v7177_v41 }
 0x4fa   :  { %7076 = vmatprep.subr.bf16.mxu0 %v8948_v56  ;;  %v9027_v56 = vcombine.low %v6242_v19, %v6246_v50  ;;  %v9020_v60 = vcombine.high %v6234_v54, %v6238_v55  ;;  %v6213_v58 = vld [vmem:[#allocation11 + $0x9d0] sm:$0xff]  ;;  %v7165_v50 = vld [vmem:[#allocation11 + $0x660] sm:$0xff] }
 0x4fb   :  { %v8994_v10 = vcombine.high %v6209_v24, %v6213_v58  ;;  %v6201_v31 = vld [vmem:[#allocation11 + $0x850] sm:$0xff] }
 0x4fc   :  { %7036 = vmatpush1.bf16.msra.mxu1 %v8945_v5  ;;  %v6226_v5 = vld [vmem:[#allocation11 + $0xb58] sm:$0xff]  ;;  %v6205_v63 = vld [vmem:[#allocation11 + $0x8d0] sm:$0xff] }
 0x4fd   :  { %7077 = vmatpush1.bf16.msra.mxu0 %v8947_v7  ;;  %7037 = vmatprep.subr.bf16.mxu1 %v8938_v12  ;;  %v6230_v7 = vld [vmem:[#allocation11 + $0xbd8] sm:$0xff]  ;;  %v9017_v12 = vcombine.low %v6233_v11, %v6237_v14  ;;  %v8986_v0 = vcombine.high %v6201_v31, %v6205_v63  ;;  %v7170_v11 = vld [vmem:[#allocation11 + $0x6e8] sm:$0xff]  ;;  %v5294_v14 = vrot.slane %v10363_v47, %v10320_v29 }
 0x4fe   :  { %7078 = vmatprep.subr.bf16.mxu0 %v8940_v13  ;;  %v9019_v13 = vcombine.low %v6234_v54, %v6238_v55  ;;  %v9012_v16 = vcombine.high %v6226_v5, %v6230_v7  ;;  %v5290_v55 = vrot.slane %v10363_v47, %v10248_v37 }
 0x500   :  { %7038 = vmatpush1.bf16.msra.mxu1 %v8937_v18  ;;  %v6218_v18 = vld [vmem:[#allocation11 + $0xa58] sm:$0xff] }
 0x501   :  { %7079 = vmatpush1.bf16.msra.mxu0 %v8939_v20  ;;  %7039 = vmatprep.subr.bf16.mxu1 %v8930_v25  ;;  %v6222_v20 = vld [vmem:[#allocation11 + $0xad8] sm:$0xff]  ;;  %v9009_v25 = vcombine.low %v6225_v61, %v6229_v2  ;;  %v5298_v61 = vrot.slane %v10363_v47, %v10325_v33 }
 0x502   :  { %7080 = vmatprep.subr.bf16.mxu0 %v8932_v21  ;;  %v9011_v21 = vcombine.low %v6226_v5, %v6230_v7  ;;  %v9004_v23 = vcombine.high %v6218_v18, %v6222_v20  ;;  %v7158_v5 = vld [vmem:[#allocation11 + $0x568] sm:$0xff] }
 0x503   :  { %v7162_v7 = vld [vmem:[#allocation11 + $0x5e8] sm:$0xff] }
 0x504   :  { %7040 = vmatpush1.bf16.msra.mxu1 %v8929_v27  ;;  %v6210_v27 = vld [vmem:[#allocation11 + $0x958] sm:$0xff] }
 0x505   :  { %7081 = vmatpush1.bf16.msra.mxu0 %v8931_v6  ;;  %7041 = vmatprep.subr.bf16.mxu1 %v8922_v28  ;;  %v6214_v6 = vld [vmem:[#allocation11 + $0x9d8] sm:$0xff]  ;;  %v9001_v28 = vcombine.low %v6217_v49, %v6221_v17 }
 0x506   :  { %7082 = vmatprep.subr.bf16.mxu0 %v8924_v57  ;;  %v9003_v57 = vcombine.low %v6218_v18, %v6222_v20  ;;  %v8996_v30 = vcombine.high %v6210_v27, %v6214_v6 }
 0x508   :  { %7042 = vmatpush1.bf16.msra.mxu1 %v8921_v34  ;;  %v6202_v34 = vld [vmem:[#allocation11 + $0x858] sm:$0xff] }
 0x509   :  { %7083 = vmatpush1.bf16.msra.mxu0 %v8923_v35  ;;  %7043 = vmatprep.subr.bf16.mxu1 %v9042_v36  ;;  %v6206_v35 = vld [vmem:[#allocation11 + $0x8d8] sm:$0xff]  ;;  %v8993_v36 = vcombine.low %v6209_v24, %v6213_v58 }
 0x50a   :  { %7084 = vmatprep.subr.bf16.mxu0 %v9044_v38  ;;  %v8995_v38 = vcombine.low %v6210_v27, %v6214_v6  ;;  %v8988_v39 = vcombine.high %v6202_v34, %v6206_v35  ;;  %v7150_v27 = vld [vmem:[#allocation11 + $0x468] sm:$0xff] }
 0x50b   :  { %v7154_v6 = vld [vmem:[#allocation11 + $0x4e8] sm:$0xff] }
 0x50c   :  { %7044 = vmatpush2.bf16.msra.mxu1 %v9041_v42  ;;  %v7174_v42 = vld [vmem:[#allocation11 + $0x768] sm:$0xff] }
 0x50d   :  { %7085 = vmatpush2.bf16.msra.mxu0 %v9043_v43  ;;  %7045 = vmatprep.subr.bf16.mxu1 %v9034_v44  ;;  %v7178_v43 = vld [vmem:[#allocation11 + $0x7e8] sm:$0xff]  ;;  %v8985_v44 = vcombine.low %v6201_v31, %v6205_v63 }
 0x50e   :  { %7086 = vmatprep.subr.bf16.mxu0 %v9036_v46  ;;  %v8987_v46 = vcombine.low %v6202_v34, %v6206_v35  ;;  %v9104_v19 = vcombine.high %v7174_v42, %v7178_v43  ;;  %v9103_v54 = vcombine.low %v7174_v42, %v7178_v43  ;;  %v9080_v34 = vcombine.high %v7150_v27, %v7154_v6  ;;  %v7141_v35 = vld [vmem:[#allocation11 + $0x360] sm:$0xff] }
 0x50f   :  { %v7133_v43 = vld [vmem:[#allocation11 + $0x260] sm:$0xff] }
 0x510   :  { %7046 = vmatpush2.bf16.msra.mxu1 %v9033_v51  ;;  %v7169_v51 = vld [vmem:[#allocation11 + $0x6e0] sm:$0xff] }
 0x511   :  { %7087 = vmatpush2.bf16.msra.mxu0 %v9035_v52  ;;  %7047 = vmatprep.subr.bf16.mxu1 %v9026_v53  ;;  %v5286_v52 = vrot.slane %v10363_v47, %v10245_v32  ;;  %v9101_v53 = vcombine.low %v7173_v40, %v7177_v41  ;;  %v9079_v40 = vcombine.low %v7150_v27, %v7154_v6 }
 0x512   :  { %7088 = vmatprep.subr.bf16.mxu0 %v9028_v8  ;;  %v7166_v8 = vld [vmem:[#allocation11 + $0x668] sm:$0xff] }
 0x513   :  { %v9096_v2 = vcombine.high %v7166_v8, %v7170_v11  ;;  %v9095_v17 = vcombine.low %v7166_v8, %v7170_v11  ;;  %v7129_v8 = vld [vmem:[#allocation11 + $0x1e0] sm:$0xff]  ;;  %v7126_v11 = vld [vmem:[#allocation11 + $0x168] sm:$0xff] }
 0x514   :  { %7048 = vmatpush2.bf16.msra.mxu1 %v9025_v26  ;;  %v9094_v26 = vcombine.high %v7165_v50, %v7169_v51 }
 0x515   :  { %7089 = vmatpush2.bf16.msra.mxu0 %v9027_v56  ;;  %7049 = vmatprep.subr.bf16.mxu1 %v9018_v59  ;;  %v7157_v56 = vld [vmem:[#allocation11 + $0x560] sm:$0xff] }
 0x516   :  { %7090 = vmatprep.subr.bf16.mxu0 %v9020_v60  ;;  %v7161_v59 = vld [vmem:[#allocation11 + $0x5e0] sm:$0xff] }
 0x517   :  { %v9086_v18 = vcombine.high %v7157_v56, %v7161_v59 }
 0x518   :  { %7050 = vmatpush2.bf16.msra.mxu1 %v9017_v12 }
 0x519   :  { %7091 = vmatpush2.bf16.msra.mxu0 %v9019_v13  ;;  %7051 = vmatprep.subr.bf16.mxu1 %v9010_v15  ;;  %v9093_v15 = vcombine.low %v7165_v50, %v7169_v51 }
 0x51a   :  { %7092 = vmatprep.subr.bf16.mxu0 %v9012_v16 }
 0x51c   :  { %7052 = vmatpush2.bf16.msra.mxu1 %v9009_v25 }
 0x51d   :  { %7093 = vmatpush2.bf16.msra.mxu0 %v9011_v21  ;;  %7053 = vmatprep.subr.bf16.mxu1 %v9002_v22  ;;  %v9088_v21 = vcombine.high %v7158_v5, %v7162_v7  ;;  %v7149_v22 = vld [vmem:[#allocation11 + $0x460] sm:$0xff] }
 0x51e   :  { %7094 = vmatprep.subr.bf16.mxu0 %v9004_v23  ;;  %v7153_v23 = vld [vmem:[#allocation11 + $0x4e0] sm:$0xff] }
 0x51f   :  { %v9078_v31 = vcombine.high %v7149_v22, %v7153_v23 }
 0x520   :  { %7054 = vmatpush2.bf16.msra.mxu1 %v9001_v28 }
 0x521   :  { %7095 = vmatpush2.bf16.msra.mxu0 %v9003_v57  ;;  %7055 = vmatprep.subr.bf16.mxu1 %v8994_v10  ;;  %v9085_v57 = vcombine.low %v7157_v56, %v7161_v59  ;;  %v7117_v59 = vld [vmem:[#allocation11 + $0x60] sm:$0xff] }
 0x522   :  { %7096 = vmatprep.subr.bf16.mxu0 %v8996_v30  ;;  %v9087_v30 = vcombine.low %v7158_v5, %v7162_v7 }
 0x524   :  { %7056 = vmatpush2.bf16.msra.mxu1 %v8993_v36  ;;  %v7145_v36 = vld [vmem:[#allocation11 + $0x3e0] sm:$0xff] }
 0x525   :  { %7097 = vmatpush2.bf16.msra.mxu0 %v8995_v38  ;;  %7057 = vmatprep.subr.bf16.mxu1 %v8986_v0  ;;  %v7142_v38 = vld [vmem:[#allocation11 + $0x368] sm:$0xff]  ;;  %v9070_v41 = vcombine.high %v7141_v35, %v7145_v36 }
 0x526   :  { %7098 = vmatprep.subr.bf16.mxu0 %v8988_v39  ;;  %v7146_v0 = vld [vmem:[#allocation11 + $0x3e8] sm:$0xff]  ;;  %v9077_v39 = vcombine.low %v7149_v22, %v7153_v23  ;;  %v7229_v22 = vld [vmem:[#allocation11 + $0xe60] sm:$0xff] }
 0x527   :  { %v9072_v42 = vcombine.high %v7142_v38, %v7146_v0  ;;  %v9071_v50 = vcombine.low %v7142_v38, %v7146_v0  ;;  %v7233_v23 = vld [vmem:[#allocation11 + $0xee0] sm:$0xff] }
 0x528   :  { %7058 = vmatpush2.bf16.msra.mxu1 %v8985_v44  ;;  %v7137_v44 = vld [vmem:[#allocation11 + $0x2e0] sm:$0xff] }
 0x529   :  { %7099 = vmatpush2.bf16.msra.mxu0 %v8987_v46  ;;  %7927 = vmatprep.subr.bf16.mxu1 %v9102_v48  ;;  %v7134_v46 = vld [vmem:[#allocation11 + $0x268] sm:$0xff]  ;;  %v9062_v51 = vcombine.high %v7133_v43, %v7137_v44  ;;  %v7213_v0 = vld [vmem:[#allocation11 + $0xc60] sm:$0xff] }
 0x52a   :  { %7968 = vmatprep.subr.bf16.mxu0 %v9104_v19  ;;  %v7138_v48 = vld [vmem:[#allocation11 + $0x2e8] sm:$0xff]  ;;  %v9069_v19 = vcombine.low %v7141_v35, %v7145_v36 }
 0x52b   :  { %v5997_v60 = vpop.f32.mrf.mxu1  ;;  %7060 = vmatmul.mubr.bf16.vlgmr.msra.gmra.mxu1 %v10303_v4 }
 0x52c   :  { %v5998_v12 = vadd.f32 %v5997_v60, %v5286_v52  ;;  %v6038_v13 = vpop.f32.mrf.mxu0  ;;  %7101 = vmatmul.mubr.bf16.vlgmr.msra.gmra.mxu0 %v10303_v4  ;;  %7928 = vmatpush1.bf16.msra.mxu1 %v9101_v53  ;;  %v9064_v52 = vcombine.high %v7134_v46, %v7138_v48  ;;  %v7125_v53 = vld [vmem:[#allocation11 + $0x160] sm:$0xff] }
 0x52d   :  { %v6039_v16 = vadd.f32 %v6038_v13, %v5294_v14  ;;  %7959 = vmatprep.mubr.bf16.mxu1 %v10301_v3  ;;  %7969 = vmatpush1.bf16.msra.mxu0 %v9103_v54  ;;  %v5999_v49 = vpop.f32.mrf.mxu1  ;;  %v7130_v14 = vld [vmem:[#allocation11 + $0x1e8] sm:$0xff]  ;;  %v9061_v54 = vcombine.low %v7133_v43, %v7137_v44  ;;  %v7121_v60 = vld [vmem:[#allocation11 + $0xe0] sm:$0xff]  ;;  %v9053_v5 = vcombine.low %v7125_v53, %v7129_v8 }
 0x52e   :  { %6127 = vst [vmem:[#allocation14 + $0x40] sm:$0xff] %v5998_v12  ;;  %8000 = vmatprep.mubr.bf16.mxu0 %v10301_v3  ;;  %v6000_v20 = vadd.f32 %v5999_v49, %v5290_v55  ;;  %v6040_v25 = vpop.f32.mrf.mxu0  ;;  %7929 = vmatprep.subr.bf16.mxu1 %v9094_v26  ;;  %v9063_v55 = vcombine.low %v7134_v46, %v7138_v48  ;;  %v7238_v49 = vld [vmem:[#allocation11 + $0xf68] sm:$0xff]  ;;  %v7205_v48 = vld [vmem:[#allocation11 + $0xb60] sm:$0xff] }
 0x52f   :  { %6129 = vst [vmem:[#allocation14 + $0x50] sm:$0xff] %v6039_v16  ;;  %v6041_v24 = vadd.f32 %v6040_v25, %v5298_v61  ;;  %v6001_v58 = vpop.f32.mrf.mxu1  ;;  %7970 = vmatprep.subr.bf16.mxu0 %v9096_v2  ;;  %v9054_v26 = vcombine.high %v7125_v53, %v7129_v8  ;;  %v9056_v56 = vcombine.high %v7126_v11, %v7130_v14  ;;  %v7118_v61 = vld [vmem:[#allocation11 + $0x68] sm:$0xff]  ;;  %v7241_v16 = vld [vmem:[#allocation11 + $0xfe0] sm:$0xff] }
 0x530   :  { %6128 = vst [vmem:[#allocation14 + $0x48] sm:$0xff] %v6000_v20  ;;  %v6042_v28 = vpop.f32.mrf.mxu0  ;;  %7930 = vmatpush1.bf16.msra.mxu1 %v9093_v15  ;;  %v7122_v2 = vld [vmem:[#allocation11 + $0xe8] sm:$0xff]  ;;  %v9055_v7 = vcombine.low %v7126_v11, %v7130_v14  ;;  %v9046_v12 = vcombine.high %v7117_v59, %v7121_v60  ;;  %v7237_v15 = vld [vmem:[#allocation11 + $0xf60] sm:$0xff] }
 0x531   :  { %6130 = vst [vmem:[#allocation14 + $0x58] sm:$0xff] %v6041_v24  ;;  %7971 = vmatpush1.bf16.msra.mxu0 %v9095_v17  ;;  %v6002_v10 = vpop.f32.mrf.mxu1  ;;  %7931 = vmatprep.subr.bf16.mxu1 %v9086_v18  ;;  %v9048_v13 = vcombine.high %v7118_v61, %v7122_v2  ;;  %v7242_v17 = vld [vmem:[#allocation11 + $0xfe8] sm:$0xff]  ;;  %v9045_v18 = vcombine.low %v7117_v59, %v7121_v60  ;;  %v7197_v14 = vld [vmem:[#allocation11 + $0xa60] sm:$0xff] }
 0x532   :  { %v6043_v63 = vpop.f32.mrf.mxu0  ;;  %7972 = vmatprep.subr.bf16.mxu0 %v9088_v21  ;;  %v9047_v20 = vcombine.low %v7118_v61, %v7122_v2  ;;  %v9166_v25 = vcombine.high %v7237_v15, %v7241_v16  ;;  %v9168_v21 = vcombine.high %v7238_v49, %v7242_v17  ;;  %v7230_v24 = vld [vmem:[#allocation11 + $0xe68] sm:$0xff]  ;;  %v9165_v27 = vcombine.low %v7237_v15, %v7241_v16  ;;  %v7221_v10 = vld [vmem:[#allocation11 + $0xd60] sm:$0xff] }
 0x533   :  { %v7234_v58 = vld [vmem:[#allocation11 + $0xee8] sm:$0xff]  ;;  %v9167_v6 = vcombine.low %v7238_v49, %v7242_v17  ;;  %v9158_v28 = vcombine.high %v7229_v22, %v7233_v23  ;;  %v7189_v2 = vld [vmem:[#allocation11 + $0x960] sm:$0xff] }
 0x534   :  { %7932 = vmatpush1.bf16.msra.mxu1 %v9085_v57  ;;  %v9160_v57 = vcombine.high %v7230_v24, %v7234_v58  ;;  %v7226_v63 = vld [vmem:[#allocation11 + $0xde8] sm:$0xff]  ;;  %v9159_v35 = vcombine.low %v7230_v24, %v7234_v58  ;;  %v7181_v17 = vld [vmem:[#allocation11 + $0x860] sm:$0xff]  ;;  %v7175_v58 = vld [vmem:[#allocation11 + $0x770] sm:$0xff] }
 0x535   :  { %7973 = vmatpush1.bf16.msra.mxu0 %v9087_v30  ;;  %7933 = vmatprep.subr.bf16.mxu1 %v9078_v31  ;;  %v7225_v30 = vld [vmem:[#allocation11 + $0xde0] sm:$0xff]  ;;  %v7222_v31 = vld [vmem:[#allocation11 + $0xd68] sm:$0xff] }
 0x536   :  { %7974 = vmatprep.subr.bf16.mxu0 %v9080_v34  ;;  %v9157_v34 = vcombine.low %v7229_v22, %v7233_v23  ;;  %v9150_v36 = vcombine.high %v7221_v10, %v7225_v30  ;;  %v9152_v38 = vcombine.high %v7222_v31, %v7226_v63  ;;  %v9151_v43 = vcombine.low %v7222_v31, %v7226_v63  ;;  %v7167_v63 = vld [vmem:[#allocation11 + $0x670] sm:$0xff] }
 0x538   :  { %7934 = vmatpush1.bf16.msra.mxu1 %v9077_v39  ;;  %v7217_v39 = vld [vmem:[#allocation11 + $0xce0] sm:$0xff] }
 0x539   :  { %7975 = vmatpush1.bf16.msra.mxu0 %v9079_v40  ;;  %7935 = vmatprep.subr.bf16.mxu1 %v9070_v41  ;;  %v7214_v40 = vld [vmem:[#allocation11 + $0xc68] sm:$0xff]  ;;  %v9142_v44 = vcombine.high %v7213_v0, %v7217_v39 }
 0x53a   :  { %7976 = vmatprep.subr.bf16.mxu0 %v9072_v42  ;;  %v7218_v41 = vld [vmem:[#allocation11 + $0xce8] sm:$0xff]  ;;  %v9149_v42 = vcombine.low %v7221_v10, %v7225_v30 }
 0x53b   :  { %v9144_v46 = vcombine.high %v7214_v40, %v7218_v41  ;;  %v9143_v53 = vcombine.low %v7214_v40, %v7218_v41  ;;  %v5306_v41 = vrot.slane %v10363_v47, %v10346_v9 }
 0x53c   :  { %7936 = vmatpush1.bf16.msra.mxu1 %v9069_v19  ;;  %v7209_v19 = vld [vmem:[#allocation11 + $0xbe0] sm:$0xff] }
 0x53d   :  { %7977 = vmatpush1.bf16.msra.mxu0 %v9071_v50  ;;  %7937 = vmatprep.subr.bf16.mxu1 %v9062_v51  ;;  %v7206_v50 = vld [vmem:[#allocation11 + $0xb68] sm:$0xff]  ;;  %v9134_v8 = vcombine.high %v7205_v48, %v7209_v19 }
 0x53e   :  { %7978 = vmatprep.subr.bf16.mxu0 %v9064_v52  ;;  %v7210_v51 = vld [vmem:[#allocation11 + $0xbe8] sm:$0xff]  ;;  %v9141_v52 = vcombine.low %v7213_v0, %v7217_v39  ;;  %v7172_v0 = vld [vmem:[#allocation11 + $0x6f8] sm:$0xff]  ;;  %v5310_v39 = vrot.slane %v10363_v47, %v10343_v1 }
 0x53f   :  { %v9136_v11 = vcombine.high %v7206_v50, %v7210_v51  ;;  %v9135_v59 = vcombine.low %v7206_v50, %v7210_v51  ;;  %v7160_v50 = vld [vmem:[#allocation11 + $0x578] sm:$0xff] }
 0x540   :  { %7938 = vmatpush1.bf16.msra.mxu1 %v9061_v54  ;;  %v7201_v54 = vld [vmem:[#allocation11 + $0xae0] sm:$0xff]  ;;  %v7164_v51 = vld [vmem:[#allocation11 + $0x5f8] sm:$0xff] }
 0x541   :  { %7979 = vmatpush1.bf16.msra.mxu0 %v9063_v55  ;;  %7939 = vmatprep.subr.bf16.mxu1 %v9054_v26  ;;  %v7198_v55 = vld [vmem:[#allocation11 + $0xa68] sm:$0xff]  ;;  %v9126_v60 = vcombine.high %v7197_v14, %v7201_v54 }
 0x542   :  { %7980 = vmatprep.subr.bf16.mxu0 %v9056_v56  ;;  %v7202_v26 = vld [vmem:[#allocation11 + $0xae8] sm:$0xff]  ;;  %v9133_v56 = vcombine.low %v7205_v48, %v7209_v19  ;;  %v5314_v48 = vrot.slane %v10363_v47, %v10349_v45 }
 0x543   :  { %v9128_v61 = vcombine.high %v7198_v55, %v7202_v26  ;;  %v9127_v15 = vcombine.low %v7198_v55, %v7202_v26 }
 0x544   :  { %7940 = vmatpush1.bf16.msra.mxu1 %v9053_v5  ;;  %v7193_v5 = vld [vmem:[#allocation11 + $0x9e0] sm:$0xff] }
 0x545   :  { %7981 = vmatpush1.bf16.msra.mxu0 %v9055_v7  ;;  %7941 = vmatprep.subr.bf16.mxu1 %v9046_v12  ;;  %v7190_v7 = vld [vmem:[#allocation11 + $0x968] sm:$0xff]  ;;  %v9118_v16 = vcombine.high %v7189_v2, %v7193_v5 }
 0x546   :  { %7982 = vmatprep.subr.bf16.mxu0 %v9048_v13  ;;  %v7194_v12 = vld [vmem:[#allocation11 + $0x9e8] sm:$0xff]  ;;  %v9125_v13 = vcombine.low %v7197_v14, %v7201_v54 }
 0x547   :  { %v9120_v49 = vcombine.high %v7190_v7, %v7194_v12  ;;  %v9119_v22 = vcombine.low %v7190_v7, %v7194_v12  ;;  %v7156_v7 = vld [vmem:[#allocation11 + $0x4f8] sm:$0xff] }
 0x548   :  { %7942 = vmatpush1.bf16.msra.mxu1 %v9045_v18  ;;  %v7185_v18 = vld [vmem:[#allocation11 + $0x8e0] sm:$0xff] }
 0x549   :  { %7983 = vmatpush1.bf16.msra.mxu0 %v9047_v20  ;;  %7943 = vmatprep.subr.bf16.mxu1 %v9166_v25  ;;  %v7182_v20 = vld [vmem:[#allocation11 + $0x868] sm:$0xff]  ;;  %v9110_v23 = vcombine.high %v7181_v17, %v7185_v18 }
 0x54a   :  { %7984 = vmatprep.subr.bf16.mxu0 %v9168_v21  ;;  %v7186_v25 = vld [vmem:[#allocation11 + $0x8e8] sm:$0xff]  ;;  %v9117_v21 = vcombine.low %v7189_v2, %v7193_v5  ;;  %v7152_v5 = vld [vmem:[#allocation11 + $0x478] sm:$0xff] }
 0x54b   :  { %v9112_v24 = vcombine.high %v7182_v20, %v7186_v25  ;;  %v9111_v10 = vcombine.low %v7182_v20, %v7186_v25  ;;  %v7147_v20 = vld [vmem:[#allocation11 + $0x3f0] sm:$0xff]  ;;  %v7144_v25 = vld [vmem:[#allocation11 + $0x378] sm:$0xff] }
 0x54c   :  { %7944 = vmatpush2.bf16.msra.mxu1 %v9165_v27  ;;  %v7179_v27 = vld [vmem:[#allocation11 + $0x7f0] sm:$0xff] }
 0x54d   :  { %7985 = vmatpush2.bf16.msra.mxu0 %v9167_v6  ;;  %7945 = vmatprep.subr.bf16.mxu1 %v9158_v28  ;;  %v7176_v6 = vld [vmem:[#allocation11 + $0x778] sm:$0xff]  ;;  %v9106_v30 = vcombine.high %v7175_v58, %v7179_v27 }
 0x54e   :  { %7986 = vmatprep.subr.bf16.mxu0 %v9160_v57  ;;  %v7180_v28 = vld [vmem:[#allocation11 + $0x7f8] sm:$0xff]  ;;  %v9109_v57 = vcombine.low %v7181_v17, %v7185_v18  ;;  %v9084_v17 = vcombine.high %v7152_v5, %v7156_v7  ;;  %v7143_v18 = vld [vmem:[#allocation11 + $0x370] sm:$0xff] }
 0x54f   :  { %v9108_v31 = vcombine.high %v7176_v6, %v7180_v28  ;;  %v9107_v40 = vcombine.low %v7176_v6, %v7180_v28  ;;  %v7139_v6 = vld [vmem:[#allocation11 + $0x2f0] sm:$0xff]  ;;  %v7136_v28 = vld [vmem:[#allocation11 + $0x278] sm:$0xff] }
 0x550   :  { %7946 = vmatpush2.bf16.msra.mxu1 %v9157_v34  ;;  %v7171_v34 = vld [vmem:[#allocation11 + $0x6f0] sm:$0xff] }
 0x551   :  { %7987 = vmatpush2.bf16.msra.mxu0 %v9159_v35  ;;  %7947 = vmatprep.subr.bf16.mxu1 %v9150_v36  ;;  %v5302_v35 = vrot.slane %v10363_v47, %v10340_v62  ;;  %v9105_v36 = vcombine.low %v7175_v58, %v7179_v27  ;;  %v7135_v27 = vld [vmem:[#allocation11 + $0x270] sm:$0xff] }
 0x552   :  { %7988 = vmatprep.subr.bf16.mxu0 %v9152_v38  ;;  %v7168_v38 = vld [vmem:[#allocation11 + $0x678] sm:$0xff] }
 0x553   :  { %v9100_v19 = vcombine.high %v7168_v38, %v7172_v0  ;;  %v9099_v54 = vcombine.low %v7168_v38, %v7172_v0  ;;  %v7132_v38 = vld [vmem:[#allocation11 + $0x1f8] sm:$0xff]  ;;  %v9065_v0 = vcombine.low %v7135_v27, %v7139_v6 }
 0x554   :  { %7948 = vmatpush2.bf16.msra.mxu1 %v9149_v42  ;;  %v9098_v42 = vcombine.high %v7167_v63, %v7171_v34 }
 0x555   :  { %7989 = vmatpush2.bf16.msra.mxu0 %v9151_v43  ;;  %7949 = vmatprep.subr.bf16.mxu1 %v9142_v44  ;;  %v7159_v43 = vld [vmem:[#allocation11 + $0x570] sm:$0xff] }
 0x556   :  { %7990 = vmatprep.subr.bf16.mxu0 %v9144_v46  ;;  %v7163_v44 = vld [vmem:[#allocation11 + $0x5f0] sm:$0xff] }
 0x557   :  { %v9090_v55 = vcombine.high %v7159_v43, %v7163_v44 }
 0x558   :  { %7950 = vmatpush2.bf16.msra.mxu1 %v9141_v52 }
 0x559   :  { %7991 = vmatpush2.bf16.msra.mxu0 %v9143_v53  ;;  %7951 = vmatprep.subr.bf16.mxu1 %v9134_v8  ;;  %v9097_v8 = vcombine.low %v7167_v63, %v7171_v34  ;;  %v7127_v34 = vld [vmem:[#allocation11 + $0x170] sm:$0xff] }
 0x55a   :  { %7992 = vmatprep.subr.bf16.mxu0 %v9136_v11 }
 0x55c   :  { %7952 = vmatpush2.bf16.msra.mxu1 %v9133_v56  ;;  %v9092_v56 = vcombine.high %v7160_v50, %v7164_v51 }
 0x55d   :  { %7993 = vmatpush2.bf16.msra.mxu0 %v9135_v59  ;;  %7953 = vmatprep.subr.bf16.mxu1 %v9126_v60  ;;  %v7151_v59 = vld [vmem:[#allocation11 + $0x470] sm:$0xff] }
 0x55e   :  { %7994 = vmatprep.subr.bf16.mxu0 %v9128_v61  ;;  %v7155_v60 = vld [vmem:[#allocation11 + $0x4f0] sm:$0xff] }
 0x560   :  { %7954 = vmatpush2.bf16.msra.mxu1 %v9125_v13  ;;  %v9089_v13 = vcombine.low %v7159_v43, %v7163_v44  ;;  %v7123_v43 = vld [vmem:[#allocation11 + $0xf0] sm:$0xff]  ;;  %v7120_v44 = vld [vmem:[#allocation11 + $0x78] sm:$0xff] }
 0x561   :  { %7995 = vmatpush2.bf16.msra.mxu0 %v9127_v15  ;;  %7955 = vmatprep.subr.bf16.mxu1 %v9118_v16  ;;  %v9082_v16 = vcombine.high %v7151_v59, %v7155_v60 }
 0x562   :  { %7996 = vmatprep.subr.bf16.mxu0 %v9120_v49 }
 0x564   :  { %7956 = vmatpush2.bf16.msra.mxu1 %v9117_v21  ;;  %v7148_v21 = vld [vmem:[#allocation11 + $0x3f8] sm:$0xff] }
 0x565   :  { %7997 = vmatpush2.bf16.msra.mxu0 %v9119_v22  ;;  %7957 = vmatprep.subr.bf16.mxu1 %v9110_v23  ;;  %v9081_v22 = vcombine.low %v7151_v59, %v7155_v60  ;;  %v9083_v23 = vcombine.low %v7152_v5, %v7156_v7  ;;  %v9076_v58 = vcombine.high %v7144_v25, %v7148_v21  ;;  %v7232_v59 = vld [vmem:[#allocation11 + $0xe78] sm:$0xff] }
 0x566   :  { %7998 = vmatprep.subr.bf16.mxu0 %v9112_v24  ;;  %v9074_v24 = vcombine.high %v7143_v18, %v7147_v20  ;;  %v7236_v60 = vld [vmem:[#allocation11 + $0xef8] sm:$0xff] }
 0x567   :  { %v9164_v7 = vcombine.high %v7232_v59, %v7236_v60 }
 0x568   :  { %7958 = vmatpush2.bf16.msra.mxu1 %v9109_v57  ;;  %v7140_v57 = vld [vmem:[#allocation11 + $0x2f8] sm:$0xff] }
 0x569   :  { %7999 = vmatpush2.bf16.msra.mxu0 %v9111_v10  ;;  %8009 = vmatprep.subr.bf16.mxu1 %v9106_v30  ;;  %v9073_v10 = vcombine.low %v7143_v18, %v7147_v20  ;;  %v9075_v30 = vcombine.low %v7144_v25, %v7148_v21  ;;  %v9068_v63 = vcombine.high %v7136_v28, %v7140_v57  ;;  %v7215_v20 = vld [vmem:[#allocation11 + $0xc70] sm:$0xff]  ;;  %v7216_v21 = vld [vmem:[#allocation11 + $0xc78] sm:$0xff] }
 0x56a   :  { %8050 = vmatprep.subr.bf16.mxu0 %v9108_v31  ;;  %v9066_v31 = vcombine.high %v7135_v27, %v7139_v6  ;;  %v7219_v25 = vld [vmem:[#allocation11 + $0xcf0] sm:$0xff] }
 0x56b   :  { %v6079_v46 = vpop.f32.mrf.mxu1  ;;  %7960 = vmatmul.mubr.bf16.vlgmr.msra.gmra.mxu1 %v10303_v4  ;;  %v7207_v6 = vld [vmem:[#allocation11 + $0xb70] sm:$0xff] }
 0x56c   :  { %v6080_v52 = vadd.f32 %v6079_v46, %v5302_v35  ;;  %v6120_v53 = vpop.f32.mrf.mxu0  ;;  %8001 = vmatmul.mubr.bf16.vlgmr.msra.gmra.mxu0 %v10303_v4  ;;  %8010 = vmatpush1.bf16.msra.mxu1 %v9105_v36  ;;  %v7131_v35 = vld [vmem:[#allocation11 + $0x1f0] sm:$0xff]  ;;  %v7128_v36 = vld [vmem:[#allocation11 + $0x178] sm:$0xff] }
 0x56d   :  { %v6121_v11 = vadd.f32 %v6120_v53, %v5310_v39  ;;  %8041 = vmatprep.mubr.bf16.mxu1 %v10301_v3  ;;  %8051 = vmatpush1.bf16.msra.mxu0 %v9107_v40  ;;  %v6081_v14 = vpop.f32.mrf.mxu1  ;;  %v9067_v39 = vcombine.low %v7136_v28, %v7140_v57  ;;  %v9058_v40 = vcombine.high %v7127_v34, %v7131_v35  ;;  %v7124_v46 = vld [vmem:[#allocation11 + $0xf8] sm:$0xff]  ;;  %v7243_v53 = vld [vmem:[#allocation11 + $0xff0] sm:$0xff] }
 0x56e   :  { %6131 = vst [vmem:[#allocation14 + $0x60] sm:$0xff] %v6080_v52  ;;  %8082 = vmatprep.mubr.bf16.mxu0 %v10301_v3  ;;  %v6082_v47 = vadd.f32 %v6081_v14, %v5306_v41  ;;  %v6122_v26 = vpop.f32.mrf.mxu0  ;;  %8011 = vmatprep.subr.bf16.mxu1 %v9098_v42  ;;  %v9091_v3 = vcombine.low %v7160_v50, %v7164_v51  ;;  %v7119_v42 = vld [vmem:[#allocation11 + $0x70] sm:$0xff]  ;;  %v7208_v57 = vld [vmem:[#allocation11 + $0xb78] sm:$0xff] }
 0x56f   :  { %6133 = vst [vmem:[#allocation14 + $0x70] sm:$0xff] %v6121_v11  ;;  %v6123_v61 = vadd.f32 %v6122_v26, %v5314_v48  ;;  %v6083_v2 = vpop.f32.mrf.mxu1  ;;  %8052 = vmatprep.subr.bf16.mxu0 %v9100_v19  ;;  %v9060_v41 = vcombine.high %v7128_v36, %v7132_v38  ;;  %v9057_v48 = vcombine.low %v7127_v34, %v7131_v35  ;;  %v7239_v52 = vld [vmem:[#allocation11 + $0xf70] sm:$0xff]  ;;  %v7244_v11 = vld [vmem:[#allocation11 + $0xff8] sm:$0xff] }
 0x570   :  { %6132 = vst [vmem:[#allocation14 + $0x68] sm:$0xff] %v6082_v47  ;;  %v6124_v12 = vpop.f32.mrf.mxu0  ;;  %8012 = vmatpush1.bf16.msra.mxu1 %v9097_v8  ;;  %v9059_v19 = vcombine.low %v7128_v36, %v7132_v38  ;;  %v9050_v50 = vcombine.high %v7119_v42, %v7123_v43  ;;  %v9052_v51 = vcombine.high %v7120_v44, %v7124_v46  ;;  %v7240_v8 = vld [vmem:[#allocation11 + $0xf78] sm:$0xff]  ;;  %v7231_v26 = vld [vmem:[#allocation11 + $0xe70] sm:$0xff] }
 0x571   :  { %6134 = vst [vmem:[#allocation14 + $0x78] sm:$0xff] %v6123_v61  ;;  %8053 = vmatpush1.bf16.msra.mxu0 %v9099_v54  ;;  %v6084_v15 = vpop.f32.mrf.mxu1  ;;  %8013 = vmatprep.subr.bf16.mxu1 %v9090_v55  ;;  %v9049_v14 = vcombine.low %v7119_v42, %v7123_v43  ;;  %v9051_v54 = vcombine.low %v7120_v44, %v7124_v46  ;;  %v7223_v12 = vld [vmem:[#allocation11 + $0xd70] sm:$0xff]  ;;  %v7200_v38 = vld [vmem:[#allocation11 + $0xa78] sm:$0xff] }
 0x572   :  { %v6125_v49 = vpop.f32.mrf.mxu0  ;;  %8054 = vmatprep.subr.bf16.mxu0 %v9092_v56  ;;  %v9170_v55 = vcombine.high %v7239_v52, %v7243_v53  ;;  %v9172_v47 = vcombine.high %v7240_v8, %v7244_v11  ;;  %v7235_v56 = vld [vmem:[#allocation11 + $0xef0] sm:$0xff]  ;;  %v9169_v61 = vcombine.low %v7239_v52, %v7243_v53  ;;  %v9171_v2 = vcombine.low %v7240_v8, %v7244_v11  ;;  %v7224_v15 = vld [vmem:[#allocation11 + $0xd78] sm:$0xff] }
 0x573   :  { %v9162_v5 = vcombine.high %v7231_v26, %v7235_v56  ;;  %v9163_v49 = vcombine.low %v7232_v59, %v7236_v60  ;;  %v7211_v28 = vld [vmem:[#allocation11 + $0xbf0] sm:$0xff]  ;;  %v7192_v46 = vld [vmem:[#allocation11 + $0x978] sm:$0xff] }
 0x574   :  { %8014 = vmatpush1.bf16.msra.mxu1 %v9089_v13  ;;  %v7227_v13 = vld [vmem:[#allocation11 + $0xdf0] sm:$0xff]  ;;  %v7184_v11 = vld [vmem:[#allocation11 + $0x878] sm:$0xff] }
 0x575   :  { %8055 = vmatpush1.bf16.msra.mxu0 %v9091_v3  ;;  %8015 = vmatprep.subr.bf16.mxu1 %v9082_v16  ;;  %v7228_v3 = vld [vmem:[#allocation11 + $0xdf8] sm:$0xff]  ;;  %v9161_v16 = vcombine.low %v7231_v26, %v7235_v56  ;;  %v7199_v35 = vld [vmem:[#allocation11 + $0xa70] sm:$0xff] }
 0x576   :  { %8056 = vmatprep.subr.bf16.mxu0 %v9084_v17  ;;  %v9154_v17 = vcombine.high %v7223_v12, %v7227_v13  ;;  %v9156_v18 = vcombine.high %v7224_v15, %v7228_v3  ;;  %v7203_v36 = vld [vmem:[#allocation11 + $0xaf0] sm:$0xff] }
 0x577   :  { %v7191_v43 = vld [vmem:[#allocation11 + $0x970] sm:$0xff] }
 0x578   :  { %8016 = vmatpush1.bf16.msra.mxu1 %v9081_v22  ;;  %v7220_v22 = vld [vmem:[#allocation11 + $0xcf8] sm:$0xff]  ;;  %v7195_v44 = vld [vmem:[#allocation11 + $0x9f0] sm:$0xff] }
 0x579   :  { %8057 = vmatpush1.bf16.msra.mxu0 %v9083_v23  ;;  %8017 = vmatprep.subr.bf16.mxu1 %v9074_v24  ;;  %v9153_v23 = vcombine.low %v7223_v12, %v7227_v13  ;;  %v9155_v24 = vcombine.low %v7224_v15, %v7228_v3  ;;  %v9148_v27 = vcombine.high %v7216_v21, %v7220_v22  ;;  %v7183_v53 = vld [vmem:[#allocation11 + $0x870] sm:$0xff] }
 0x57a   :  { %8058 = vmatprep.subr.bf16.mxu0 %v9076_v58  ;;  %v9146_v58 = vcombine.high %v7215_v20, %v7219_v25  ;;  %v7187_v8 = vld [vmem:[#allocation11 + $0x8f0] sm:$0xff] }
 0x57b   :  { %v9113_v56 = vcombine.low %v7183_v53, %v7187_v8  ;;  %v6263_v60 = vld [vmem:[#allocation13 + $0x10] sm:$0xff] }
 0x57c   :  { %8018 = vmatpush1.bf16.msra.mxu1 %v9073_v10  ;;  %v7212_v10 = vld [vmem:[#allocation11 + $0xbf8] sm:$0xff]  ;;  %v6280_v12 = vrot.slane %v6263_v60, %v10325_v33 }
 0x57d   :  { %8059 = vmatpush1.bf16.msra.mxu0 %v9075_v30  ;;  %8019 = vmatprep.subr.bf16.mxu1 %v9066_v31  ;;  %v9145_v30 = vcombine.low %v7215_v20, %v7219_v25  ;;  %v9147_v31 = vcombine.low %v7216_v21, %v7220_v22  ;;  %v9140_v34 = vcombine.high %v7208_v57, %v7212_v10 }
 0x57e   :  { %8060 = vmatprep.subr.bf16.mxu0 %v9068_v63  ;;  %v9138_v63 = vcombine.high %v7207_v6, %v7211_v28 }
 0x580   :  { %8020 = vmatpush1.bf16.msra.mxu1 %v9065_v0  ;;  %v7204_v0 = vld [vmem:[#allocation11 + $0xaf8] sm:$0xff] }
 0x581   :  { %8061 = vmatpush1.bf16.msra.mxu0 %v9067_v39  ;;  %8021 = vmatprep.subr.bf16.mxu1 %v9058_v40  ;;  %v9137_v39 = vcombine.low %v7207_v6, %v7211_v28  ;;  %v9139_v40 = vcombine.low %v7208_v57, %v7212_v10  ;;  %v9132_v42 = vcombine.high %v7200_v38, %v7204_v0 }
 0x582   :  { %8062 = vmatprep.subr.bf16.mxu0 %v9060_v41  ;;  %v9130_v41 = vcombine.high %v7199_v35, %v7203_v36 }
 0x584   :  { %8022 = vmatpush1.bf16.msra.mxu1 %v9057_v48  ;;  %v7196_v48 = vld [vmem:[#allocation11 + $0x9f8] sm:$0xff] }
 0x585   :  { %8063 = vmatpush1.bf16.msra.mxu0 %v9059_v19  ;;  %8023 = vmatprep.subr.bf16.mxu1 %v9050_v50  ;;  %v9129_v19 = vcombine.low %v7199_v35, %v7203_v36  ;;  %v9131_v50 = vcombine.low %v7200_v38, %v7204_v0  ;;  %v9124_v52 = vcombine.high %v7192_v46, %v7196_v48  ;;  %v7245_v0 = vld [vmem:[#allocation13 + $0x18] sm:$0xff] }
 0x586   :  { %8064 = vmatprep.subr.bf16.mxu0 %v9052_v51  ;;  %v9122_v51 = vcombine.high %v7191_v43, %v7195_v44 }
 0x588   :  { %8024 = vmatpush1.bf16.msra.mxu1 %v9049_v14  ;;  %v7188_v14 = vld [vmem:[#allocation11 + $0x8f8] sm:$0xff] }
 0x589   :  { %8065 = vmatpush1.bf16.msra.mxu0 %v9051_v54  ;;  %8025 = vmatprep.subr.bf16.mxu1 %v9170_v55  ;;  %v9121_v54 = vcombine.low %v7191_v43, %v7195_v44  ;;  %v9123_v55 = vcombine.low %v7192_v46, %v7196_v48  ;;  %v9116_v26 = vcombine.high %v7184_v11, %v7188_v14 }
 0x58a   :  { %8066 = vmatprep.subr.bf16.mxu0 %v9172_v47  ;;  %v9114_v47 = vcombine.high %v7183_v53, %v7187_v8  ;;  %v9115_v59 = vcombine.low %v7184_v11, %v7188_v14  ;;  %v7262_v43 = vrot.slane %v7245_v0, %v10325_v33  ;;  %v7274_v11 = vrot.slane %v7245_v0, %v10343_v1 }
 0x58b   :  { %v7270_v33 = vrot.slane %v7245_v0, %v10346_v9 }
 0x58c   :  { %8026 = vmatpush2.bf16.msra.mxu1 %v9169_v61  ;;  %v6268_v61 = vrot.slane %v6263_v60, %v10245_v32 }
 0x58d   :  { %8067 = vmatpush2.bf16.msra.mxu0 %v9171_v2  ;;  %8027 = vmatprep.subr.bf16.mxu1 %v9162_v5  ;;  %v6276_v2 = vrot.slane %v6263_v60, %v10320_v29  ;;  %v6272_v5 = vrot.slane %v6263_v60, %v10248_v37 }
 0x58e   :  { %8068 = vmatprep.subr.bf16.mxu0 %v9164_v7 }
 0x590   :  { %8028 = vmatpush2.bf16.msra.mxu1 %v9161_v16 }
 0x591   :  { %8069 = vmatpush2.bf16.msra.mxu0 %v9163_v49  ;;  %8029 = vmatprep.subr.bf16.mxu1 %v9154_v17 }
 0x592   :  { %8070 = vmatprep.subr.bf16.mxu0 %v9156_v18 }
 0x594   :  { %8030 = vmatpush2.bf16.msra.mxu1 %v9153_v23  ;;  %v6284_v23 = vrot.slane %v6263_v60, %v10340_v62 }
 0x595   :  { %8071 = vmatpush2.bf16.msra.mxu0 %v9155_v24  ;;  %8031 = vmatprep.subr.bf16.mxu1 %v9146_v58  ;;  %v6292_v24 = vrot.slane %v6263_v60, %v10343_v1  ;;  %v6288_v58 = vrot.slane %v6263_v60, %v10346_v9 }
 0x596   :  { %8072 = vmatprep.subr.bf16.mxu0 %v9148_v27  ;;  %v6296_v27 = vrot.slane %v6263_v60, %v10349_v45 }
 0x598   :  { %8032 = vmatpush2.bf16.msra.mxu1 %v9145_v30 }
 0x599   :  { %8073 = vmatpush2.bf16.msra.mxu0 %v9147_v31  ;;  %8033 = vmatprep.subr.bf16.mxu1 %v9138_v63 }
 0x59a   :  { %8074 = vmatprep.subr.bf16.mxu0 %v9140_v34 }
 0x59c   :  { %8034 = vmatpush2.bf16.msra.mxu1 %v9137_v39  ;;  %v7250_v39 = vrot.slane %v7245_v0, %v10245_v32 }
 0x59d   :  { %8075 = vmatpush2.bf16.msra.mxu0 %v9139_v40  ;;  %8035 = vmatprep.subr.bf16.mxu1 %v9130_v41  ;;  %v7258_v40 = vrot.slane %v7245_v0, %v10320_v29  ;;  %v7254_v41 = vrot.slane %v7245_v0, %v10248_v37  ;;  %v7266_v37 = vrot.slane %v7245_v0, %v10340_v62 }
 0x59e   :  { %8076 = vmatprep.subr.bf16.mxu0 %v9132_v42 }
 0x5a0   :  { %8036 = vmatpush2.bf16.msra.mxu1 %v9129_v19 }
 0x5a1   :  { %8077 = vmatpush2.bf16.msra.mxu0 %v9131_v50  ;;  %8037 = vmatprep.subr.bf16.mxu1 %v9122_v51 }
 0x5a2   :  { %8078 = vmatprep.subr.bf16.mxu0 %v9124_v52 }
 0x5a4   :  { %8038 = vmatpush2.bf16.msra.mxu1 %v9121_v54  ;;  %v7278_v54 = vrot.slane %v7245_v0, %v10349_v45 }
 0x5a5   :  { %8079 = vmatpush2.bf16.msra.mxu0 %v9123_v55  ;;  %8039 = vmatprep.subr.bf16.mxu1 %v9114_v47 }
 0x5a6   :  { %8080 = vmatprep.subr.bf16.mxu0 %v9116_v26 }
 0x5a8   :  { %8040 = vmatpush2.bf16.msra.mxu1 %v9113_v56 }
 0x5a9   :  { %8081 = vmatpush2.bf16.msra.mxu0 %v9115_v59 }
 0x5ab   :  { %v6979_v7 = vpop.f32.mrf.mxu1  ;;  %8042 = vmatmul.mubr.bf16.vlgmr.msra.gmra.mxu1 %v10303_v4 }
 0x5ac   :  { %v6980_v13 = vadd.f32 %v6979_v7, %v6268_v61  ;;  %v7020_v15 = vpop.f32.mrf.mxu0  ;;  %8083 = vmatmul.mubr.bf16.vlgmr.msra.gmra.mxu0 %v10303_v4 }
 0x5ad   :  { %v7021_v3 = vadd.f32 %v7020_v15, %v6276_v2  ;;  %v6981_v16 = vpop.f32.mrf.mxu1 }
 0x5ae   :  { %7109 = vst [vmem:[#allocation14 + $0x80] sm:$0xff] %v6980_v13  ;;  %v6982_v49 = vadd.f32 %v6981_v16, %v6272_v5  ;;  %v7022_v17 = vpop.f32.mrf.mxu0 }
 0x5af   :  { %7111 = vst [vmem:[#allocation14 + $0x90] sm:$0xff] %v7021_v3  ;;  %v7023_v18 = vadd.f32 %v7022_v17, %v6280_v12  ;;  %v6983_v20 = vpop.f32.mrf.mxu1 }
 0x5b0   :  { %7110 = vst [vmem:[#allocation14 + $0x88] sm:$0xff] %v6982_v49  ;;  %v7024_v25 = vpop.f32.mrf.mxu0 }
 0x5b1   :  { %7112 = vst [vmem:[#allocation14 + $0x98] sm:$0xff] %v7023_v18  ;;  %v6984_v21 = vpop.f32.mrf.mxu1 }
 0x5b2   :  { %v7025_v22 = vpop.f32.mrf.mxu0 }
 0x5eb   :  { %v7061_v4 = vpop.f32.mrf.mxu1 }
 0x5ec   :  { %v7062_v6 = vadd.f32 %v7061_v4, %v6284_v23  ;;  %v7102_v28 = vpop.f32.mrf.mxu0 }
 0x5ed   :  { %v7103_v57 = vadd.f32 %v7102_v28, %v6292_v24  ;;  %v7063_v10 = vpop.f32.mrf.mxu1 }
 0x5ee   :  { %7113 = vst [vmem:[#allocation14 + $0xa0] sm:$0xff] %v7062_v6  ;;  %v7064_v30 = vadd.f32 %v7063_v10, %v6288_v58  ;;  %v7104_v31 = vpop.f32.mrf.mxu0 }
 0x5ef   :  { %7115 = vst [vmem:[#allocation14 + $0xb0] sm:$0xff] %v7103_v57  ;;  %v7105_v63 = vadd.f32 %v7104_v31, %v6296_v27  ;;  %v7065_v34 = vpop.f32.mrf.mxu1 }
 0x5f0   :  { %7114 = vst [vmem:[#allocation14 + $0xa8] sm:$0xff] %v7064_v30  ;;  %v7106_v35 = vpop.f32.mrf.mxu0 }
 0x5f1   :  { %7116 = vst [vmem:[#allocation14 + $0xb8] sm:$0xff] %v7105_v63  ;;  %v7066_v36 = vpop.f32.mrf.mxu1 }
 0x5f2   :  { %v7107_v38 = vpop.f32.mrf.mxu0 }
 0x62b   :  { %v7961_v42 = vpop.f32.mrf.mxu1 }
 0x62c   :  { %v7962_v44 = vadd.f32 %v7961_v42, %v7250_v39  ;;  %v8002_v46 = vpop.f32.mrf.mxu0 }
 0x62d   :  { %v8003_v48 = vadd.f32 %v8002_v46, %v7258_v40  ;;  %v7963_v19 = vpop.f32.mrf.mxu1 }
 0x62e   :  { %8091 = vst [vmem:[#allocation14 + $0xc0] sm:$0xff] %v7962_v44  ;;  %v7964_v50 = vadd.f32 %v7963_v19, %v7254_v41  ;;  %v8004_v51 = vpop.f32.mrf.mxu0 }
 0x62f   :  { %8093 = vst [vmem:[#allocation14 + $0xd0] sm:$0xff] %v8003_v48  ;;  %v8005_v52 = vadd.f32 %v8004_v51, %v7262_v43  ;;  %v7965_v53 = vpop.f32.mrf.mxu1 }
 0x630   :  { %8092 = vst [vmem:[#allocation14 + $0xc8] sm:$0xff] %v7964_v50  ;;  %v8006_v8 = vpop.f32.mrf.mxu0 }
 0x631   :  { %8094 = vst [vmem:[#allocation14 + $0xd8] sm:$0xff] %v8005_v52  ;;  %v7966_v32 = vpop.f32.mrf.mxu1 }
 0x632   :  { %v8007_v29 = vpop.f32.mrf.mxu0 }
 0x66b   :  { %v8043_v14 = vpop.f32.mrf.mxu1 }
 0x66c   :  { %v8044_v55 = vadd.f32 %v8043_v14, %v7266_v37  ;;  %v8084_v47 = vpop.f32.mrf.mxu0 }
 0x66d   :  { %v8085_v26 = vadd.f32 %v8084_v47, %v7274_v11  ;;  %v8045_v56 = vpop.f32.mrf.mxu1 }
 0x66e   :  { %8095 = vst [vmem:[#allocation14 + $0xe0] sm:$0xff] %v8044_v55  ;;  %v8046_v59 = vadd.f32 %v8045_v56, %v7270_v33  ;;  %v8086_v60 = vpop.f32.mrf.mxu0 }
 0x66f   :  { %8097 = vst [vmem:[#allocation14 + $0xf0] sm:$0xff] %v8085_v26  ;;  %v8087_v61 = vadd.f32 %v8086_v60, %v7278_v54  ;;  %v8047_v2 = vpop.f32.mrf.mxu1 }
 0x670   :  { %8096 = vst [vmem:[#allocation14 + $0xe8] sm:$0xff] %v8046_v59  ;;  %v8088_v62 = vpop.f32.mrf.mxu0 }
 0x671   :  { %8098 = vst [vmem:[#allocation14 + $0xf8] sm:$0xff] %v8087_v61  ;;  %v8048_v1 = vpop.f32.mrf.mxu1 }
 0x672   :  { %v8089_v9 = vpop.f32.mrf.mxu0 }
 0x673   :  { %10151 = shalt.err (!%p10148_p11)
}
 0x674   :  { %8108 = dma.vmem_to_hbm [thread:$0]  %s8106_s6, 4096, %s10417_s7, [#allocation4]  }
 0x675   :  { %10168 = dma.done.wait [#allocation4], 4096  }
 0x676   :  { %10169 = vsyncadd [#allocation4], 4294963200 }
 0x677   :  { %8112 = vsyncpa [#allocation3], 1 }
 0x678   :  { %8113 = vsyncpa [#allocation6], 1 }
 0x679   :  { %8114 = vsyncpa [#allocation9], 1 }
 0x67a   :  { %8115 = vsyncpa [#allocation12], 1 }
 0x67b   :  { %8116 = vsyncpa [#allocation4], 1 }

</bundles_post_ra>
